<compile_context>
chip_gen: v6e
topology: v6e:2x2x1
jax: 0.10.0
libtpu: 0.0.40
codegen_flags: <defaults>
</compile_context>

<pallas_src>
import math

import jax
import jax.numpy as jnp
import numpy as np
from jax.experimental import pallas as pl
from jax.experimental.pallas import tpu as pltpu

# ---------------- model hyper-parameters (small, consistent with the module) ----
DEPTH = 2
EMBED_DIM = 32
NUM_HEADS = 4
HEAD_DIM = EMBED_DIM // NUM_HEADS
HIDDEN = 4 * EMBED_DIM
PATCH_SIZE = 3
STRIDE = 2
IN_CH = 3
IMG = 16                                   # H = W = 16 -> conv out 7x7 == (H-1)//stride
LN_EPS = 1e-5
K_RAW = IN_CH * PATCH_SIZE * PATCH_SIZE    # 27
K_PAD = 32                                 # zero-padded contraction dim (full MXU pass)
H_OUT = (IMG - PATCH_SIZE) // STRIDE + 1   # 7
T = H_OUT * H_OUT                          # 49 tokens
T_PAD = 56                                 # 49 -> 56: multiple of 8 sublanes
ATT_SCALE = 1.0 / math.sqrt(NUM_HEADS)     # reference scales by 1/sqrt(num_heads)


# ------------------------------- in-kernel helpers -------------------------------
def _layernorm(x, g, b):
    # nn.LayerNorm over the last dim: biased variance, eps=1e-5, affine.
    mu = jnp.mean(x, axis=-1, keepdims=True)
    xc = x - mu
    var = jnp.mean(xc * xc, axis=-1, keepdims=True)
    return xc * jax.lax.rsqrt(var + LN_EPS) * g + b


def _erf(z):
    # Abramowitz & Stegun 7.1.26 polynomial erf (max abs err ~1.5e-7) so exact-erf
    # nn.GELU stays inside the fused kernel (exp rides the EUP slot).
    a = jnp.abs(z)
    t = 1.0 / (1.0 + 0.3275911 * a)
    poly = t * (0.254829592 + t * (-0.284496736 + t * (1.421413741
           + t * (-1.453152027 + t * 1.061405429))))
    y = 1.0 - poly * jnp.exp(-a * a)
    return jnp.where(z < 0.0, -y, y)


def _gelu(x):
    return 0.5 * x * (1.0 + _erf(x * (1.0 / math.sqrt(2.0))))


# ------------------------------- the fused kernel --------------------------------
def _vit_kernel(patch_ref, ew_ref, eb_ref, eg_ref, ebeta_ref,
                ln1g_ref, ln1b_ref, ln2g_ref, ln2b_ref,
                w1_ref, b1_ref, w2_ref, b2_ref, perm_ref, out_ref):
    bb = patch_ref.shape[0]
    rows = bb * T_PAD

    def mxu(a, w):
        # bf16 x bf16 MXU pass, f32 accumulation.
        return jnp.dot(a.astype(w.dtype), w, preferred_element_type=jnp.float32)

    # ---- CVTEmbedding: Conv2d(patch,stride) as (im2col @ W) + bias, then LayerNorm
    flat = patch_ref[...].reshape(rows, K_PAD)                       # tile-aligned reshape
    seq = mxu(flat, ew_ref[...]) + eb_ref[...]                       # (rows, E) f32
    seq = _layernorm(seq, eg_ref[...], ebeta_ref[...])

    # padded token positions (49..55) must receive zero attention weight as keys
    key_mask = jnp.where(
        jax.lax.broadcasted_iota(jnp.int32, (1, 1, T_PAD), 2) < T,
        jnp.float32(0.0), jnp.float32(-1e30))

    for l in range(DEPTH):
        # ---- MHSA: q = k = v = rearrange(LN(x), 'b t (d H) -> b H t d') ----------
        xn1 = _layernorm(seq, ln1g_ref[l], ln1b_ref[l])
        # one permutation matmul -> head-major channels; per-head q is then a
        # contiguous slice, and head-major concat of outputs == 'b H t d -> b t (H d)'
        xp = mxu(xn1, perm_ref[...]).reshape(bb, T_PAD, EMBED_DIM)   # f32
        heads = []
        for h in range(NUM_HEADS):
            q = xp[:, :, h * HEAD_DIM:(h + 1) * HEAD_DIM].astype(jnp.bfloat16)
            s = jnp.einsum('bqd,bkd->bqk', q, q,
                           preferred_element_type=jnp.float32) * ATT_SCALE
            s = s + key_mask
            s = s - jnp.max(s, axis=-1, keepdims=True)
            p = jnp.exp(s)
            p = p * pl.reciprocal(jnp.sum(p, axis=-1, keepdims=True), approx=True)
            o = jnp.einsum('bqk,bkd->bqd', p.astype(jnp.bfloat16), q,
                           preferred_element_type=jnp.float32)       # (bb, T_PAD, d)
            heads.append(o)
        att = jnp.concatenate(heads, axis=-1)                        # 'b H t d -> b t (H d)'
        seq = seq + att.reshape(rows, EMBED_DIM)                     # dropout = identity

        # ---- MLP -----------------------------------------------------------------
        xn2 = _layernorm(seq, ln2g_ref[l], ln2b_ref[l])
        hid = _gelu(mxu(xn2, w1_ref[l]) + b1_ref[l])                 # (rows, HIDDEN)
        seq = seq + (mxu(hid, w2_ref[l]) + b2_ref[l])                # dropout = identity

    out_ref[...] = seq.reshape(bb, T_PAD, EMBED_DIM)


# ------------------------------- JAX glue -----------------------------------------
def im2col(x, k, stride):
    """x: (B, C, H, W) -> (B, Ho*Wo, C*k*k) with (C, kh, kw) flattening order."""
    B, C, H, W = x.shape
    Ho = (H - k) // stride + 1
    Wo = (W - k) // stride + 1
    cols = []
    for i in range(k):
        for j in range(k):
            cols.append(x[:, :, i:i + stride * Ho:stride, j:j + stride * Wo:stride])
    p = jnp.stack(cols, axis=0).reshape(k, k, B, C, Ho, Wo)
    p = p.transpose(2, 4, 5, 3, 0, 1)                 # (B, Ho, Wo, C, kh, kw)
    return p.reshape(B, Ho * Wo, C * k * k), Ho, Wo


def _head_perm_constant():
    # Split 'b t (d H) -> b H t d': head h, dim j reads channel j*H + h.
    # Head-major column h*d + j <- original channel j*H + h.  The merge
    # 'b H t d -> b t (H d)' writes channel h*d + j, i.e. exactly head-major
    # concatenation, so no inverse permutation is needed after attention.
    perm = np.zeros((EMBED_DIM, EMBED_DIM), np.float32)
    for h in range(NUM_HEADS):
        for j in range(HEAD_DIM):
            perm[j * NUM_HEADS + h, h * HEAD_DIM + j] = 1.0
    return jnp.asarray(perm, dtype=jnp.bfloat16)      # 0/1: exact in bf16


def _const_spec(shape):
    nd = len(shape)
    return pl.BlockSpec(shape, lambda b, _nd=nd: (0,) * _nd)


def _pick_batch_block(batch):
    # Per-grid-step fixed cost (~0.35us + DMA setup) dominates at this model size,
    # so amortize it over many images per step, but keep >=2 grid steps when the
    # batch allows so v7x's two TensorCores both get work.
    if batch <= 2:
        return 1
    return min(32, -(-batch // 2))                    # ceil(batch/2), capped at 32


@jax.jit
def vit_forward(x, params):
    """x: (B, C, H, W) NCHW -> (B, EMBED_DIM, (H-1)//STRIDE, (W-1)//STRIDE) NCHW."""
    B, _, H, W = x.shape
    patches, Ho, Wo = im2col(x, PATCH_SIZE, STRIDE)                    # (B, T, 27)
    # The module's output rearrange uses h = w = (H-1)//stride; only valid when that
    # equals the conv output size (true for this H/patch/stride combo).
    h_out, w_out = (H - 1) // STRIDE, (W - 1) // STRIDE
    assert (Ho, Wo) == (h_out, w_out), "output rearrange only valid for this config"

    Bb = _pick_batch_block(B)
    steps = -(-B // Bb)
    B_pad = steps * Bb

    # one-time zero pads: batch B -> B_pad, tokens 49 -> 56 (8-sublane aligned so the
    # in-kernel (Bb,T,E) <-> (Bb*T,E) reshapes are tile-aligned), contraction 27 -> 32.
    patches = jnp.pad(patches, ((0, B_pad - B), (0, T_PAD - T), (0, K_PAD - K_RAW)))

    # bf16 MXU weight operands; biases / LN params / activations stay f32.
    ew = jnp.pad(params["embed_w"], ((0, K_PAD - K_RAW), (0, 0))).astype(jnp.bfloat16)
    w1 = params["w1"].astype(jnp.bfloat16)
    w2 = params["w2"].astype(jnp.bfloat16)
    perm = _head_perm_constant()

    in_arrays = [patches, ew,
                 params["embed_b"], params["embed_ln_g"], params["embed_ln_b"],
                 params["ln1_g"], params["ln1_b"], params["ln2_g"], params["ln2_b"],
                 w1, params["b1"], w2, params["b2"], perm]

    in_specs = [pl.BlockSpec((Bb, T_PAD, K_PAD), lambda b: (b, 0, 0))]
    in_specs += [_const_spec(a.shape) for a in in_arrays[1:]]

    out = pl.pallas_call(
        _vit_kernel,
        out_shape=jax.ShapeDtypeStruct((B_pad, T_PAD, EMBED_DIM), jnp.float32),
        grid=(steps,),
        in_specs=in_specs,
        out_specs=pl.BlockSpec((Bb, T_PAD, EMBED_DIM), lambda b: (b, 0, 0)),
        compiler_params=pltpu.CompilerParams(
            dimension_semantics=("parallel",)),        # batch tiles shard across TCs
    )(*in_arrays)

    # drop batch / token padding, then 'b (h w) c -> b c h w' in XLA (cheap; avoids
    # an in-kernel transpose and the masked 49-lane stores it forced).
    out = out[:B, :T, :]
    return out.transpose(0, 2, 1).reshape(B, EMBED_DIM, h_out, w_out)


# ------------------------------- pure-JAX reference -------------------------------
def _reference_forward(x, params):
    """Plain-XLA mirror of the PyTorch module's forward math (f32 throughout)."""
    B = x.shape[0]
    patches, Ho, Wo = im2col(x, PATCH_SIZE, STRIDE)
    seq = patches @ params["embed_w"] + params["embed_b"]
    seq = _layernorm(seq, params["embed_ln_g"], params["embed_ln_b"])
    for l in range(DEPTH):
        xn = _layernorm(seq, params["ln1_g"][l], params["ln1_b"][l])
        q = xn.reshape(B, T, HEAD_DIM, NUM_HEADS).transpose(0, 3, 1, 2)   # b H t d
        s = jnp.einsum('bhqd,bhkd->bhqk', q, q) * ATT_SCALE
        p = jax.nn.softmax(s, axis=-1)
        att = jnp.einsum('bhqk,bhkd->bhqd', p, q)
        att = att.transpose(0, 2, 1, 3).reshape(B, T, EMBED_DIM)          # b t (H d)
        seq = seq + att
        xn2 = _layernorm(seq, params["ln2_g"][l], params["ln2_b"][l])
        hid = jax.nn.gelu(xn2 @ params["w1"][l] + params["b1"][l], approximate=False)
        seq = seq + hid @ params["w2"][l] + params["b2"][l]
    return seq.transpose(0, 2, 1).reshape(B, EMBED_DIM, Ho, Wo)


# ------------------------------- parameter init ---------------------------------
def init_params(key):
    def nrm(k, shape):
        return 0.02 * jax.random.normal(k, shape, jnp.float32)

    keys = jax.random.split(key, 1 + 2 * DEPTH)
    params = {
        "embed_w": nrm(keys[0], (K_RAW, EMBED_DIM)),
        "embed_b": jnp.zeros((1, EMBED_DIM), jnp.float32),
        "embed_ln_g": jnp.ones((1, EMBED_DIM), jnp.float32),
        "embed_ln_b": jnp.zeros((1, EMBED_DIM), jnp.float32),
        # per-block params stacked along a leading DEPTH axis (statically indexed in-kernel)
        "ln1_g": jnp.ones((DEPTH, 1, EMBED_DIM), jnp.float32),
        "ln1_b": jnp.zeros((DEPTH, 1, EMBED_DIM), jnp.float32),
        "ln2_g": jnp.ones((DEPTH, 1, EMBED_DIM), jnp.float32),
        "ln2_b": jnp.zeros((DEPTH, 1, EMBED_DIM), jnp.float32),
        "w1": jnp.stack([nrm(keys[1 + 2 * i], (EMBED_DIM, HIDDEN)) for i in range(DEPTH)]),
        "b1": jnp.zeros((DEPTH, 1, HIDDEN), jnp.float32),
        "w2": jnp.stack([nrm(keys[2 + 2 * i], (HIDDEN, EMBED_DIM)) for i in range(DEPTH)]),
        "b2": jnp.zeros((DEPTH, 1, EMBED_DIM), jnp.float32),
    }
    return params


# ------------------------------------ main ---------------------------------------
if __name__ == "__main__":
    key = jax.random.PRNGKey(0)
    kp, kx = jax.random.split(key)
    params = init_params(kp)
    x = jax.random.normal(kx, (2, IN_CH, IMG, IMG), jnp.float32)   # NCHW, like PyTorch

    out = jax.block_until_ready(vit_forward(x, params))

    expected = (2, EMBED_DIM, (IMG - 1) // STRIDE, (IMG - 1) // STRIDE)
    assert out.shape == expected, (out.shape, expected)
    assert bool(jnp.isfinite(out).all())

    # sanity-check against the pure-XLA reference (loose tol: bf16 MXU + approx recip)
    ref = jax.block_until_ready(_reference_forward(x, params))
    err = float(jnp.max(jnp.abs(out - ref)))
    assert err < 0.25, f"max abs diff vs reference: {err}"

    print("KERNEL_OK")
</pallas_src>

<mosaic_0001>
module attributes {stable_mosaic.version = 11 : i64} {
  func.func @_vit_kernel(%arg0: i32, %arg1: memref<1x56x32xf32, #tpu.memory_space<vmem>>, %arg2: memref<32x32xbf16, #tpu.memory_space<vmem>>, %arg3: memref<1x32xf32, #tpu.memory_space<vmem>>, %arg4: memref<1x32xf32, #tpu.memory_space<vmem>>, %arg5: memref<1x32xf32, #tpu.memory_space<vmem>>, %arg6: memref<2x1x32xf32, #tpu.memory_space<vmem>>, %arg7: memref<2x1x32xf32, #tpu.memory_space<vmem>>, %arg8: memref<2x1x32xf32, #tpu.memory_space<vmem>>, %arg9: memref<2x1x32xf32, #tpu.memory_space<vmem>>, %arg10: memref<2x32x128xbf16, #tpu.memory_space<vmem>>, %arg11: memref<2x1x128xf32, #tpu.memory_space<vmem>>, %arg12: memref<2x128x32xbf16, #tpu.memory_space<vmem>>, %arg13: memref<2x1x32xf32, #tpu.memory_space<vmem>>, %arg14: memref<32x32xbf16, #tpu.memory_space<vmem>>, %arg15: memref<1x56x32xf32, #tpu.memory_space<vmem>>) attributes {dimension_semantics = [#tpu.dimension_semantics<parallel>], iteration_bounds = array<i64: 2>, scalar_prefetch = 0 : i64, scratch_operands = 0 : i64, tpu.core_type = #tpu.core_type<tc>, window_params = [{transform_indices = @transform_0, window_bounds = array<i64: 1, 56, 32>}, {pipeline_mode = #tpu.pipeline_mode<synchronous>, transform_indices = @transform_1, window_bounds = array<i64: 32, 32>}, {pipeline_mode = #tpu.pipeline_mode<synchronous>, transform_indices = @transform_2, window_bounds = array<i64: 1, 32>}, {pipeline_mode = #tpu.pipeline_mode<synchronous>, transform_indices = @transform_3, window_bounds = array<i64: 1, 32>}, {pipeline_mode = #tpu.pipeline_mode<synchronous>, transform_indices = @transform_4, window_bounds = array<i64: 1, 32>}, {pipeline_mode = #tpu.pipeline_mode<synchronous>, transform_indices = @transform_5, window_bounds = array<i64: 2, 1, 32>}, {pipeline_mode = #tpu.pipeline_mode<synchronous>, transform_indices = @transform_6, window_bounds = array<i64: 2, 1, 32>}, {pipeline_mode = #tpu.pipeline_mode<synchronous>, transform_indices = @transform_7, window_bounds = array<i64: 2, 1, 32>}, {pipeline_mode = #tpu.pipeline_mode<synchronous>, transform_indices = @transform_8, window_bounds = array<i64: 2, 1, 32>}, {pipeline_mode = #tpu.pipeline_mode<synchronous>, transform_indices = @transform_9, window_bounds = array<i64: 2, 32, 128>}, {pipeline_mode = #tpu.pipeline_mode<synchronous>, transform_indices = @transform_10, window_bounds = array<i64: 2, 1, 128>}, {pipeline_mode = #tpu.pipeline_mode<synchronous>, transform_indices = @transform_11, window_bounds = array<i64: 2, 128, 32>}, {pipeline_mode = #tpu.pipeline_mode<synchronous>, transform_indices = @transform_12, window_bounds = array<i64: 2, 1, 32>}, {pipeline_mode = #tpu.pipeline_mode<synchronous>, transform_indices = @transform_13, window_bounds = array<i64: 32, 32>}, {transform_indices = @transform_14, window_bounds = array<i64: 1, 56, 32>}]} {
    %c0 = arith.constant 0 : index
    %c0_0 = arith.constant 0 : index
    %c0_1 = arith.constant 0 : index
    %0 = vector.load %arg1[%c0, %c0_0, %c0_1] : memref<1x56x32xf32, #tpu.memory_space<vmem>>, vector<1x56x32xf32>
    %1 = vector.shape_cast %0 : vector<1x56x32xf32> to vector<56x32xf32>
    %c0_2 = arith.constant 0 : index
    %c0_3 = arith.constant 0 : index
    %2 = vector.load %arg2[%c0_2, %c0_3] : memref<32x32xbf16, #tpu.memory_space<vmem>>, vector<32x32xbf16>
    %3 = arith.truncf %1 : vector<56x32xf32> to vector<56x32xbf16>
    %cst = arith.constant dense<0.000000e+00> : vector<56x32xf32>
    %4 = tpu.matmul %3, %2, %cst {dimension_numbers = #tpu.dot_dimension_numbers<[1], [0], [0], [1], [0, 0, 1, 1], [], []>} : vector<56x32xbf16>, vector<32x32xbf16>, vector<56x32xf32> -> vector<56x32xf32>
    %c0_4 = arith.constant 0 : index
    %c0_5 = arith.constant 0 : index
    %5 = vector.load %arg3[%c0_4, %c0_5] : memref<1x32xf32, #tpu.memory_space<vmem>>, vector<1x32xf32>
    %6 = vector.broadcast %5 : vector<1x32xf32> to vector<56x32xf32>
    %7 = arith.addf %4, %6 : vector<56x32xf32>
    %c0_6 = arith.constant 0 : index
    %c0_7 = arith.constant 0 : index
    %8 = vector.load %arg4[%c0_6, %c0_7] : memref<1x32xf32, #tpu.memory_space<vmem>>, vector<1x32xf32>
    %c0_8 = arith.constant 0 : index
    %c0_9 = arith.constant 0 : index
    %9 = vector.load %arg5[%c0_8, %c0_9] : memref<1x32xf32, #tpu.memory_space<vmem>>, vector<1x32xf32>
    %cst_10 = arith.constant dense<0.000000e+00> : vector<56xf32>
    %10 = vector.multi_reduction <add>, %7, %cst_10 [1] : vector<56x32xf32> to vector<56xf32>
    %11 = vector.shape_cast %10 : vector<56xf32> to vector<56x1xf32>
    %cst_11 = arith.constant 3.200000e+01 : f32
    %12 = vector.broadcast %cst_11 : f32 to vector<56x1xf32>
    %13 = arith.divf %11, %12 : vector<56x1xf32>
    %14 = vector.broadcast %13 : vector<56x1xf32> to vector<56x32xf32>
    %15 = arith.subf %7, %14 : vector<56x32xf32>
    %16 = arith.mulf %15, %15 : vector<56x32xf32>
    %cst_12 = arith.constant dense<0.000000e+00> : vector<56xf32>
    %17 = vector.multi_reduction <add>, %16, %cst_12 [1] : vector<56x32xf32> to vector<56xf32>
    %18 = vector.shape_cast %17 : vector<56xf32> to vector<56x1xf32>
    %cst_13 = arith.constant 3.200000e+01 : f32
    %19 = vector.broadcast %cst_13 : f32 to vector<56x1xf32>
    %20 = arith.divf %18, %19 : vector<56x1xf32>
    %cst_14 = arith.constant 9.99999974E-6 : f32
    %21 = vector.broadcast %cst_14 : f32 to vector<56x1xf32>
    %22 = arith.addf %20, %21 : vector<56x1xf32>
    %23 = math.rsqrt %22 : vector<56x1xf32>
    %24 = vector.broadcast %23 : vector<56x1xf32> to vector<56x32xf32>
    %25 = arith.mulf %15, %24 : vector<56x32xf32>
    %26 = vector.broadcast %8 : vector<1x32xf32> to vector<56x32xf32>
    %27 = arith.mulf %25, %26 : vector<56x32xf32>
    %28 = vector.broadcast %9 : vector<1x32xf32> to vector<56x32xf32>
    %29 = arith.addf %27, %28 : vector<56x32xf32>
    %30 = tpu.iota {dimensions = array<i32: 2>} : vector<1x1x56xi32>
    %c49_i32 = arith.constant 49 : i32
    %31 = vector.broadcast %c49_i32 : i32 to vector<1x1x56xi32>
    %32 = arith.cmpi slt, %30, %31 : vector<1x1x56xi32>
    %cst_15 = arith.constant 0.000000e+00 : f32
    %cst_16 = arith.constant -1.000000e+30 : f32
    %33 = vector.broadcast %cst_15 : f32 to vector<1x1x56xf32>
    %34 = vector.broadcast %cst_16 : f32 to vector<1x1x56xf32>
    %35 = arith.select %32, %33, %34 : vector<1x1x56xi1>, vector<1x1x56xf32>
    %c0_17 = arith.constant 0 : index
    %c0_18 = arith.constant 0 : index
    %c0_19 = arith.constant 0 : index
    %36 = vector.load %arg6[%c0_17, %c0_18, %c0_19] : memref<2x1x32xf32, #tpu.memory_space<vmem>>, vector<1x1x32xf32>
    %37 = vector.shape_cast %36 : vector<1x1x32xf32> to vector<1x32xf32>
    %c0_20 = arith.constant 0 : index
    %c0_21 = arith.constant 0 : index
    %c0_22 = arith.constant 0 : index
    %38 = vector.load %arg7[%c0_20, %c0_21, %c0_22] : memref<2x1x32xf32, #tpu.memory_space<vmem>>, vector<1x1x32xf32>
    %39 = vector.shape_cast %38 : vector<1x1x32xf32> to vector<1x32xf32>
    %cst_23 = arith.constant dense<0.000000e+00> : vector<56xf32>
    %40 = vector.multi_reduction <add>, %29, %cst_23 [1] : vector<56x32xf32> to vector<56xf32>
    %41 = vector.shape_cast %40 : vector<56xf32> to vector<56x1xf32>
    %cst_24 = arith.constant 3.200000e+01 : f32
    %42 = vector.broadcast %cst_24 : f32 to vector<56x1xf32>
    %43 = arith.divf %41, %42 : vector<56x1xf32>
    %44 = vector.broadcast %43 : vector<56x1xf32> to vector<56x32xf32>
    %45 = arith.subf %29, %44 : vector<56x32xf32>
    %46 = arith.mulf %45, %45 : vector<56x32xf32>
    %cst_25 = arith.constant dense<0.000000e+00> : vector<56xf32>
    %47 = vector.multi_reduction <add>, %46, %cst_25 [1] : vector<56x32xf32> to vector<56xf32>
    %48 = vector.shape_cast %47 : vector<56xf32> to vector<56x1xf32>
    %cst_26 = arith.constant 3.200000e+01 : f32
    %49 = vector.broadcast %cst_26 : f32 to vector<56x1xf32>
    %50 = arith.divf %48, %49 : vector<56x1xf32>
    %cst_27 = arith.constant 9.99999974E-6 : f32
    %51 = vector.broadcast %cst_27 : f32 to vector<56x1xf32>
    %52 = arith.addf %50, %51 : vector<56x1xf32>
    %53 = math.rsqrt %52 : vector<56x1xf32>
    %54 = vector.broadcast %53 : vector<56x1xf32> to vector<56x32xf32>
    %55 = arith.mulf %45, %54 : vector<56x32xf32>
    %56 = vector.broadcast %37 : vector<1x32xf32> to vector<56x32xf32>
    %57 = arith.mulf %55, %56 : vector<56x32xf32>
    %58 = vector.broadcast %39 : vector<1x32xf32> to vector<56x32xf32>
    %59 = arith.addf %57, %58 : vector<56x32xf32>
    %c0_28 = arith.constant 0 : index
    %c0_29 = arith.constant 0 : index
    %60 = vector.load %arg14[%c0_28, %c0_29] : memref<32x32xbf16, #tpu.memory_space<vmem>>, vector<32x32xbf16>
    %61 = arith.truncf %59 : vector<56x32xf32> to vector<56x32xbf16>
    %cst_30 = arith.constant dense<0.000000e+00> : vector<56x32xf32>
    %62 = tpu.matmul %61, %60, %cst_30 {dimension_numbers = #tpu.dot_dimension_numbers<[1], [0], [0], [1], [0, 0, 1, 1], [], []>} : vector<56x32xbf16>, vector<32x32xbf16>, vector<56x32xf32> -> vector<56x32xf32>
    %63 = vector.shape_cast %62 : vector<56x32xf32> to vector<1x56x32xf32>
    %64 = vector.extract_strided_slice %63 {offsets = [0, 0, 0], sizes = [1, 56, 8], strides = [1, 1, 1]} : vector<1x56x32xf32> to vector<1x56x8xf32>
    %65 = arith.truncf %64 : vector<1x56x8xf32> to vector<1x56x8xbf16>
    "tpu.trace_start"() <{level = 10 : i32, message = "bqd,bkd->bqk"}> : () -> ()
    %cst_31 = arith.constant dense<0.000000e+00> : vector<1x56x56xf32>
    %66 = tpu.matmul %65, %65, %cst_31 {dimension_numbers = #tpu.dot_dimension_numbers<[2], [2], [1], [1], [0, 0, 0, 1, 1, 1], [0], [0]>} : vector<1x56x8xbf16>, vector<1x56x8xbf16>, vector<1x56x56xf32> -> vector<1x56x56xf32>
    "tpu.trace_stop"() : () -> ()
    %cst_32 = arith.constant 5.000000e-01 : f32
    %67 = vector.broadcast %cst_32 : f32 to vector<1x56x56xf32>
    %68 = arith.mulf %66, %67 : vector<1x56x56xf32>
    %69 = vector.broadcast %35 : vector<1x1x56xf32> to vector<1x56x56xf32>
    %70 = arith.addf %68, %69 : vector<1x56x56xf32>
    %cst_33 = arith.constant dense<0xFF800000> : vector<1x56xf32>
    %71 = vector.multi_reduction <maximumf>, %70, %cst_33 [2] : vector<1x56x56xf32> to vector<1x56xf32>
    %72 = vector.shape_cast %71 : vector<1x56xf32> to vector<1x56x1xf32>
    %73 = vector.broadcast %72 : vector<1x56x1xf32> to vector<1x56x56xf32>
    %74 = arith.subf %70, %73 : vector<1x56x56xf32>
    %75 = math.exp %74 : vector<1x56x56xf32>
    %cst_34 = arith.constant dense<0.000000e+00> : vector<1x56xf32>
    %76 = vector.multi_reduction <add>, %75, %cst_34 [2] : vector<1x56x56xf32> to vector<1x56xf32>
    %77 = vector.shape_cast %76 : vector<1x56xf32> to vector<1x56x1xf32>
    %78 = tpu.reciprocal %77 {approx = true} : vector<1x56x1xf32> -> vector<1x56x1xf32>
    %79 = vector.broadcast %78 : vector<1x56x1xf32> to vector<1x56x56xf32>
    %80 = arith.mulf %75, %79 : vector<1x56x56xf32>
    %81 = arith.truncf %80 : vector<1x56x56xf32> to vector<1x56x56xbf16>
    "tpu.trace_start"() <{level = 10 : i32, message = "bqk,bkd->bqd"}> : () -> ()
    %cst_35 = arith.constant dense<0.000000e+00> : vector<1x56x8xf32>
    %82 = tpu.matmul %81, %65, %cst_35 {dimension_numbers = #tpu.dot_dimension_numbers<[2], [1], [1], [2], [0, 0, 0, 1, 1, 2], [0], [0]>} : vector<1x56x56xbf16>, vector<1x56x8xbf16>, vector<1x56x8xf32> -> vector<1x56x8xf32>
    "tpu.trace_stop"() : () -> ()
    %83 = vector.extract_strided_slice %63 {offsets = [0, 0, 8], sizes = [1, 56, 8], strides = [1, 1, 1]} : vector<1x56x32xf32> to vector<1x56x8xf32>
    %84 = arith.truncf %83 : vector<1x56x8xf32> to vector<1x56x8xbf16>
    "tpu.trace_start"() <{level = 10 : i32, message = "bqd,bkd->bqk"}> : () -> ()
    %cst_36 = arith.constant dense<0.000000e+00> : vector<1x56x56xf32>
    %85 = tpu.matmul %84, %84, %cst_36 {dimension_numbers = #tpu.dot_dimension_numbers<[2], [2], [1], [1], [0, 0, 0, 1, 1, 1], [0], [0]>} : vector<1x56x8xbf16>, vector<1x56x8xbf16>, vector<1x56x56xf32> -> vector<1x56x56xf32>
    "tpu.trace_stop"() : () -> ()
    %cst_37 = arith.constant 5.000000e-01 : f32
    %86 = vector.broadcast %cst_37 : f32 to vector<1x56x56xf32>
    %87 = arith.mulf %85, %86 : vector<1x56x56xf32>
    %88 = vector.broadcast %35 : vector<1x1x56xf32> to vector<1x56x56xf32>
    %89 = arith.addf %87, %88 : vector<1x56x56xf32>
    %cst_38 = arith.constant dense<0xFF800000> : vector<1x56xf32>
    %90 = vector.multi_reduction <maximumf>, %89, %cst_38 [2] : vector<1x56x56xf32> to vector<1x56xf32>
    %91 = vector.shape_cast %90 : vector<1x56xf32> to vector<1x56x1xf32>
    %92 = vector.broadcast %91 : vector<1x56x1xf32> to vector<1x56x56xf32>
    %93 = arith.subf %89, %92 : vector<1x56x56xf32>
    %94 = math.exp %93 : vector<1x56x56xf32>
    %cst_39 = arith.constant dense<0.000000e+00> : vector<1x56xf32>
    %95 = vector.multi_reduction <add>, %94, %cst_39 [2] : vector<1x56x56xf32> to vector<1x56xf32>
    %96 = vector.shape_cast %95 : vector<1x56xf32> to vector<1x56x1xf32>
    %97 = tpu.reciprocal %96 {approx = true} : vector<1x56x1xf32> -> vector<1x56x1xf32>
    %98 = vector.broadcast %97 : vector<1x56x1xf32> to vector<1x56x56xf32>
    %99 = arith.mulf %94, %98 : vector<1x56x56xf32>
    %100 = arith.truncf %99 : vector<1x56x56xf32> to vector<1x56x56xbf16>
    "tpu.trace_start"() <{level = 10 : i32, message = "bqk,bkd->bqd"}> : () -> ()
    %cst_40 = arith.constant dense<0.000000e+00> : vector<1x56x8xf32>
    %101 = tpu.matmul %100, %84, %cst_40 {dimension_numbers = #tpu.dot_dimension_numbers<[2], [1], [1], [2], [0, 0, 0, 1, 1, 2], [0], [0]>} : vector<1x56x56xbf16>, vector<1x56x8xbf16>, vector<1x56x8xf32> -> vector<1x56x8xf32>
    "tpu.trace_stop"() : () -> ()
    %102 = vector.extract_strided_slice %63 {offsets = [0, 0, 16], sizes = [1, 56, 8], strides = [1, 1, 1]} : vector<1x56x32xf32> to vector<1x56x8xf32>
    %103 = arith.truncf %102 : vector<1x56x8xf32> to vector<1x56x8xbf16>
    "tpu.trace_start"() <{level = 10 : i32, message = "bqd,bkd->bqk"}> : () -> ()
    %cst_41 = arith.constant dense<0.000000e+00> : vector<1x56x56xf32>
    %104 = tpu.matmul %103, %103, %cst_41 {dimension_numbers = #tpu.dot_dimension_numbers<[2], [2], [1], [1], [0, 0, 0, 1, 1, 1], [0], [0]>} : vector<1x56x8xbf16>, vector<1x56x8xbf16>, vector<1x56x56xf32> -> vector<1x56x56xf32>
    "tpu.trace_stop"() : () -> ()
    %cst_42 = arith.constant 5.000000e-01 : f32
    %105 = vector.broadcast %cst_42 : f32 to vector<1x56x56xf32>
    %106 = arith.mulf %104, %105 : vector<1x56x56xf32>
    %107 = vector.broadcast %35 : vector<1x1x56xf32> to vector<1x56x56xf32>
    %108 = arith.addf %106, %107 : vector<1x56x56xf32>
    %cst_43 = arith.constant dense<0xFF800000> : vector<1x56xf32>
    %109 = vector.multi_reduction <maximumf>, %108, %cst_43 [2] : vector<1x56x56xf32> to vector<1x56xf32>
    %110 = vector.shape_cast %109 : vector<1x56xf32> to vector<1x56x1xf32>
    %111 = vector.broadcast %110 : vector<1x56x1xf32> to vector<1x56x56xf32>
    %112 = arith.subf %108, %111 : vector<1x56x56xf32>
    %113 = math.exp %112 : vector<1x56x56xf32>
    %cst_44 = arith.constant dense<0.000000e+00> : vector<1x56xf32>
    %114 = vector.multi_reduction <add>, %113, %cst_44 [2] : vector<1x56x56xf32> to vector<1x56xf32>
    %115 = vector.shape_cast %114 : vector<1x56xf32> to vector<1x56x1xf32>
    %116 = tpu.reciprocal %115 {approx = true} : vector<1x56x1xf32> -> vector<1x56x1xf32>
    %117 = vector.broadcast %116 : vector<1x56x1xf32> to vector<1x56x56xf32>
    %118 = arith.mulf %113, %117 : vector<1x56x56xf32>
    %119 = arith.truncf %118 : vector<1x56x56xf32> to vector<1x56x56xbf16>
    "tpu.trace_start"() <{level = 10 : i32, message = "bqk,bkd->bqd"}> : () -> ()
    %cst_45 = arith.constant dense<0.000000e+00> : vector<1x56x8xf32>
    %120 = tpu.matmul %119, %103, %cst_45 {dimension_numbers = #tpu.dot_dimension_numbers<[2], [1], [1], [2], [0, 0, 0, 1, 1, 2], [0], [0]>} : vector<1x56x56xbf16>, vector<1x56x8xbf16>, vector<1x56x8xf32> -> vector<1x56x8xf32>
    "tpu.trace_stop"() : () -> ()
    %121 = vector.extract_strided_slice %63 {offsets = [0, 0, 24], sizes = [1, 56, 8], strides = [1, 1, 1]} : vector<1x56x32xf32> to vector<1x56x8xf32>
    %122 = arith.truncf %121 : vector<1x56x8xf32> to vector<1x56x8xbf16>
    "tpu.trace_start"() <{level = 10 : i32, message = "bqd,bkd->bqk"}> : () -> ()
    %cst_46 = arith.constant dense<0.000000e+00> : vector<1x56x56xf32>
    %123 = tpu.matmul %122, %122, %cst_46 {dimension_numbers = #tpu.dot_dimension_numbers<[2], [2], [1], [1], [0, 0, 0, 1, 1, 1], [0], [0]>} : vector<1x56x8xbf16>, vector<1x56x8xbf16>, vector<1x56x56xf32> -> vector<1x56x56xf32>
    "tpu.trace_stop"() : () -> ()
    %cst_47 = arith.constant 5.000000e-01 : f32
    %124 = vector.broadcast %cst_47 : f32 to vector<1x56x56xf32>
    %125 = arith.mulf %123, %124 : vector<1x56x56xf32>
    %126 = vector.broadcast %35 : vector<1x1x56xf32> to vector<1x56x56xf32>
    %127 = arith.addf %125, %126 : vector<1x56x56xf32>
    %cst_48 = arith.constant dense<0xFF800000> : vector<1x56xf32>
    %128 = vector.multi_reduction <maximumf>, %127, %cst_48 [2] : vector<1x56x56xf32> to vector<1x56xf32>
    %129 = vector.shape_cast %128 : vector<1x56xf32> to vector<1x56x1xf32>
    %130 = vector.broadcast %129 : vector<1x56x1xf32> to vector<1x56x56xf32>
    %131 = arith.subf %127, %130 : vector<1x56x56xf32>
    %132 = math.exp %131 : vector<1x56x56xf32>
    %cst_49 = arith.constant dense<0.000000e+00> : vector<1x56xf32>
    %133 = vector.multi_reduction <add>, %132, %cst_49 [2] : vector<1x56x56xf32> to vector<1x56xf32>
    %134 = vector.shape_cast %133 : vector<1x56xf32> to vector<1x56x1xf32>
    %135 = tpu.reciprocal %134 {approx = true} : vector<1x56x1xf32> -> vector<1x56x1xf32>
    %136 = vector.broadcast %135 : vector<1x56x1xf32> to vector<1x56x56xf32>
    %137 = arith.mulf %132, %136 : vector<1x56x56xf32>
    %138 = arith.truncf %137 : vector<1x56x56xf32> to vector<1x56x56xbf16>
    "tpu.trace_start"() <{level = 10 : i32, message = "bqk,bkd->bqd"}> : () -> ()
    %cst_50 = arith.constant dense<0.000000e+00> : vector<1x56x8xf32>
    %139 = tpu.matmul %138, %122, %cst_50 {dimension_numbers = #tpu.dot_dimension_numbers<[2], [1], [1], [2], [0, 0, 0, 1, 1, 2], [0], [0]>} : vector<1x56x56xbf16>, vector<1x56x8xbf16>, vector<1x56x8xf32> -> vector<1x56x8xf32>
    "tpu.trace_stop"() : () -> ()
    %140 = tpu.concatenate %82, %101, %120, %139 in 2 : vector<1x56x8xf32>, vector<1x56x8xf32>, vector<1x56x8xf32>, vector<1x56x8xf32> -> vector<1x56x32xf32>
    %141 = vector.shape_cast %140 : vector<1x56x32xf32> to vector<56x32xf32>
    %142 = arith.addf %29, %141 : vector<56x32xf32>
    %c0_51 = arith.constant 0 : index
    %c0_52 = arith.constant 0 : index
    %c0_53 = arith.constant 0 : index
    %143 = vector.load %arg8[%c0_51, %c0_52, %c0_53] : memref<2x1x32xf32, #tpu.memory_space<vmem>>, vector<1x1x32xf32>
    %144 = vector.shape_cast %143 : vector<1x1x32xf32> to vector<1x32xf32>
    %c0_54 = arith.constant 0 : index
    %c0_55 = arith.constant 0 : index
    %c0_56 = arith.constant 0 : index
    %145 = vector.load %arg9[%c0_54, %c0_55, %c0_56] : memref<2x1x32xf32, #tpu.memory_space<vmem>>, vector<1x1x32xf32>
    %146 = vector.shape_cast %145 : vector<1x1x32xf32> to vector<1x32xf32>
    %cst_57 = arith.constant dense<0.000000e+00> : vector<56xf32>
    %147 = vector.multi_reduction <add>, %142, %cst_57 [1] : vector<56x32xf32> to vector<56xf32>
    %148 = vector.shape_cast %147 : vector<56xf32> to vector<56x1xf32>
    %cst_58 = arith.constant 3.200000e+01 : f32
    %149 = vector.broadcast %cst_58 : f32 to vector<56x1xf32>
    %150 = arith.divf %148, %149 : vector<56x1xf32>
    %151 = vector.broadcast %150 : vector<56x1xf32> to vector<56x32xf32>
    %152 = arith.subf %142, %151 : vector<56x32xf32>
    %153 = arith.mulf %152, %152 : vector<56x32xf32>
    %cst_59 = arith.constant dense<0.000000e+00> : vector<56xf32>
    %154 = vector.multi_reduction <add>, %153, %cst_59 [1] : vector<56x32xf32> to vector<56xf32>
    %155 = vector.shape_cast %154 : vector<56xf32> to vector<56x1xf32>
    %cst_60 = arith.constant 3.200000e+01 : f32
    %156 = vector.broadcast %cst_60 : f32 to vector<56x1xf32>
    %157 = arith.divf %155, %156 : vector<56x1xf32>
    %cst_61 = arith.constant 9.99999974E-6 : f32
    %158 = vector.broadcast %cst_61 : f32 to vector<56x1xf32>
    %159 = arith.addf %157, %158 : vector<56x1xf32>
    %160 = math.rsqrt %159 : vector<56x1xf32>
    %161 = vector.broadcast %160 : vector<56x1xf32> to vector<56x32xf32>
    %162 = arith.mulf %152, %161 : vector<56x32xf32>
    %163 = vector.broadcast %144 : vector<1x32xf32> to vector<56x32xf32>
    %164 = arith.mulf %162, %163 : vector<56x32xf32>
    %165 = vector.broadcast %146 : vector<1x32xf32> to vector<56x32xf32>
    %166 = arith.addf %164, %165 : vector<56x32xf32>
    %c0_62 = arith.constant 0 : index
    %c0_63 = arith.constant 0 : index
    %c0_64 = arith.constant 0 : index
    %167 = vector.load %arg10[%c0_62, %c0_63, %c0_64] : memref<2x32x128xbf16, #tpu.memory_space<vmem>>, vector<1x32x128xbf16>
    %168 = vector.shape_cast %167 : vector<1x32x128xbf16> to vector<32x128xbf16>
    %169 = arith.truncf %166 : vector<56x32xf32> to vector<56x32xbf16>
    %cst_65 = arith.constant dense<0.000000e+00> : vector<56x128xf32>
    %170 = tpu.matmul %169, %168, %cst_65 {dimension_numbers = #tpu.dot_dimension_numbers<[1], [0], [0], [1], [0, 0, 1, 1], [], []>} : vector<56x32xbf16>, vector<32x128xbf16>, vector<56x128xf32> -> vector<56x128xf32>
    %c0_66 = arith.constant 0 : index
    %c0_67 = arith.constant 0 : index
    %c0_68 = arith.constant 0 : index
    %171 = vector.load %arg11[%c0_66, %c0_67, %c0_68] : memref<2x1x128xf32, #tpu.memory_space<vmem>>, vector<1x1x128xf32>
    %172 = vector.shape_cast %171 : vector<1x1x128xf32> to vector<1x128xf32>
    %173 = vector.broadcast %172 : vector<1x128xf32> to vector<56x128xf32>
    %174 = arith.addf %170, %173 : vector<56x128xf32>
    %cst_69 = arith.constant 5.000000e-01 : f32
    %175 = vector.broadcast %cst_69 : f32 to vector<56x128xf32>
    %176 = arith.mulf %175, %174 : vector<56x128xf32>
    %cst_70 = arith.constant 0.707106769 : f32
    %177 = vector.broadcast %cst_70 : f32 to vector<56x128xf32>
    %178 = arith.mulf %174, %177 : vector<56x128xf32>
    %179 = math.absf %178 : vector<56x128xf32>
    %cst_71 = arith.constant 0.327591091 : f32
    %180 = vector.broadcast %cst_71 : f32 to vector<56x128xf32>
    %181 = arith.mulf %180, %179 : vector<56x128xf32>
    %cst_72 = arith.constant 1.000000e+00 : f32
    %182 = vector.broadcast %cst_72 : f32 to vector<56x128xf32>
    %183 = arith.addf %182, %181 : vector<56x128xf32>
    %cst_73 = arith.constant 1.000000e+00 : f32
    %184 = vector.broadcast %cst_73 : f32 to vector<56x128xf32>
    %185 = arith.divf %184, %183 : vector<56x128xf32>
    %cst_74 = arith.constant 1.06140542 : f32
    %186 = vector.broadcast %cst_74 : f32 to vector<56x128xf32>
    %187 = arith.mulf %185, %186 : vector<56x128xf32>
    %cst_75 = arith.constant -1.45315206 : f32
    %188 = vector.broadcast %cst_75 : f32 to vector<56x128xf32>
    %189 = arith.addf %188, %187 : vector<56x128xf32>
    %190 = arith.mulf %185, %189 : vector<56x128xf32>
    %cst_76 = arith.constant 1.42141378 : f32
    %191 = vector.broadcast %cst_76 : f32 to vector<56x128xf32>
    %192 = arith.addf %191, %190 : vector<56x128xf32>
    %193 = arith.mulf %185, %192 : vector<56x128xf32>
    %cst_77 = arith.constant -0.284496725 : f32
    %194 = vector.broadcast %cst_77 : f32 to vector<56x128xf32>
    %195 = arith.addf %194, %193 : vector<56x128xf32>
    %196 = arith.mulf %185, %195 : vector<56x128xf32>
    %cst_78 = arith.constant 0.254829586 : f32
    %197 = vector.broadcast %cst_78 : f32 to vector<56x128xf32>
    %198 = arith.addf %197, %196 : vector<56x128xf32>
    %199 = arith.mulf %185, %198 : vector<56x128xf32>
    %cst_79 = arith.constant 0.000000e+00 : f32
    %200 = vector.broadcast %cst_79 : f32 to vector<56x128xf32>
    %201 = arith.subf %200, %179 : vector<56x128xf32>
    %202 = arith.mulf %201, %179 : vector<56x128xf32>
    %203 = math.exp %202 : vector<56x128xf32>
    %204 = arith.mulf %199, %203 : vector<56x128xf32>
    %cst_80 = arith.constant 1.000000e+00 : f32
    %205 = vector.broadcast %cst_80 : f32 to vector<56x128xf32>
    %206 = arith.subf %205, %204 : vector<56x128xf32>
    %cst_81 = arith.constant 0.000000e+00 : f32
    %207 = vector.broadcast %cst_81 : f32 to vector<56x128xf32>
    %208 = arith.cmpf olt, %178, %207 : vector<56x128xf32>
    %cst_82 = arith.constant 0.000000e+00 : f32
    %209 = vector.broadcast %cst_82 : f32 to vector<56x128xf32>
    %210 = arith.subf %209, %206 : vector<56x128xf32>
    %211 = arith.select %208, %210, %206 : vector<56x128xi1>, vector<56x128xf32>
    %cst_83 = arith.constant 1.000000e+00 : f32
    %212 = vector.broadcast %cst_83 : f32 to vector<56x128xf32>
    %213 = arith.addf %212, %211 : vector<56x128xf32>
    %214 = arith.mulf %176, %213 : vector<56x128xf32>
    %c0_84 = arith.constant 0 : index
    %c0_85 = arith.constant 0 : index
    %c0_86 = arith.constant 0 : index
    %215 = vector.load %arg12[%c0_84, %c0_85, %c0_86] : memref<2x128x32xbf16, #tpu.memory_space<vmem>>, vector<1x128x32xbf16>
    %216 = vector.shape_cast %215 : vector<1x128x32xbf16> to vector<128x32xbf16>
    %217 = arith.truncf %214 : vector<56x128xf32> to vector<56x128xbf16>
    %cst_87 = arith.constant dense<0.000000e+00> : vector<56x32xf32>
    %218 = tpu.matmul %217, %216, %cst_87 {dimension_numbers = #tpu.dot_dimension_numbers<[1], [0], [0], [1], [0, 0, 1, 1], [], []>} : vector<56x128xbf16>, vector<128x32xbf16>, vector<56x32xf32> -> vector<56x32xf32>
    %c0_88 = arith.constant 0 : index
    %c0_89 = arith.constant 0 : index
    %c0_90 = arith.constant 0 : index
    %219 = vector.load %arg13[%c0_88, %c0_89, %c0_90] : memref<2x1x32xf32, #tpu.memory_space<vmem>>, vector<1x1x32xf32>
    %220 = vector.shape_cast %219 : vector<1x1x32xf32> to vector<1x32xf32>
    %221 = vector.broadcast %220 : vector<1x32xf32> to vector<56x32xf32>
    %222 = arith.addf %218, %221 : vector<56x32xf32>
    %223 = arith.addf %142, %222 : vector<56x32xf32>
    %c1 = arith.constant 1 : index
    %c0_91 = arith.constant 0 : index
    %c0_92 = arith.constant 0 : index
    %224 = vector.load %arg6[%c1, %c0_91, %c0_92] : memref<2x1x32xf32, #tpu.memory_space<vmem>>, vector<1x1x32xf32>
    %225 = vector.shape_cast %224 : vector<1x1x32xf32> to vector<1x32xf32>
    %c1_93 = arith.constant 1 : index
    %c0_94 = arith.constant 0 : index
    %c0_95 = arith.constant 0 : index
    %226 = vector.load %arg7[%c1_93, %c0_94, %c0_95] : memref<2x1x32xf32, #tpu.memory_space<vmem>>, vector<1x1x32xf32>
    %227 = vector.shape_cast %226 : vector<1x1x32xf32> to vector<1x32xf32>
    %cst_96 = arith.constant dense<0.000000e+00> : vector<56xf32>
    %228 = vector.multi_reduction <add>, %223, %cst_96 [1] : vector<56x32xf32> to vector<56xf32>
    %229 = vector.shape_cast %228 : vector<56xf32> to vector<56x1xf32>
    %cst_97 = arith.constant 3.200000e+01 : f32
    %230 = vector.broadcast %cst_97 : f32 to vector<56x1xf32>
    %231 = arith.divf %229, %230 : vector<56x1xf32>
    %232 = vector.broadcast %231 : vector<56x1xf32> to vector<56x32xf32>
    %233 = arith.subf %223, %232 : vector<56x32xf32>
    %234 = arith.mulf %233, %233 : vector<56x32xf32>
    %cst_98 = arith.constant dense<0.000000e+00> : vector<56xf32>
    %235 = vector.multi_reduction <add>, %234, %cst_98 [1] : vector<56x32xf32> to vector<56xf32>
    %236 = vector.shape_cast %235 : vector<56xf32> to vector<56x1xf32>
    %cst_99 = arith.constant 3.200000e+01 : f32
    %237 = vector.broadcast %cst_99 : f32 to vector<56x1xf32>
    %238 = arith.divf %236, %237 : vector<56x1xf32>
    %cst_100 = arith.constant 9.99999974E-6 : f32
    %239 = vector.broadcast %cst_100 : f32 to vector<56x1xf32>
    %240 = arith.addf %238, %239 : vector<56x1xf32>
    %241 = math.rsqrt %240 : vector<56x1xf32>
    %242 = vector.broadcast %241 : vector<56x1xf32> to vector<56x32xf32>
    %243 = arith.mulf %233, %242 : vector<56x32xf32>
    %244 = vector.broadcast %225 : vector<1x32xf32> to vector<56x32xf32>
    %245 = arith.mulf %243, %244 : vector<56x32xf32>
    %246 = vector.broadcast %227 : vector<1x32xf32> to vector<56x32xf32>
    %247 = arith.addf %245, %246 : vector<56x32xf32>
    %c0_101 = arith.constant 0 : index
    %c0_102 = arith.constant 0 : index
    %248 = vector.load %arg14[%c0_101, %c0_102] : memref<32x32xbf16, #tpu.memory_space<vmem>>, vector<32x32xbf16>
    %249 = arith.truncf %247 : vector<56x32xf32> to vector<56x32xbf16>
    %cst_103 = arith.constant dense<0.000000e+00> : vector<56x32xf32>
    %250 = tpu.matmul %249, %248, %cst_103 {dimension_numbers = #tpu.dot_dimension_numbers<[1], [0], [0], [1], [0, 0, 1, 1], [], []>} : vector<56x32xbf16>, vector<32x32xbf16>, vector<56x32xf32> -> vector<56x32xf32>
    %251 = vector.shape_cast %250 : vector<56x32xf32> to vector<1x56x32xf32>
    %252 = vector.extract_strided_slice %251 {offsets = [0, 0, 0], sizes = [1, 56, 8], strides = [1, 1, 1]} : vector<1x56x32xf32> to vector<1x56x8xf32>
    %253 = arith.truncf %252 : vector<1x56x8xf32> to vector<1x56x8xbf16>
    "tpu.trace_start"() <{level = 10 : i32, message = "bqd,bkd->bqk"}> : () -> ()
    %cst_104 = arith.constant dense<0.000000e+00> : vector<1x56x56xf32>
    %254 = tpu.matmul %253, %253, %cst_104 {dimension_numbers = #tpu.dot_dimension_numbers<[2], [2], [1], [1], [0, 0, 0, 1, 1, 1], [0], [0]>} : vector<1x56x8xbf16>, vector<1x56x8xbf16>, vector<1x56x56xf32> -> vector<1x56x56xf32>
    "tpu.trace_stop"() : () -> ()
    %cst_105 = arith.constant 5.000000e-01 : f32
    %255 = vector.broadcast %cst_105 : f32 to vector<1x56x56xf32>
    %256 = arith.mulf %254, %255 : vector<1x56x56xf32>
    %257 = vector.broadcast %35 : vector<1x1x56xf32> to vector<1x56x56xf32>
    %258 = arith.addf %256, %257 : vector<1x56x56xf32>
    %cst_106 = arith.constant dense<0xFF800000> : vector<1x56xf32>
    %259 = vector.multi_reduction <maximumf>, %258, %cst_106 [2] : vector<1x56x56xf32> to vector<1x56xf32>
    %260 = vector.shape_cast %259 : vector<1x56xf32> to vector<1x56x1xf32>
    %261 = vector.broadcast %260 : vector<1x56x1xf32> to vector<1x56x56xf32>
    %262 = arith.subf %258, %261 : vector<1x56x56xf32>
    %263 = math.exp %262 : vector<1x56x56xf32>
    %cst_107 = arith.constant dense<0.000000e+00> : vector<1x56xf32>
    %264 = vector.multi_reduction <add>, %263, %cst_107 [2] : vector<1x56x56xf32> to vector<1x56xf32>
    %265 = vector.shape_cast %264 : vector<1x56xf32> to vector<1x56x1xf32>
    %266 = tpu.reciprocal %265 {approx = true} : vector<1x56x1xf32> -> vector<1x56x1xf32>
    %267 = vector.broadcast %266 : vector<1x56x1xf32> to vector<1x56x56xf32>
    %268 = arith.mulf %263, %267 : vector<1x56x56xf32>
    %269 = arith.truncf %268 : vector<1x56x56xf32> to vector<1x56x56xbf16>
    "tpu.trace_start"() <{level = 10 : i32, message = "bqk,bkd->bqd"}> : () -> ()
    %cst_108 = arith.constant dense<0.000000e+00> : vector<1x56x8xf32>
    %270 = tpu.matmul %269, %253, %cst_108 {dimension_numbers = #tpu.dot_dimension_numbers<[2], [1], [1], [2], [0, 0, 0, 1, 1, 2], [0], [0]>} : vector<1x56x56xbf16>, vector<1x56x8xbf16>, vector<1x56x8xf32> -> vector<1x56x8xf32>
    "tpu.trace_stop"() : () -> ()
    %271 = vector.extract_strided_slice %251 {offsets = [0, 0, 8], sizes = [1, 56, 8], strides = [1, 1, 1]} : vector<1x56x32xf32> to vector<1x56x8xf32>
    %272 = arith.truncf %271 : vector<1x56x8xf32> to vector<1x56x8xbf16>
    "tpu.trace_start"() <{level = 10 : i32, message = "bqd,bkd->bqk"}> : () -> ()
    %cst_109 = arith.constant dense<0.000000e+00> : vector<1x56x56xf32>
    %273 = tpu.matmul %272, %272, %cst_109 {dimension_numbers = #tpu.dot_dimension_numbers<[2], [2], [1], [1], [0, 0, 0, 1, 1, 1], [0], [0]>} : vector<1x56x8xbf16>, vector<1x56x8xbf16>, vector<1x56x56xf32> -> vector<1x56x56xf32>
    "tpu.trace_stop"() : () -> ()
    %cst_110 = arith.constant 5.000000e-01 : f32
    %274 = vector.broadcast %cst_110 : f32 to vector<1x56x56xf32>
    %275 = arith.mulf %273, %274 : vector<1x56x56xf32>
    %276 = vector.broadcast %35 : vector<1x1x56xf32> to vector<1x56x56xf32>
    %277 = arith.addf %275, %276 : vector<1x56x56xf32>
    %cst_111 = arith.constant dense<0xFF800000> : vector<1x56xf32>
    %278 = vector.multi_reduction <maximumf>, %277, %cst_111 [2] : vector<1x56x56xf32> to vector<1x56xf32>
    %279 = vector.shape_cast %278 : vector<1x56xf32> to vector<1x56x1xf32>
    %280 = vector.broadcast %279 : vector<1x56x1xf32> to vector<1x56x56xf32>
    %281 = arith.subf %277, %280 : vector<1x56x56xf32>
    %282 = math.exp %281 : vector<1x56x56xf32>
    %cst_112 = arith.constant dense<0.000000e+00> : vector<1x56xf32>
    %283 = vector.multi_reduction <add>, %282, %cst_112 [2] : vector<1x56x56xf32> to vector<1x56xf32>
    %284 = vector.shape_cast %283 : vector<1x56xf32> to vector<1x56x1xf32>
    %285 = tpu.reciprocal %284 {approx = true} : vector<1x56x1xf32> -> vector<1x56x1xf32>
    %286 = vector.broadcast %285 : vector<1x56x1xf32> to vector<1x56x56xf32>
    %287 = arith.mulf %282, %286 : vector<1x56x56xf32>
    %288 = arith.truncf %287 : vector<1x56x56xf32> to vector<1x56x56xbf16>
    "tpu.trace_start"() <{level = 10 : i32, message = "bqk,bkd->bqd"}> : () -> ()
    %cst_113 = arith.constant dense<0.000000e+00> : vector<1x56x8xf32>
    %289 = tpu.matmul %288, %272, %cst_113 {dimension_numbers = #tpu.dot_dimension_numbers<[2], [1], [1], [2], [0, 0, 0, 1, 1, 2], [0], [0]>} : vector<1x56x56xbf16>, vector<1x56x8xbf16>, vector<1x56x8xf32> -> vector<1x56x8xf32>
    "tpu.trace_stop"() : () -> ()
    %290 = vector.extract_strided_slice %251 {offsets = [0, 0, 16], sizes = [1, 56, 8], strides = [1, 1, 1]} : vector<1x56x32xf32> to vector<1x56x8xf32>
    %291 = arith.truncf %290 : vector<1x56x8xf32> to vector<1x56x8xbf16>
    "tpu.trace_start"() <{level = 10 : i32, message = "bqd,bkd->bqk"}> : () -> ()
    %cst_114 = arith.constant dense<0.000000e+00> : vector<1x56x56xf32>
    %292 = tpu.matmul %291, %291, %cst_114 {dimension_numbers = #tpu.dot_dimension_numbers<[2], [2], [1], [1], [0, 0, 0, 1, 1, 1], [0], [0]>} : vector<1x56x8xbf16>, vector<1x56x8xbf16>, vector<1x56x56xf32> -> vector<1x56x56xf32>
    "tpu.trace_stop"() : () -> ()
    %cst_115 = arith.constant 5.000000e-01 : f32
    %293 = vector.broadcast %cst_115 : f32 to vector<1x56x56xf32>
    %294 = arith.mulf %292, %293 : vector<1x56x56xf32>
    %295 = vector.broadcast %35 : vector<1x1x56xf32> to vector<1x56x56xf32>
    %296 = arith.addf %294, %295 : vector<1x56x56xf32>
    %cst_116 = arith.constant dense<0xFF800000> : vector<1x56xf32>
    %297 = vector.multi_reduction <maximumf>, %296, %cst_116 [2] : vector<1x56x56xf32> to vector<1x56xf32>
    %298 = vector.shape_cast %297 : vector<1x56xf32> to vector<1x56x1xf32>
    %299 = vector.broadcast %298 : vector<1x56x1xf32> to vector<1x56x56xf32>
    %300 = arith.subf %296, %299 : vector<1x56x56xf32>
    %301 = math.exp %300 : vector<1x56x56xf32>
    %cst_117 = arith.constant dense<0.000000e+00> : vector<1x56xf32>
    %302 = vector.multi_reduction <add>, %301, %cst_117 [2] : vector<1x56x56xf32> to vector<1x56xf32>
    %303 = vector.shape_cast %302 : vector<1x56xf32> to vector<1x56x1xf32>
    %304 = tpu.reciprocal %303 {approx = true} : vector<1x56x1xf32> -> vector<1x56x1xf32>
    %305 = vector.broadcast %304 : vector<1x56x1xf32> to vector<1x56x56xf32>
    %306 = arith.mulf %301, %305 : vector<1x56x56xf32>
    %307 = arith.truncf %306 : vector<1x56x56xf32> to vector<1x56x56xbf16>
    "tpu.trace_start"() <{level = 10 : i32, message = "bqk,bkd->bqd"}> : () -> ()
    %cst_118 = arith.constant dense<0.000000e+00> : vector<1x56x8xf32>
    %308 = tpu.matmul %307, %291, %cst_118 {dimension_numbers = #tpu.dot_dimension_numbers<[2], [1], [1], [2], [0, 0, 0, 1, 1, 2], [0], [0]>} : vector<1x56x56xbf16>, vector<1x56x8xbf16>, vector<1x56x8xf32> -> vector<1x56x8xf32>
    "tpu.trace_stop"() : () -> ()
    %309 = vector.extract_strided_slice %251 {offsets = [0, 0, 24], sizes = [1, 56, 8], strides = [1, 1, 1]} : vector<1x56x32xf32> to vector<1x56x8xf32>
    %310 = arith.truncf %309 : vector<1x56x8xf32> to vector<1x56x8xbf16>
    "tpu.trace_start"() <{level = 10 : i32, message = "bqd,bkd->bqk"}> : () -> ()
    %cst_119 = arith.constant dense<0.000000e+00> : vector<1x56x56xf32>
    %311 = tpu.matmul %310, %310, %cst_119 {dimension_numbers = #tpu.dot_dimension_numbers<[2], [2], [1], [1], [0, 0, 0, 1, 1, 1], [0], [0]>} : vector<1x56x8xbf16>, vector<1x56x8xbf16>, vector<1x56x56xf32> -> vector<1x56x56xf32>
    "tpu.trace_stop"() : () -> ()
    %cst_120 = arith.constant 5.000000e-01 : f32
    %312 = vector.broadcast %cst_120 : f32 to vector<1x56x56xf32>
    %313 = arith.mulf %311, %312 : vector<1x56x56xf32>
    %314 = vector.broadcast %35 : vector<1x1x56xf32> to vector<1x56x56xf32>
    %315 = arith.addf %313, %314 : vector<1x56x56xf32>
    %cst_121 = arith.constant dense<0xFF800000> : vector<1x56xf32>
    %316 = vector.multi_reduction <maximumf>, %315, %cst_121 [2] : vector<1x56x56xf32> to vector<1x56xf32>
    %317 = vector.shape_cast %316 : vector<1x56xf32> to vector<1x56x1xf32>
    %318 = vector.broadcast %317 : vector<1x56x1xf32> to vector<1x56x56xf32>
    %319 = arith.subf %315, %318 : vector<1x56x56xf32>
    %320 = math.exp %319 : vector<1x56x56xf32>
    %cst_122 = arith.constant dense<0.000000e+00> : vector<1x56xf32>
    %321 = vector.multi_reduction <add>, %320, %cst_122 [2] : vector<1x56x56xf32> to vector<1x56xf32>
    %322 = vector.shape_cast %321 : vector<1x56xf32> to vector<1x56x1xf32>
    %323 = tpu.reciprocal %322 {approx = true} : vector<1x56x1xf32> -> vector<1x56x1xf32>
    %324 = vector.broadcast %323 : vector<1x56x1xf32> to vector<1x56x56xf32>
    %325 = arith.mulf %320, %324 : vector<1x56x56xf32>
    %326 = arith.truncf %325 : vector<1x56x56xf32> to vector<1x56x56xbf16>
    "tpu.trace_start"() <{level = 10 : i32, message = "bqk,bkd->bqd"}> : () -> ()
    %cst_123 = arith.constant dense<0.000000e+00> : vector<1x56x8xf32>
    %327 = tpu.matmul %326, %310, %cst_123 {dimension_numbers = #tpu.dot_dimension_numbers<[2], [1], [1], [2], [0, 0, 0, 1, 1, 2], [0], [0]>} : vector<1x56x56xbf16>, vector<1x56x8xbf16>, vector<1x56x8xf32> -> vector<1x56x8xf32>
    "tpu.trace_stop"() : () -> ()
    %328 = tpu.concatenate %270, %289, %308, %327 in 2 : vector<1x56x8xf32>, vector<1x56x8xf32>, vector<1x56x8xf32>, vector<1x56x8xf32> -> vector<1x56x32xf32>
    %329 = vector.shape_cast %328 : vector<1x56x32xf32> to vector<56x32xf32>
    %330 = arith.addf %223, %329 : vector<56x32xf32>
    %c1_124 = arith.constant 1 : index
    %c0_125 = arith.constant 0 : index
    %c0_126 = arith.constant 0 : index
    %331 = vector.load %arg8[%c1_124, %c0_125, %c0_126] : memref<2x1x32xf32, #tpu.memory_space<vmem>>, vector<1x1x32xf32>
    %332 = vector.shape_cast %331 : vector<1x1x32xf32> to vector<1x32xf32>
    %c1_127 = arith.constant 1 : index
    %c0_128 = arith.constant 0 : index
    %c0_129 = arith.constant 0 : index
    %333 = vector.load %arg9[%c1_127, %c0_128, %c0_129] : memref<2x1x32xf32, #tpu.memory_space<vmem>>, vector<1x1x32xf32>
    %334 = vector.shape_cast %333 : vector<1x1x32xf32> to vector<1x32xf32>
    %cst_130 = arith.constant dense<0.000000e+00> : vector<56xf32>
    %335 = vector.multi_reduction <add>, %330, %cst_130 [1] : vector<56x32xf32> to vector<56xf32>
    %336 = vector.shape_cast %335 : vector<56xf32> to vector<56x1xf32>
    %cst_131 = arith.constant 3.200000e+01 : f32
    %337 = vector.broadcast %cst_131 : f32 to vector<56x1xf32>
    %338 = arith.divf %336, %337 : vector<56x1xf32>
    %339 = vector.broadcast %338 : vector<56x1xf32> to vector<56x32xf32>
    %340 = arith.subf %330, %339 : vector<56x32xf32>
    %341 = arith.mulf %340, %340 : vector<56x32xf32>
    %cst_132 = arith.constant dense<0.000000e+00> : vector<56xf32>
    %342 = vector.multi_reduction <add>, %341, %cst_132 [1] : vector<56x32xf32> to vector<56xf32>
    %343 = vector.shape_cast %342 : vector<56xf32> to vector<56x1xf32>
    %cst_133 = arith.constant 3.200000e+01 : f32
    %344 = vector.broadcast %cst_133 : f32 to vector<56x1xf32>
    %345 = arith.divf %343, %344 : vector<56x1xf32>
    %cst_134 = arith.constant 9.99999974E-6 : f32
    %346 = vector.broadcast %cst_134 : f32 to vector<56x1xf32>
    %347 = arith.addf %345, %346 : vector<56x1xf32>
    %348 = math.rsqrt %347 : vector<56x1xf32>
    %349 = vector.broadcast %348 : vector<56x1xf32> to vector<56x32xf32>
    %350 = arith.mulf %340, %349 : vector<56x32xf32>
    %351 = vector.broadcast %332 : vector<1x32xf32> to vector<56x32xf32>
    %352 = arith.mulf %350, %351 : vector<56x32xf32>
    %353 = vector.broadcast %334 : vector<1x32xf32> to vector<56x32xf32>
    %354 = arith.addf %352, %353 : vector<56x32xf32>
    %c1_135 = arith.constant 1 : index
    %c0_136 = arith.constant 0 : index
    %c0_137 = arith.constant 0 : index
    %355 = vector.load %arg10[%c1_135, %c0_136, %c0_137] : memref<2x32x128xbf16, #tpu.memory_space<vmem>>, vector<1x32x128xbf16>
    %356 = vector.shape_cast %355 : vector<1x32x128xbf16> to vector<32x128xbf16>
    %357 = arith.truncf %354 : vector<56x32xf32> to vector<56x32xbf16>
    %cst_138 = arith.constant dense<0.000000e+00> : vector<56x128xf32>
    %358 = tpu.matmul %357, %356, %cst_138 {dimension_numbers = #tpu.dot_dimension_numbers<[1], [0], [0], [1], [0, 0, 1, 1], [], []>} : vector<56x32xbf16>, vector<32x128xbf16>, vector<56x128xf32> -> vector<56x128xf32>
    %c1_139 = arith.constant 1 : index
    %c0_140 = arith.constant 0 : index
    %c0_141 = arith.constant 0 : index
    %359 = vector.load %arg11[%c1_139, %c0_140, %c0_141] : memref<2x1x128xf32, #tpu.memory_space<vmem>>, vector<1x1x128xf32>
    %360 = vector.shape_cast %359 : vector<1x1x128xf32> to vector<1x128xf32>
    %361 = vector.broadcast %360 : vector<1x128xf32> to vector<56x128xf32>
    %362 = arith.addf %358, %361 : vector<56x128xf32>
    %cst_142 = arith.constant 5.000000e-01 : f32
    %363 = vector.broadcast %cst_142 : f32 to vector<56x128xf32>
    %364 = arith.mulf %363, %362 : vector<56x128xf32>
    %cst_143 = arith.constant 0.707106769 : f32
    %365 = vector.broadcast %cst_143 : f32 to vector<56x128xf32>
    %366 = arith.mulf %362, %365 : vector<56x128xf32>
    %367 = math.absf %366 : vector<56x128xf32>
    %cst_144 = arith.constant 0.327591091 : f32
    %368 = vector.broadcast %cst_144 : f32 to vector<56x128xf32>
    %369 = arith.mulf %368, %367 : vector<56x128xf32>
    %cst_145 = arith.constant 1.000000e+00 : f32
    %370 = vector.broadcast %cst_145 : f32 to vector<56x128xf32>
    %371 = arith.addf %370, %369 : vector<56x128xf32>
    %cst_146 = arith.constant 1.000000e+00 : f32
    %372 = vector.broadcast %cst_146 : f32 to vector<56x128xf32>
    %373 = arith.divf %372, %371 : vector<56x128xf32>
    %cst_147 = arith.constant 1.06140542 : f32
    %374 = vector.broadcast %cst_147 : f32 to vector<56x128xf32>
    %375 = arith.mulf %373, %374 : vector<56x128xf32>
    %cst_148 = arith.constant -1.45315206 : f32
    %376 = vector.broadcast %cst_148 : f32 to vector<56x128xf32>
    %377 = arith.addf %376, %375 : vector<56x128xf32>
    %378 = arith.mulf %373, %377 : vector<56x128xf32>
    %cst_149 = arith.constant 1.42141378 : f32
    %379 = vector.broadcast %cst_149 : f32 to vector<56x128xf32>
    %380 = arith.addf %379, %378 : vector<56x128xf32>
    %381 = arith.mulf %373, %380 : vector<56x128xf32>
    %cst_150 = arith.constant -0.284496725 : f32
    %382 = vector.broadcast %cst_150 : f32 to vector<56x128xf32>
    %383 = arith.addf %382, %381 : vector<56x128xf32>
    %384 = arith.mulf %373, %383 : vector<56x128xf32>
    %cst_151 = arith.constant 0.254829586 : f32
    %385 = vector.broadcast %cst_151 : f32 to vector<56x128xf32>
    %386 = arith.addf %385, %384 : vector<56x128xf32>
    %387 = arith.mulf %373, %386 : vector<56x128xf32>
    %cst_152 = arith.constant 0.000000e+00 : f32
    %388 = vector.broadcast %cst_152 : f32 to vector<56x128xf32>
    %389 = arith.subf %388, %367 : vector<56x128xf32>
    %390 = arith.mulf %389, %367 : vector<56x128xf32>
    %391 = math.exp %390 : vector<56x128xf32>
    %392 = arith.mulf %387, %391 : vector<56x128xf32>
    %cst_153 = arith.constant 1.000000e+00 : f32
    %393 = vector.broadcast %cst_153 : f32 to vector<56x128xf32>
    %394 = arith.subf %393, %392 : vector<56x128xf32>
    %cst_154 = arith.constant 0.000000e+00 : f32
    %395 = vector.broadcast %cst_154 : f32 to vector<56x128xf32>
    %396 = arith.cmpf olt, %366, %395 : vector<56x128xf32>
    %cst_155 = arith.constant 0.000000e+00 : f32
    %397 = vector.broadcast %cst_155 : f32 to vector<56x128xf32>
    %398 = arith.subf %397, %394 : vector<56x128xf32>
    %399 = arith.select %396, %398, %394 : vector<56x128xi1>, vector<56x128xf32>
    %cst_156 = arith.constant 1.000000e+00 : f32
    %400 = vector.broadcast %cst_156 : f32 to vector<56x128xf32>
    %401 = arith.addf %400, %399 : vector<56x128xf32>
    %402 = arith.mulf %364, %401 : vector<56x128xf32>
    %c1_157 = arith.constant 1 : index
    %c0_158 = arith.constant 0 : index
    %c0_159 = arith.constant 0 : index
    %403 = vector.load %arg12[%c1_157, %c0_158, %c0_159] : memref<2x128x32xbf16, #tpu.memory_space<vmem>>, vector<1x128x32xbf16>
    %404 = vector.shape_cast %403 : vector<1x128x32xbf16> to vector<128x32xbf16>
    %405 = arith.truncf %402 : vector<56x128xf32> to vector<56x128xbf16>
    %cst_160 = arith.constant dense<0.000000e+00> : vector<56x32xf32>
    %406 = tpu.matmul %405, %404, %cst_160 {dimension_numbers = #tpu.dot_dimension_numbers<[1], [0], [0], [1], [0, 0, 1, 1], [], []>} : vector<56x128xbf16>, vector<128x32xbf16>, vector<56x32xf32> -> vector<56x32xf32>
    %c1_161 = arith.constant 1 : index
    %c0_162 = arith.constant 0 : index
    %c0_163 = arith.constant 0 : index
    %407 = vector.load %arg13[%c1_161, %c0_162, %c0_163] : memref<2x1x32xf32, #tpu.memory_space<vmem>>, vector<1x1x32xf32>
    %408 = vector.shape_cast %407 : vector<1x1x32xf32> to vector<1x32xf32>
    %409 = vector.broadcast %408 : vector<1x32xf32> to vector<56x32xf32>
    %410 = arith.addf %406, %409 : vector<56x32xf32>
    %411 = arith.addf %330, %410 : vector<56x32xf32>
    %412 = vector.shape_cast %411 : vector<56x32xf32> to vector<1x56x32xf32>
    %c0_164 = arith.constant 0 : index
    %c0_165 = arith.constant 0 : index
    %c0_166 = arith.constant 0 : index
    %413 = vector.load %arg15[%c0_164, %c0_165, %c0_166] : memref<1x56x32xf32, #tpu.memory_space<vmem>>, vector<1x56x32xf32>
    tpu.vector_store %arg15[%c0_164, %c0_165, %c0_166], %412 {strides = array<i32>} : memref<1x56x32xf32, #tpu.memory_space<vmem>>, vector<1x56x32xf32>,
    return
  }
  func.func @transform_0(%arg0: i32) -> (i32, i32, i32) {
    %c0_i32 = arith.constant 0 : i32
    %c0_i32_0 = arith.constant 0 : i32
    %c0_i32_1 = arith.constant 0 : i32
    return %arg0, %c0_i32, %c0_i32_0 : i32, i32, i32
  }
  func.func @transform_1(%arg0: i32) -> (i32, i32) {
    %c0_i32 = arith.constant 0 : i32
    %c0_i32_0 = arith.constant 0 : i32
    %c0_i32_1 = arith.constant 0 : i32
    return %c0_i32, %c0_i32_0 : i32, i32
  }
  func.func @transform_2(%arg0: i32) -> (i32, i32) {
    %c0_i32 = arith.constant 0 : i32
    %c0_i32_0 = arith.constant 0 : i32
    %c0_i32_1 = arith.constant 0 : i32
    return %c0_i32, %c0_i32_0 : i32, i32
  }
  func.func @transform_3(%arg0: i32) -> (i32, i32) {
    %c0_i32 = arith.constant 0 : i32
    %c0_i32_0 = arith.constant 0 : i32
    %c0_i32_1 = arith.constant 0 : i32
    return %c0_i32, %c0_i32_0 : i32, i32
  }
  func.func @transform_4(%arg0: i32) -> (i32, i32) {
    %c0_i32 = arith.constant 0 : i32
    %c0_i32_0 = arith.constant 0 : i32
    %c0_i32_1 = arith.constant 0 : i32
    return %c0_i32, %c0_i32_0 : i32, i32
  }
  func.func @transform_5(%arg0: i32) -> (i32, i32, i32) {
    %c0_i32 = arith.constant 0 : i32
    %c0_i32_0 = arith.constant 0 : i32
    %c0_i32_1 = arith.constant 0 : i32
    %c0_i32_2 = arith.constant 0 : i32
    return %c0_i32, %c0_i32_0, %c0_i32_1 : i32, i32, i32
  }
  func.func @transform_6(%arg0: i32) -> (i32, i32, i32) {
    %c0_i32 = arith.constant 0 : i32
    %c0_i32_0 = arith.constant 0 : i32
    %c0_i32_1 = arith.constant 0 : i32
    %c0_i32_2 = arith.constant 0 : i32
    return %c0_i32, %c0_i32_0, %c0_i32_1 : i32, i32, i32
  }
  func.func @transform_7(%arg0: i32) -> (i32, i32, i32) {
    %c0_i32 = arith.constant 0 : i32
    %c0_i32_0 = arith.constant 0 : i32
    %c0_i32_1 = arith.constant 0 : i32
    %c0_i32_2 = arith.constant 0 : i32
    return %c0_i32, %c0_i32_0, %c0_i32_1 : i32, i32, i32
  }
  func.func @transform_8(%arg0: i32) -> (i32, i32, i32) {
    %c0_i32 = arith.constant 0 : i32
    %c0_i32_0 = arith.constant 0 : i32
    %c0_i32_1 = arith.constant 0 : i32
    %c0_i32_2 = arith.constant 0 : i32
    return %c0_i32, %c0_i32_0, %c0_i32_1 : i32, i32, i32
  }
  func.func @transform_9(%arg0: i32) -> (i32, i32, i32) {
    %c0_i32 = arith.constant 0 : i32
    %c0_i32_0 = arith.constant 0 : i32
    %c0_i32_1 = arith.constant 0 : i32
    %c0_i32_2 = arith.constant 0 : i32
    return %c0_i32, %c0_i32_0, %c0_i32_1 : i32, i32, i32
  }
  func.func @transform_10(%arg0: i32) -> (i32, i32, i32) {
    %c0_i32 = arith.constant 0 : i32
    %c0_i32_0 = arith.constant 0 : i32
    %c0_i32_1 = arith.constant 0 : i32
    %c0_i32_2 = arith.constant 0 : i32
    return %c0_i32, %c0_i32_0, %c0_i32_1 : i32, i32, i32
  }
  func.func @transform_11(%arg0: i32) -> (i32, i32, i32) {
    %c0_i32 = arith.constant 0 : i32
    %c0_i32_0 = arith.constant 0 : i32
    %c0_i32_1 = arith.constant 0 : i32
    %c0_i32_2 = arith.constant 0 : i32
    return %c0_i32, %c0_i32_0, %c0_i32_1 : i32, i32, i32
  }
  func.func @transform_12(%arg0: i32) -> (i32, i32, i32) {
    %c0_i32 = arith.constant 0 : i32
    %c0_i32_0 = arith.constant 0 : i32
    %c0_i32_1 = arith.constant 0 : i32
    %c0_i32_2 = arith.constant 0 : i32
    return %c0_i32, %c0_i32_0, %c0_i32_1 : i32, i32, i32
  }
  func.func @transform_13(%arg0: i32) -> (i32, i32) {
    %c0_i32 = arith.constant 0 : i32
    %c0_i32_0 = arith.constant 0 : i32
    %c0_i32_1 = arith.constant 0 : i32
    return %c0_i32, %c0_i32_0 : i32, i32
  }
  func.func @transform_14(%arg0: i32) -> (i32, i32, i32) {
    %c0_i32 = arith.constant 0 : i32
    %c0_i32_0 = arith.constant 0 : i32
    %c0_i32_1 = arith.constant 0 : i32
    return %arg0, %c0_i32, %c0_i32_0 : i32, i32, i32
  }
}

</mosaic_0001>

<bundles_post_ra>
// kernel: vit_forward.1
= control target key start
LH: loop header
LB: loop body
LE: loop exit
PB: predicated region body
PF: predicated region fallthrough
CT: control target
= control target key end

     0   :  { %s5849_s29 = smov 0   ;;  %s7289_s0 = inlined_call_operand.vmem [shape: f32[2,56,32], index: 0, kind: input, shape index: {}]   ;;  %s7290_s1 = inlined_call_operand.vmem [shape: bf16[32,32], index: 1, kind: input, shape index: {}]   ;;  %s7291_s2 = inlined_call_operand.vmem [shape: f32[1,32], index: 2, kind: input, shape index: {}]   ;;  %s7292_s3 = inlined_call_operand.vmem [shape: f32[1,32], index: 3, kind: input, shape index: {}]   ;;  %s7293_s4 = inlined_call_operand.vmem [shape: f32[1,32], index: 4, kind: input, shape index: {}]   ;;  %s7294_s5 = inlined_call_operand.vmem [shape: f32[2,1,32], index: 5, kind: input, shape index: {}]   ;;  %s7295_s6 = inlined_call_operand.vmem [shape: f32[2,1,32], index: 6, kind: input, shape index: {}]   ;;  %s7296_s7 = inlined_call_operand.vmem [shape: f32[2,1,32], index: 7, kind: input, shape index: {}]   ;;  %s7297_s8 = inlined_call_operand.vmem [shape: f32[2,1,32], index: 8, kind: input, shape index: {}]   ;;  %s7298_s9 = inlined_call_operand.vmem [shape: bf16[2,32,128], index: 9, kind: input, shape index: {}]   ;;  %s7299_s10 = inlined_call_operand.vmem [shape: f32[2,1,128], index: 10, kind: input, shape index: {}]   ;;  %s7300_s11 = inlined_call_operand.vmem [shape: bf16[2,128,32], index: 11, kind: input, shape index: {}]   ;;  %s7301_s12 = inlined_call_operand.vmem [shape: f32[2,1,32], index: 12, kind: input, shape index: {}]   ;;  %s7302_s13 = inlined_call_operand.vmem [shape: bf16[32,32], index: 13, kind: input, shape index: {}]   ;;  %s7303_s14 = inlined_call_operand.vmem [shape: f32[2,56,32], index: 14, kind: output, shape index: {}]  }
   0x1 LB: > { %s4621_s30 = sadd.s32 4294967295, %s5765_s29   ;;  %p4625_p0 = scmp.ge.s32.totalorder %s5765_s29, 1  ;;  %s5765_s29 = sphi %s5849_s29, %s24_s29  }
   0x2   : > { %p412_p1 = scmp.lt.s32.totalorder %s5765_s29, 3 }
   0x4   : > { %p413_p2 = pnand %p4625_p0, %p412_p1 }
   0x5   : > { %p458_p3 = scmp.lt.s32.totalorder (!%p413_p2), %s4621_s30, 1  ;;  %s5768_s24 = smov (!%p413_p2), 120  }
   0x6   : > { %416 = sbr.rel (%p413_p2) target bundleno = 8300 (0x206c), region = 76  ;;  %s5769_s25 = smov (!%p413_p2), 112  }
   0x7   : > { %s5770_s26 = smov (!%p413_p2), 104   ;;  %s5771_s27 = smov (!%p413_p2), 8  }
   0x8   : > { %s5772_s28 = smov (!%p413_p2), 16   ;;  %s5773_s15 = smov (!%p413_p2), 24  }
   0xb   : > { %v5383_v0 = vld [vmem:[%s7290_s1 + $0x8] sm:$0xff]   ;;  %v5384_v1 = vld [vmem:[%s7290_s1] sm:$0xff]   ;;  %s7307_s30 = smov (!%p458_p3, %s4621_s30), 1  ;;  %vm503_vm0 = vcmask 261120   ;;  %vm923_vm1 = vcmask 64512   ;;  %vm1108_vm2 = vcmask 1043456  }
   0xc   : > { %4963 = vmatprep.subr.bf16.mxu0 %v5383_v0  ;;  %s7304_s19 = smul.u32 56, %s7307_s30  ;;  %v4628_v13 = vld [vmem:[%s7291_s2] ss:$0 sm:$0xff]  ;;  %vm1014_vm4 = vcmask 457728   ;;  %vm2058_vm5 = vcmask 195584   ;;  %vm2050_vm6 = vcmask 130048  }
   0xd   : > { %4964 = vmatpush3.bf16.msra.mxu0 %v5383_v0 }
   0xe   : > { %4965 = vmatprep.subr.bf16.mxu0 %v5384_v1  ;;  %s462_s22 = scalar_lea.vmem %s7289_s0, %s7304_s19 }
   0xf   : > { %v469_v2 = vld [vmem:[%s462_s22] sm:$0xff]  ;;  %v470_v3 = vld [vmem:[%s462_s22 + $0x8] sm:$0xff]  ;;  %v471_v4 = vld [vmem:[%s462_s22 + $0x10] sm:$0xff] }
  0x10   : > { %v480_v5 = vpack.c.bf16 %v470_v3, %v469_v2  ;;  %v472_v6 = vld [vmem:[%s462_s22 + $0x18] sm:$0xff]  ;;  %v473_v7 = vld [vmem:[%s462_s22 + $0x20] sm:$0xff]  ;;  %v474_v8 = vld [vmem:[%s462_s22 + $0x28] sm:$0xff] }
  0x11   : > { %4966 = vmatpush3.bf16.msra.mxu0 %v5384_v1  ;;  %v481_v9 = vpack.c.bf16 %v472_v6, %v471_v4  ;;  %v482_v10 = vpack.c.bf16 %v474_v8, %v473_v7  ;;  %v475_v11 = vld [vmem:[%s462_s22 + $0x30] sm:$0xff] }
  0x12   : > { %4967 = vmatprep.mubr.msk.bf16.mxu0 %vm503_vm0, %v480_v5  ;;  %v483_v12 = vpack.c.bf16 %v475_v11, %v475_v11 }
  0x14   : > { %4968 = vmatmul.mubr.msk.bf16.vlgmr.msra.gmra.mxu0 %vm503_vm0, %v481_v9 }
  0x15   : > { %4971 = vmatprep.mubr.msk.bf16.mxu0 %vm503_vm0, %v482_v10 }
  0x1c   : > { %4972 = vmatmul.mubr.msk.bf16.gmra.mxu0 %vm503_vm0, %v483_v12 }
  0xd4   : > { %v4969_v14 = vpop.f32.mrf.mxu0 }
  0xd5   : > { %v559_v15 = vadd.f32 %v4969_v14, %v4628_v13 }
  0xd6   : > { %v550_v16 = vpop.f32.mrf.mxu0 }
  0xd7   : > { %v551_v17 = vadd.f32 %v4628_v13, %v550_v16  ;;  %v588_v18 = vsel %vm503_vm0, %v559_v15, 0.0 }
  0xd8   : > { %589 = vadd.xlane.f32.xlu1 %v588_v18  ;;  %v4970_v19 = vpop.f32.mrf.mxu0 }
  0xd9   : > { %v562_v20 = vadd.f32 %v4970_v19, %v4628_v13  ;;  %v582_v21 = vsel %vm503_vm0, %v551_v17, 0.0 }
  0xda   : > { %v553_v22 = vpop.f32.mrf.mxu0  ;;  %583 = vadd.xlane.f32.xlu0 %v582_v21 }
  0xdb   : > { %v554_v23 = vadd.f32 %v4628_v13, %v553_v22  ;;  %v591_v24 = vsel %vm503_vm0, %v562_v20, 0.0 }
  0xdc   : > { %592 = vadd.xlane.f32.xlu1 %v591_v24  ;;  %v4973_v25 = vpop.f32.mrf.mxu0 }
  0xdd   : > { %v585_v26 = vsel %vm503_vm0, %v554_v23, 0.0  ;;  %v575_v30 = vadd.f32 %v4973_v25, %v4628_v13 }
  0xde   : > { %v566_v27 = vpop.f32.mrf.mxu0  ;;  %586 = vadd.xlane.f32.xlu0 %v585_v26 }
  0xdf   : > { %v567_v28 = vadd.f32 %v4628_v13, %v566_v27  ;;  %v600_v35 = vsel %vm503_vm0, %v575_v30, 0.0 }
  0xe0   : > { %v4974_v29 = vpop.f32.mrf.mxu0 }
  0xe1   : > { %v594_v31 = vsel %vm503_vm0, %v567_v28, 0.0  ;;  %v4635_v29 = vld [vmem:[%s7292_s3] ss:$0 sm:$0xff] }
  0xe2   : > { %v569_v32 = vpop.f32.mrf.mxu0  ;;  %595 = vadd.xlane.f32.xlu0 %v594_v31  ;;  %v4636_v31 = vld [vmem:[%s7293_s4] ss:$0 sm:$0xff] }
  0xe3   : > { %v570_v33 = vadd.f32 %v4628_v13, %v569_v32 }
  0xe5   : > { %v597_v34 = vsel %vm503_vm0, %v570_v33, 0.0 }
  0xe6   : > { %598 = vadd.xlane.f32.xlu1 %v597_v34  ;;  %601 = vadd.xlane.f32.xlu0 %v600_v35 }
 0x161   : > { %v590_v36 = vpop.xlane.xlu1 %589 }
 0x162   : > { %v606_v37 = vmul.f32 0.03125, %v590_v36 }
 0x163   : > { %v584_v38 = vpop.xlane.xlu0 %583 }
 0x164   : > { %v604_v39 = vmul.f32 0.03125, %v584_v38  ;;  %v5885_v41 = vsub.f32 %v559_v15, %v606_v37 }
 0x165   : > { %v593_v40 = vpop.xlane.xlu1 %592 }
 0x166   : > { %v5887_v42 = vsub.f32 %v551_v17, %v604_v39  ;;  %v607_v43 = vmul.f32 0.03125, %v593_v40  ;;  %v620_v50 = vmul.f32 %v5885_v41, %v5885_v41 }
 0x167   : > { %v587_v44 = vpop.xlane.xlu0 %586 }
 0x168   : > { %v605_v45 = vmul.f32 0.03125, %v587_v44  ;;  %v618_v46 = vmul.f32 %v5887_v42, %v5887_v42  ;;  %v5891_v47 = vsub.f32 %v562_v20, %v607_v43  ;;  %v631_v55 = vsel %vm503_vm0, %v620_v50, 0.0 }
 0x16a   : > { %v5893_v48 = vsub.f32 %v554_v23, %v605_v45  ;;  %v625_v49 = vsel %vm503_vm0, %v618_v46, 0.0  ;;  %v621_v57 = vmul.f32 %v5891_v47, %v5891_v47 }
 0x16b   : > { %626 = vadd.xlane.f32.xlu1 %v625_v49  ;;  %v596_v51 = vpop.xlane.xlu0 %595 }
 0x16c   : > { %v608_v52 = vmul.f32 0.03125, %v596_v51  ;;  %v619_v53 = vmul.f32 %v5893_v48, %v5893_v48  ;;  %v634_v1 = vsel %vm503_vm0, %v621_v57, 0.0 }
 0x16e   : > { %v5900_v54 = vsub.f32 %v567_v28, %v608_v52  ;;  %v628_v56 = vsel %vm503_vm0, %v619_v53, 0.0 }
 0x16f   : > { %v599_v58 = vpop.xlane.xlu1 %598  ;;  %632 = vadd.xlane.f32.xlu1 %v631_v55  ;;  %629 = vadd.xlane.f32.xlu0 %v628_v56  ;;  %v602_v59 = vpop.xlane.xlu0 %601 }
 0x170   : > { %v609_v60 = vmul.f32 0.03125, %v599_v58  ;;  %v610_v61 = vmul.f32 0.03125, %v602_v59  ;;  %v622_v62 = vmul.f32 %v5900_v54, %v5900_v54 }
 0x172   : > { %v5908_v63 = vsub.f32 %v570_v33, %v609_v60  ;;  %v5910_v0 = vsub.f32 %v575_v30, %v610_v61  ;;  %v637_v2 = vsel %vm503_vm0, %v622_v62, 0.0 }
 0x173   : > { %635 = vadd.xlane.f32.xlu0 %v634_v1  ;;  %638 = vadd.xlane.f32.xlu1 %v637_v2 }
 0x174   : > { %v623_v3 = vmul.f32 %v5908_v63, %v5908_v63  ;;  %v624_v4 = vmul.f32 %v5910_v0, %v5910_v0 }
 0x176   : > { %v640_v5 = vsel %vm503_vm0, %v623_v3, 0.0  ;;  %v643_v6 = vsel %vm503_vm0, %v624_v4, 0.0 }
 0x177   : > { %641 = vadd.xlane.f32.xlu0 %v640_v5  ;;  %644 = vadd.xlane.f32.xlu1 %v643_v6 }
 0x1f4   : > { %v627_v7 = vpop.xlane.xlu1 %626 }
 0x1f5   : > { %v646_v8 = vmul.f32 0.03125, %v627_v7 }
 0x1f7   : > { %v653_v9 = vadd.f32 1e-05, %v646_v8 }
 0x1f8   : > { %v633_v10 = vpop.xlane.xlu1 %632  ;;  %v630_v11 = vpop.xlane.xlu0 %629 }
 0x1f9   : > { %5409 = vrsqrt.f32 %v653_v9  ;;  %v648_v12 = vmul.f32 0.03125, %v633_v10  ;;  %v647_v13 = vmul.f32 0.03125, %v630_v11 }
 0x1fb   : > { %v655_v14 = vadd.f32 1e-05, %v648_v12  ;;  %v654_v15 = vadd.f32 1e-05, %v647_v13 }
 0x1fc   : > { %v639_v16 = vpop.xlane.xlu1 %638  ;;  %v636_v17 = vpop.xlane.xlu0 %635 }
 0x1fd   : > { %5411 = vrsqrt.f32 %v655_v14  ;;  %v650_v18 = vmul.f32 0.03125, %v639_v16  ;;  %v649_v19 = vmul.f32 0.03125, %v636_v17 }
 0x1fe   : > { %5413 = vrsqrt.f32 %v654_v15 }
 0x1ff   : > { %v657_v20 = vadd.f32 1e-05, %v650_v18  ;;  %v656_v21 = vadd.f32 1e-05, %v649_v19 }
 0x200   : > { %v645_v22 = vpop.xlane.xlu1 %644  ;;  %v642_v23 = vpop.xlane.xlu0 %641 }
 0x201   : > { %5415 = vrsqrt.f32 %v657_v20  ;;  %v652_v24 = vmul.f32 0.03125, %v645_v22  ;;  %v651_v25 = vmul.f32 0.03125, %v642_v23 }
 0x202   : > { %5417 = vrsqrt.f32 %v656_v21 }
 0x203   : > { %v659_v26 = vadd.f32 1e-05, %v652_v24  ;;  %v658_v27 = vadd.f32 1e-05, %v651_v25 }
 0x205   : > { %5419 = vrsqrt.f32 %v659_v26 }
 0x206   : > { %v5410_v28 = vpop.eup %5409  ;;  %5421 = vrsqrt.f32 %v658_v27 }
 0x207   : > { %v667_v30 = vmul.f32 %v5410_v28, %v5887_v42 }
 0x209   : > { %v680_v32 = vmul.f32 %v4635_v29, %v667_v30 }
 0x20a   : > { %v5412_v33 = vpop.eup %5411 }
 0x20b   : > { %v5414_v34 = vpop.eup %5413  ;;  %v5927_v35 = vadd.f32 %v4636_v31, %v680_v32  ;;  %v669_v36 = vmul.f32 %v5412_v33, %v5885_v41 }
 0x20c   : > { %v668_v37 = vmul.f32 %v5414_v34, %v5893_v48 }
 0x20d   : > { %v706_v38 = vsel %vm503_vm0, %v5927_v35, 0.0  ;;  %v682_v39 = vmul.f32 %v4635_v29, %v669_v36 }
 0x20e   : > { %v5416_v40 = vpop.eup %5415  ;;  %707 = vadd.xlane.f32.xlu0 %v706_v38  ;;  %v681_v42 = vmul.f32 %v4635_v29, %v668_v37  ;;  %v5385_v37 = vld [vmem:[%s7302_s13 + $0x8] sm:$0xff]   ;;  %v5386_v38 = vld [vmem:[%s7302_s13] sm:$0xff]  }
 0x20f   : > { %v5418_v43 = vpop.eup %5417  ;;  %v5933_v44 = vadd.f32 %v4636_v31, %v682_v39  ;;  %v671_v45 = vmul.f32 %v5416_v40, %v5900_v54  ;;  %4975 = vmatprep.subr.bf16.mxu1 %v5385_v37 }
 0x210   : > { %v5936_v46 = vadd.f32 %v4636_v31, %v681_v42  ;;  %v670_v49 = vmul.f32 %v5418_v43, %v5891_v47  ;;  %4976 = vmatpush3.bf16.msra.mxu1 %v5385_v37 }
 0x211   : > { %v712_v41 = vsel %vm503_vm0, %v5933_v44, 0.0  ;;  %v684_v48 = vmul.f32 %v4635_v29, %v671_v45  ;;  %4977 = vmatprep.subr.bf16.mxu1 %v5386_v38 }
 0x212   : > { %v5420_v50 = vpop.eup %5419  ;;  %713 = vadd.xlane.f32.xlu0 %v712_v41  ;;  %v709_v51 = vsel %vm503_vm0, %v5936_v46, 0.0  ;;  %v683_v52 = vmul.f32 %v4635_v29, %v670_v49 }
 0x213   : > { %v5422_v53 = vpop.eup %5421  ;;  %710 = vadd.xlane.f32.xlu1 %v709_v51  ;;  %v5943_v55 = vadd.f32 %v4636_v31, %v684_v48  ;;  %v673_v54 = vmul.f32 %v5420_v50, %v5910_v0 }
 0x214   : > { %v5946_v56 = vadd.f32 %v4636_v31, %v683_v52  ;;  %v672_v47 = vmul.f32 %v5422_v53, %v5908_v63  ;;  %4978 = vmatpush3.bf16.msra.mxu1 %v5386_v38 }
 0x215   : > { %v718_v57 = vsel %vm503_vm0, %v5943_v55, 0.0  ;;  %v686_v58 = vmul.f32 %v4635_v29, %v673_v54 }
 0x216   : > { %719 = vadd.xlane.f32.xlu0 %v718_v57  ;;  %v715_v59 = vsel %vm503_vm0, %v5946_v56, 0.0  ;;  %v685_v60 = vmul.f32 %v4635_v29, %v672_v47 }
 0x217   : > { %716 = vadd.xlane.f32.xlu1 %v715_v59  ;;  %v5953_v61 = vadd.f32 %v4636_v31, %v686_v58 }
 0x218   : > { %v5955_v62 = vadd.f32 %v4636_v31, %v685_v60 }
 0x219   : > { %v724_v0 = vsel %vm503_vm0, %v5953_v61, 0.0 }
 0x21a   : > { %725 = vadd.xlane.f32.xlu0 %v724_v0  ;;  %v721_v63 = vsel %vm503_vm0, %v5955_v62, 0.0 }
 0x21b   : > { %722 = vadd.xlane.f32.xlu1 %v721_v63 }
 0x297   : > { %v708_v1 = vpop.xlane.xlu0 %707 }
 0x298   : > { %v727_v2 = vmul.f32 0.03125, %v708_v1 }
 0x29a   : > { %v5962_v3 = vsub.f32 %v5927_v35, %v727_v2 }
 0x29b   : > { %v714_v4 = vpop.xlane.xlu0 %713 }
 0x29c   : > { %v711_v5 = vpop.xlane.xlu1 %710  ;;  %v729_v6 = vmul.f32 0.03125, %v714_v4  ;;  %v741_v7 = vmul.f32 %v5962_v3, %v5962_v3 }
 0x29d   : > { %v728_v8 = vmul.f32 0.03125, %v711_v5  ;;  %v4637_v5 = vld [vmem:[%s7294_s5] ss:$0 sm:$0xff] }
 0x29e   : > { %v5967_v9 = vsub.f32 %v5933_v44, %v729_v6  ;;  %v748_v10 = vsel %vm503_vm0, %v741_v7, 0.0 }
 0x29f   : > { %v5971_v11 = vsub.f32 %v5936_v46, %v728_v8  ;;  %749 = vadd.xlane.f32.xlu1 %v748_v10  ;;  %v720_v12 = vpop.xlane.xlu0 %719  ;;  %v4638_v10 = vld [vmem:[%s7295_s6] ss:$0 sm:$0xff] }
 0x2a0   : > { %v717_v13 = vpop.xlane.xlu1 %716  ;;  %v731_v14 = vmul.f32 0.03125, %v720_v12  ;;  %v743_v15 = vmul.f32 %v5967_v9, %v5967_v9 }
 0x2a1   : > { %v730_v16 = vmul.f32 0.03125, %v717_v13  ;;  %v742_v17 = vmul.f32 %v5971_v11, %v5971_v11 }
 0x2a2   : > { %v5978_v18 = vsub.f32 %v5943_v55, %v731_v14  ;;  %v754_v19 = vsel %vm503_vm0, %v743_v15, 0.0 }
 0x2a3   : > { %v5982_v20 = vsub.f32 %v5946_v56, %v730_v16  ;;  %v751_v21 = vsel %vm503_vm0, %v742_v17, 0.0  ;;  %755 = vadd.xlane.f32.xlu1 %v754_v19  ;;  %v726_v22 = vpop.xlane.xlu0 %725 }
 0x2a4   : > { %752 = vadd.xlane.f32.xlu0 %v751_v21  ;;  %v723_v23 = vpop.xlane.xlu1 %722  ;;  %v733_v24 = vmul.f32 0.03125, %v726_v22  ;;  %v745_v25 = vmul.f32 %v5978_v18, %v5978_v18 }
 0x2a5   : > { %v732_v26 = vmul.f32 0.03125, %v723_v23  ;;  %v744_v27 = vmul.f32 %v5982_v20, %v5982_v20 }
 0x2a6   : > { %v5990_v28 = vsub.f32 %v5953_v61, %v733_v24  ;;  %v760_v29 = vsel %vm503_vm0, %v745_v25, 0.0 }
 0x2a7   : > { %v5994_v30 = vsub.f32 %v5955_v62, %v732_v26  ;;  %v757_v31 = vsel %vm503_vm0, %v744_v27, 0.0  ;;  %761 = vadd.xlane.f32.xlu1 %v760_v29 }
 0x2a8   : > { %758 = vadd.xlane.f32.xlu0 %v757_v31  ;;  %v747_v32 = vmul.f32 %v5990_v28, %v5990_v28 }
 0x2a9   : > { %v746_v33 = vmul.f32 %v5994_v30, %v5994_v30 }
 0x2aa   : > { %v766_v34 = vsel %vm503_vm0, %v747_v32, 0.0 }
 0x2ab   : > { %v763_v36 = vsel %vm503_vm0, %v746_v33, 0.0  ;;  %767 = vadd.xlane.f32.xlu1 %v766_v34 }
 0x2ac   : > { %764 = vadd.xlane.f32.xlu0 %v763_v36 }
 0x328   : > { %v750_v39 = vpop.xlane.xlu1 %749 }
 0x329   : > { %v769_v40 = vmul.f32 0.03125, %v750_v39 }
 0x32b   : > { %v776_v42 = vadd.f32 1e-05, %v769_v40 }
 0x32c   : > { %v756_v43 = vpop.xlane.xlu1 %755 }
 0x32d   : > { %5423 = vrsqrt.f32 %v776_v42  ;;  %v771_v45 = vmul.f32 0.03125, %v756_v43  ;;  %v753_v49 = vpop.xlane.xlu0 %752 }
 0x32e   : > { %v770_v41 = vmul.f32 0.03125, %v753_v49 }
 0x32f   : > { %v778_v48 = vadd.f32 1e-05, %v771_v45 }
 0x330   : > { %v777_v50 = vadd.f32 1e-05, %v770_v41  ;;  %v762_v51 = vpop.xlane.xlu1 %761 }
 0x331   : > { %5425 = vrsqrt.f32 %v778_v48  ;;  %v773_v52 = vmul.f32 0.03125, %v762_v51  ;;  %v759_v53 = vpop.xlane.xlu0 %758 }
 0x332   : > { %5427 = vrsqrt.f32 %v777_v50  ;;  %v772_v54 = vmul.f32 0.03125, %v759_v53 }
 0x333   : > { %v780_v47 = vadd.f32 1e-05, %v773_v52 }
 0x334   : > { %v779_v57 = vadd.f32 1e-05, %v772_v54  ;;  %v768_v58 = vpop.xlane.xlu1 %767 }
 0x335   : > { %5429 = vrsqrt.f32 %v780_v47  ;;  %v775_v59 = vmul.f32 0.03125, %v768_v58  ;;  %v765_v60 = vpop.xlane.xlu0 %764  ;;  %v700_v58 = vlaneseq }
 0x336   : > { %5431 = vrsqrt.f32 %v779_v57  ;;  %v774_v0 = vmul.f32 0.03125, %v765_v60 }
 0x337   : > { %v782_v63 = vadd.f32 1e-05, %v775_v59  ;;  %v701_v59 = vand.u32 127, %v700_v58 }
 0x338   : > { %v781_v1 = vadd.f32 1e-05, %v774_v0 }
 0x339   : > { %5433 = vrsqrt.f32 %v782_v63  ;;  %vm702_vm3 = vcmp.lt.s32.totalorder %v701_v59, 49 }
 0x33a   : > { %v5424_v2 = vpop.eup %5423  ;;  %5435 = vrsqrt.f32 %v781_v1 }
 0x33b   : > { %v790_v4 = vmul.f32 %v5424_v2, %v5962_v3  ;;  %v5767_v2 = vmov -1e+30  }
 0x33d   : > { %v803_v8 = vmul.f32 %v4637_v5, %v790_v4  ;;  %v6068_v4 = vsel %vm702_vm3, 0.0, %v5767_v2 }
 0x33e   : > { %v5426_v6 = vpop.eup %5425 }
 0x33f   : > { %v5428_v7 = vpop.eup %5427  ;;  %v792_v13 = vmul.f32 %v5426_v6, %v5967_v9  ;;  %v816_v17 = vadd.f32 %v4638_v10, %v803_v8 }
 0x340   : > { %v791_v12 = vmul.f32 %v5428_v7, %v5971_v11 }
 0x341   : > { %v805_v21 = vmul.f32 %v4637_v5, %v792_v13 }
 0x342   : > { %v5430_v14 = vpop.eup %5429  ;;  %v804_v15 = vmul.f32 %v4637_v5, %v791_v12 }
 0x343   : > { %v5432_v16 = vpop.eup %5431  ;;  %v794_v22 = vmul.f32 %v5430_v14, %v5978_v18  ;;  %v818_v11 = vadd.f32 %v4638_v10, %v805_v21 }
 0x344   : > { %v817_v3 = vadd.f32 %v4638_v10, %v804_v15  ;;  %v793_v19 = vmul.f32 %v5432_v16, %v5982_v20 }
 0x345   : > { %v807_v31 = vmul.f32 %v4637_v5, %v794_v22 }
 0x346   : > { %v5434_v23 = vpop.eup %5433  ;;  %v827_v24 = vpack.c.bf16 %v817_v3, %v816_v17  ;;  %v806_v25 = vmul.f32 %v4637_v5, %v793_v19 }
 0x347   : > { %v5436_v26 = vpop.eup %5435  ;;  %v796_v27 = vmul.f32 %v5434_v23, %v5990_v28  ;;  %v820_v20 = vadd.f32 %v4638_v10, %v807_v31 }
 0x348   : > { %4979 = vmatprep.mubr.msk.bf16.mxu1 %vm503_vm0, %v827_v24  ;;  %v819_v9 = vadd.f32 %v4638_v10, %v806_v25  ;;  %v795_v29 = vmul.f32 %v5436_v26, %v5994_v30 }
 0x349   : > { %v809_v34 = vmul.f32 %v4637_v5, %v796_v27 }
 0x34a   : > { %v828_v32 = vpack.c.bf16 %v819_v9, %v818_v11  ;;  %v808_v33 = vmul.f32 %v4637_v5, %v795_v29 }
 0x34b   : > { %v822_v37 = vadd.f32 %v4638_v10, %v809_v34 }
 0x34c   : > { %4980 = vmatmul.mubr.msk.bf16.vlgmr.msra.gmra.mxu1 %vm503_vm0, %v828_v32  ;;  %v821_v18 = vadd.f32 %v4638_v10, %v808_v33 }
 0x34d   : > { %v830_v38 = vpack.c.bf16 %v822_v37, %v822_v37 }
 0x34e   : > { %v829_v36 = vpack.c.bf16 %v821_v18, %v820_v20 }
 0x350   : > { %4983 = vmatprep.mubr.msk.bf16.mxu1 %vm503_vm0, %v829_v36 }
 0x354   : > { %4984 = vmatmul.mubr.msk.bf16.gmra.mxu1 %vm503_vm0, %v830_v38 }
 0x40c   : > { %v4981_v28 = vpop.f32.mrf.mxu1 }
 0x40e   : > { %v889_v39 = vpop.f32.mrf.mxu1 }
 0x410   : > { %v4982_v40 = vpop.f32.mrf.mxu1 }
 0x411   : > { %v6042_v53 = vpack.c.bf16 %v4982_v40, %v4981_v28 }
 0x412   : > { %v892_v42 = vpop.f32.mrf.mxu1 }
 0x413   : > { %v6026_v30 = vpack.c.bf16 %v892_v42, %v889_v39  ;;  %v928_v47 = vsel %vm923_vm1, %v6042_v53, 0 }
 0x414   : > { %v4985_v43 = vpop.f32.mrf.mxu1 }
 0x415   : > { %v6028_v45 = vpack.c.bf16 %v4985_v43, %v4985_v43  ;;  %4995 = vmatprep.mubr.msk.bf16.mxu0 %vm923_vm1, %v6026_v30  ;;  %v925_v57 = vsel %vm923_vm1, %v6026_v30, 0 }
 0x416   : > { %v905_v49 = vpop.f32.mrf.mxu1 }
 0x417   : > { %5327 = vmatprep.subr.msk.bf16.mxu0 %vm923_vm1, %v6028_v45  ;;  %5331 = vmatprep.subr.msk.bf16.mxu1 %vm1108_vm2, %v6028_v45  ;;  %v934_v41 = vsel %vm923_vm1, %v6028_v45, 0  ;;  %v1109_v48 = vsel %vm1108_vm2, %v6028_v45, 0 }
 0x418   : > { %v4986_v50 = vpop.f32.mrf.mxu1  ;;  %4988 = vmatpush3.bf16.xpose.msra.mxu0 %v934_v41  ;;  %5004 = vmatpush3.bf16.msra.mxu1 %v1109_v48 }
 0x41a   : > { %v908_v51 = vpop.f32.mrf.mxu1 }
 0x41b   : > { %v6040_v52 = vpack.c.bf16 %v908_v51, %v905_v49 }
 0x41d   : > { %5328 = vmatprep.subr.msk.bf16.mxu0 %vm923_vm1, %v6040_v52  ;;  %5005 = vmatprep.subr.bf16.mxu1 %v6040_v52  ;;  %v931_v54 = vsel %vm923_vm1, %v6040_v52, 0 }
 0x41e   : > { %5006 = vmatpush3.bf16.msra.mxu1 %v6040_v52 }
 0x41f   : > { %5007 = vmatprep.subr.bf16.mxu1 %v6042_v53 }
 0x420   : > { %4990 = vmatpush3.bf16.xpose.msra.mxu0 %v931_v54 }
 0x421   : > { %5329 = vmatprep.subr.msk.bf16.mxu0 %vm923_vm1, %v6042_v53 }
 0x422   : > { %5008 = vmatpush3.bf16.msra.mxu1 %v6042_v53 }
 0x423   : > { %5009 = vmatprep.subr.bf16.mxu1 %v6026_v30 }
 0x426   : > { %5010 = vmatpush3.bf16.msra.mxu1 %v6026_v30 }
 0x428   : > { %4992 = vmatpush3.bf16.xpose.msra.mxu0 %v928_v47 }
 0x429   : > { %5330 = vmatprep.subr.msk.bf16.mxu0 %vm923_vm1, %v6026_v30 }
 0x430   : > { %4994 = vmatpush3.bf16.xpose.msra.mxu0 %v925_v57 }
 0x437   : > { %4996 = vmatmul.mubr.msk.bf16.vlgmr.msra.gmra.mxu0 %vm923_vm1, %v6042_v53 }
 0x438   : > { %4999 = vmatprep.mubr.msk.bf16.mxu0 %vm923_vm1, %v6040_v52 }
 0x43f   : > { %5000 = vmatmul.mubr.msk.bf16.gmra.mxu0 %vm923_vm1, %v6028_v45 }
 0x4f7   : > { %v4997_v60 = vpop.f32.mrf.mxu0 }
 0x4f8   : > { %v1002_v0 = vmul.f32 0.5, %v4997_v60 }
 0x4f9   : > { %v970_v63 = vpop.f32.mrf.mxu0 }
 0x4fa   : > { %v1000_v1 = vmul.f32 0.5, %v970_v63  ;;  %v1009_v8 = vadd.f32 %v1002_v0, %v6068_v4 }
 0x4fb   : > { %v4998_v5 = vpop.f32.mrf.mxu0 }
 0x4fc   : > { %v1007_v6 = vadd.f32 %v1000_v1, %v6068_v4  ;;  %v1003_v10 = vmul.f32 0.5, %v4998_v5  ;;  %v1021_v17 = vsel %vm1014_vm4, %v1009_v8, -inf }
 0x4fd   : > { %v973_v7 = vpop.f32.mrf.mxu0 }
 0x4fe   : > { %v1001_v12 = vmul.f32 0.5, %v973_v7  ;;  %v1015_v13 = vsel %vm1014_vm4, %v1007_v6, -inf  ;;  %v1010_v22 = vadd.f32 %v1003_v10, %v6068_v4 }
 0x4ff   : > { %1016 = vmax.xlane.f32.xlu0 %v1015_v13  ;;  %v5001_v14 = vpop.f32.mrf.mxu0 }
 0x500   : > { %v1008_v15 = vadd.f32 %v1001_v12, %v6068_v4  ;;  %v1006_v3 = vmul.f32 0.5, %v5001_v14  ;;  %v1024_v27 = vsel %vm1014_vm4, %v1010_v22, -inf }
 0x501   : > { %v986_v16 = vpop.f32.mrf.mxu0 }
 0x502   : > { %v1004_v19 = vmul.f32 0.5, %v986_v16  ;;  %v1018_v21 = vsel %vm1014_vm4, %v1008_v15, -inf  ;;  %v1013_v9 = vadd.f32 %v1006_v3, %v6068_v4 }
 0x503   : > { %1022 = vmax.xlane.f32.xlu0 %v1021_v17  ;;  %1019 = vmax.xlane.f32.xlu1 %v1018_v21  ;;  %v5002_v23 = vpop.f32.mrf.mxu0 }
 0x504   : > { %v1011_v24 = vadd.f32 %v1004_v19, %v6068_v4  ;;  %v1033_v31 = vsel %vm1014_vm4, %v1013_v9, -inf }
 0x505   : > { %v989_v25 = vpop.f32.mrf.mxu0 }
 0x506   : > { %v1005_v26 = vmul.f32 0.5, %v989_v25  ;;  %v1027_v11 = vsel %vm1014_vm4, %v1011_v24, -inf }
 0x507   : > { %1025 = vmax.xlane.f32.xlu1 %v1024_v27  ;;  %1028 = vmax.xlane.f32.xlu0 %v1027_v11 }
 0x508   : > { %v1012_v29 = vadd.f32 %v1005_v26, %v6068_v4 }
 0x50a   : > { %v1030_v32 = vsel %vm1014_vm4, %v1012_v29, -inf }
 0x50b   : > { %1034 = vmax.xlane.f32.xlu0 %v1033_v31  ;;  %1031 = vmax.xlane.f32.xlu1 %v1030_v32 }
 0x588   : > { %v1017_v33 = vpop.xlane.xlu0 %1016 }
 0x589   : > { %v1036_v34 = vsub.f32 %v1007_v6, %v1017_v33 }
 0x58b   : > { %v1043_v37 = vmul.f32 1.442695, %v1036_v34 }
 0x58c   : > { %v1023_v20 = vpop.xlane.xlu0 %1022  ;;  %v1020_v18 = vpop.xlane.xlu1 %1019 }
 0x58d   : > { %v1038_v36 = vsub.f32 %v1009_v8, %v1023_v20  ;;  %v1037_v28 = vsub.f32 %v1008_v15, %v1020_v18 }
 0x58f   : > { %v1047_v38 = vmul.f32 1.442695, %v1038_v36  ;;  %v1045_v49 = vmul.f32 1.442695, %v1037_v28 }
 0x590   : > { %v1026_v39 = vpop.xlane.xlu1 %1025  ;;  %v1029_v40 = vpop.xlane.xlu0 %1028 }
 0x591   : > { %5437 = vpow2.f32 %v1047_v38  ;;  %v1039_v42 = vsub.f32 %v1010_v22, %v1026_v39  ;;  %v1040_v43 = vsub.f32 %v1011_v24, %v1029_v40 }
 0x592   : > { %5439 = vpow2.f32 %v1043_v37 }
 0x593   : > { %v1049_v41 = vmul.f32 1.442695, %v1039_v42  ;;  %v1051_v47 = vmul.f32 1.442695, %v1040_v43 }
 0x594   : > { %v1035_v48 = vpop.xlane.xlu0 %1034  ;;  %v1032_v50 = vpop.xlane.xlu1 %1031 }
 0x595   : > { %5441 = vpow2.f32 %v1049_v41  ;;  %v1042_v51 = vsub.f32 %v1013_v9, %v1035_v48  ;;  %v1041_v54 = vsub.f32 %v1012_v29, %v1032_v50 }
 0x596   : > { %5443 = vpow2.f32 %v1045_v49 }
 0x597   : > { %v1055_v57 = vmul.f32 1.442695, %v1042_v51  ;;  %v1053_v58 = vmul.f32 1.442695, %v1041_v54 }
 0x599   : > { %5445 = vpow2.f32 %v1055_v57 }
 0x59a   : > { %5447 = vpow2.f32 %v1051_v47 }
 0x59b   : > { %5449 = vpow2.f32 %v1053_v58 }
 0x59e   : > { %v5438_v59 = vpop.eup %5437 }
 0x59f   : > { %v1063_v60 = vsel %vm1014_vm4, %v5438_v59, 0.0  ;;  %v5440_v0 = vpop.eup %5439 }
 0x5a0   : > { %1064 = vadd.xlane.f32.xlu1 %v1063_v60  ;;  %v1057_v2 = vsel %vm1014_vm4, %v5440_v0, 0.0 }
 0x5a2   : > { %v5442_v63 = vpop.eup %5441 }
 0x5a3   : > { %v1066_v1 = vsel %vm1014_vm4, %v5442_v63, 0.0  ;;  %v5444_v5 = vpop.eup %5443 }
 0x5a4   : > { %1067 = vadd.xlane.f32.xlu0 %v1066_v1  ;;  %1058 = vadd.xlane.f32.xlu1 %v1057_v2  ;;  %v1060_v8 = vsel %vm1014_vm4, %v5444_v5, 0.0 }
 0x5a6   : > { %v6087_v6 = vpop.eup %5445 }
 0x5a7   : > { %v5448_v7 = vpop.eup %5447  ;;  %v1075_v10 = vsel %vm1014_vm4, %v6087_v6, 0.0 }
 0x5a8   : > { %v5450_v12 = vpop.eup %5449  ;;  %1061 = vadd.xlane.f32.xlu0 %v1060_v8  ;;  %1076 = vadd.xlane.f32.xlu1 %v1075_v10  ;;  %v1069_v13 = vsel %vm1014_vm4, %v5448_v7, 0.0 }
 0x5a9   : > { %v1072_v14 = vsel %vm1014_vm4, %v5450_v12, 0.0 }
 0x5ac   : > { %1070 = vadd.xlane.f32.xlu1 %v1069_v13  ;;  %1073 = vadd.xlane.f32.xlu0 %v1072_v14 }
 0x5bd   : > { %1183 = vrot.lane.b32.xlu1 %v6040_v52, %s5768_s24 }
 0x5c1   : > { %1181 = vrot.lane.b32.xlu1 %v6042_v53, %s5768_s24 }
 0x5c2   : > { %1185 = vrot.lane.b32.xlu0 %v6028_v45, %s5768_s24 }
 0x5c5   : > { %1179 = vrot.lane.b32.xlu1 %v6026_v30, %s5768_s24 }
 0x629   : > { %v1065_v15 = vpop.xlane.xlu1 %1064 }
 0x62d   : > { %v1068_v16 = vpop.xlane.xlu0 %1067  ;;  %v1059_v17 = vpop.xlane.xlu1 %1058 }
 0x62e   : > { %5451 = vrcp.f32 %v1068_v16 }
 0x62f   : > { %5453 = vrcp.f32 %v1059_v17 }
 0x630   : > { %5455 = vrcp.f32 %v1065_v15 }
 0x631   : > { %v1062_v3 = vpop.xlane.xlu0 %1061  ;;  %v1077_v19 = vpop.xlane.xlu1 %1076 }
 0x632   : > { %5457 = vrcp.f32 %v1062_v3 }
 0x633   : > { %5459 = vrcp.f32 %v1077_v19 }
 0x635   : > { %v1074_v21 = vpop.xlane.xlu0 %1073  ;;  %v1071_v22 = vpop.xlane.xlu1 %1070 }
 0x636   : > { %5461 = vrcp.f32 %v1074_v21 }
 0x637   : > { %5463 = vrcp.f32 %v1071_v22 }
 0x639   : > { %v1186_v23 = vpop.permute.xlu0 %1185  ;;  %v1184_v24 = vpop.permute.xlu1 %1183 }
 0x63a   : > { %5332 = vmatprep.subr.msk.bf16.mxu1 %vm923_vm1, %v1186_v23  ;;  %5336 = vmatprep.subr.msk.bf16.mxu0 %vm1108_vm2, %v1186_v23  ;;  %v1373_v25 = vsel %vm1108_vm2, %v1186_v23, 0  ;;  %v1197_v40 = vsel %vm923_vm1, %v1186_v23, 0  ;;  %v1194_v48 = vsel %vm923_vm1, %v1184_v24, 0 }
 0x63b   : > { %5036 = vmatpush3.bf16.msra.mxu0 %v1373_v25  ;;  %v5452_v26 = vpop.eup %5451 }
 0x63c   : > { %5037 = vmatprep.subr.bf16.mxu0 %v1184_v24  ;;  %v5454_v27 = vpop.eup %5453  ;;  %v1088_v31 = vmul.f32 %v5452_v26, %v5442_v63 }
 0x63d   : > { %v1182_v11 = vpop.permute.xlu1 %1181  ;;  %v5456_v9 = vpop.eup %5455  ;;  %v1085_v32 = vmul.f32 %v5454_v27, %v5440_v0 }
 0x63e   : > { %v1087_v34 = vmul.f32 %v5456_v9, %v5438_v59  ;;  %v1191_v50 = vsel %vm923_vm1, %v1182_v11, 0 }
 0x63f   : > { %v5458_v29 = vpop.eup %5457  ;;  %5038 = vmatpush3.bf16.msra.mxu0 %v1184_v24 }
 0x640   : > { %5039 = vmatprep.subr.bf16.mxu0 %v1182_v11  ;;  %v1086_v33 = vmul.f32 %v5458_v29, %v5444_v5  ;;  %v5460_v20 = vpop.eup %5459  ;;  %v1093_v38 = vpack.c.bf16 %v1088_v31, %v1087_v34 }
 0x641   : > { %v1180_v37 = vpop.permute.xlu1 %1179  ;;  %v1091_v49 = vmul.f32 %v5460_v20, %v6087_v6 }
 0x642   : > { %v1092_v18 = vpack.c.bf16 %v1086_v33, %v1085_v32  ;;  %v1188_v51 = vsel %vm923_vm1, %v1180_v37, 0 }
 0x643   : > { %v5462_v36 = vpop.eup %5461  ;;  %5040 = vmatpush3.bf16.msra.mxu0 %v1182_v11  ;;  %v1095_v41 = vpack.c.bf16 %v1091_v49, %v1091_v49 }
 0x644   : > { %v5464_v28 = vpop.eup %5463  ;;  %5011 = vmatprep.mubr.msk.bf16.mxu1 %vm1014_vm4, %v1092_v18  ;;  %5041 = vmatprep.subr.bf16.mxu0 %v1180_v37  ;;  %v1090_v39 = vmul.f32 %v5462_v36, %v5450_v12 }
 0x645   : > { %5012 = vmatmul.mubr.msk.bf16.vlgmr.msra.gmra.mxu1 %vm1014_vm4, %v1093_v38  ;;  %v1089_v42 = vmul.f32 %v5464_v28, %v5448_v7 }
 0x646   : > { %5020 = vmatpush3.bf16.xpose.msra.mxu1 %v1197_v40 }
 0x647   : > { %5333 = vmatprep.subr.msk.bf16.mxu1 %vm923_vm1, %v1184_v24  ;;  %5042 = vmatpush3.bf16.msra.mxu0 %v1180_v37  ;;  %v1094_v43 = vpack.c.bf16 %v1090_v39, %v1089_v42 }
 0x649   : > { %5015 = vmatprep.mubr.msk.bf16.mxu1 %vm1014_vm4, %v1094_v43 }
 0x64d   : > { %5016 = vmatmul.mubr.msk.bf16.gmra.mxu1 %vm1014_vm4, %v1095_v41 }
 0x64e   : > { %5022 = vmatpush3.bf16.xpose.msra.mxu1 %v1194_v48  ;;  %5027 = vmatprep.mubr.msk.bf16.mxu1 %vm923_vm1, %v1180_v37 }
 0x64f   : > { %5334 = vmatprep.subr.msk.bf16.mxu1 %vm923_vm1, %v1182_v11 }
 0x656   : > { %5024 = vmatpush3.bf16.xpose.msra.mxu1 %v1191_v50 }
 0x657   : > { %5335 = vmatprep.subr.msk.bf16.mxu1 %vm923_vm1, %v1180_v37 }
 0x65e   : > { %5026 = vmatpush3.bf16.xpose.msra.mxu1 %v1188_v51 }
 0x665   : > { %5028 = vmatmul.mubr.msk.bf16.vlgmr.msra.gmra.mxu1 %vm923_vm1, %v1182_v11 }
 0x666   : > { %5031 = vmatprep.mubr.msk.bf16.mxu1 %vm923_vm1, %v1184_v24 }
 0x66d   : > { %5032 = vmatmul.mubr.msk.bf16.gmra.mxu1 %vm923_vm1, %v1186_v23 }
 0x705   : > { %v6121_v54 = vpop.f32.mrf.mxu1 }
 0x707   : > { %v6123_v47 = vpop.f32.mrf.mxu1 }
 0x709   : > { %v6125_v57 = vpop.f32.mrf.mxu1 }
 0x70b   : > { %v6127_v58 = vpop.f32.mrf.mxu1 }
 0x70d   : > { %v6129_v59 = vpop.f32.mrf.mxu1 }
 0x70f   : > { %v6131_v60 = vpop.f32.mrf.mxu1 }
 0x711   : > { %v5018_v0 = vpop.f32.mrf.mxu1 }
 0x713   : > { %v6133_v63 = vpop.f32.mrf.mxu1 }
 0x725   : > { %v5029_v1 = vpop.f32.mrf.mxu1 }
 0x726   : > { %v1265_v5 = vmul.f32 0.5, %v5029_v1 }
 0x727   : > { %v1233_v2 = vpop.f32.mrf.mxu1 }
 0x728   : > { %v1263_v6 = vmul.f32 0.5, %v1233_v2  ;;  %v1272_v15 = vadd.f32 %v1265_v5, %v6068_v4 }
 0x729   : > { %v5030_v7 = vpop.f32.mrf.mxu1 }
 0x72a   : > { %v1270_v8 = vadd.f32 %v1263_v6, %v6068_v4  ;;  %v1266_v12 = vmul.f32 0.5, %v5030_v7  ;;  %v1283_v21 = vsel %vm1014_vm4, %v1272_v15, -inf }
 0x72b   : > { %v1236_v10 = vpop.f32.mrf.mxu1 }
 0x72c   : > { %v1264_v13 = vmul.f32 0.5, %v1236_v10  ;;  %v1277_v14 = vsel %vm1014_vm4, %v1270_v8, -inf  ;;  %v1273_v23 = vadd.f32 %v1266_v12, %v6068_v4 }
 0x72d   : > { %1278 = vmax.xlane.f32.xlu0 %v1277_v14  ;;  %v5033_v16 = vpop.f32.mrf.mxu1 }
 0x72e   : > { %v1271_v17 = vadd.f32 %v1264_v13, %v6068_v4  ;;  %v1269_v26 = vmul.f32 0.5, %v5033_v16  ;;  %v1286_v11 = vsel %vm1014_vm4, %v1273_v23, -inf }
 0x72f   : > { %v1249_v3 = vpop.f32.mrf.mxu1 }
 0x730   : > { %v1267_v19 = vmul.f32 0.5, %v1249_v3  ;;  %v1280_v22 = vsel %vm1014_vm4, %v1271_v17, -inf  ;;  %v1276_v33 = vadd.f32 %v1269_v26, %v6068_v4 }
 0x731   : > { %1284 = vmax.xlane.f32.xlu0 %v1283_v21  ;;  %1281 = vmax.xlane.f32.xlu1 %v1280_v22  ;;  %v5034_v24 = vpop.f32.mrf.mxu1 }
 0x732   : > { %v1274_v9 = vadd.f32 %v1267_v19, %v6068_v4  ;;  %v1295_v34 = vsel %vm1014_vm4, %v1276_v33, -inf }
 0x733   : > { %v1252_v25 = vpop.f32.mrf.mxu1 }
 0x734   : > { %v1268_v27 = vmul.f32 0.5, %v1252_v25  ;;  %v1289_v31 = vsel %vm1014_vm4, %v1274_v9, -inf }
 0x735   : > { %1287 = vmax.xlane.f32.xlu0 %v1286_v11 }
 0x736   : > { %v1275_v29 = vadd.f32 %v1268_v27, %v6068_v4 }
 0x738   : > { %v1292_v32 = vsel %vm1014_vm4, %v1275_v29, -inf }
 0x739   : > { %1290 = vmax.xlane.f32.xlu0 %v1289_v31  ;;  %1293 = vmax.xlane.f32.xlu1 %v1292_v32 }
 0x73d   : > { %1296 = vmax.xlane.f32.xlu0 %v1295_v34 }
 0x7b6   : > { %v1279_v20 = vpop.xlane.xlu0 %1278 }
 0x7b7   : > { %v1298_v18 = vsub.f32 %v1270_v8, %v1279_v20 }
 0x7b9   : > { %v1305_v28 = vmul.f32 1.442695, %v1298_v18 }
 0x7ba   : > { %v1285_v36 = vpop.xlane.xlu0 %1284  ;;  %v1282_v37 = vpop.xlane.xlu1 %1281 }
 0x7bb   : > { %v1300_v38 = vsub.f32 %v1272_v15, %v1285_v36  ;;  %v1299_v40 = vsub.f32 %v1271_v17, %v1282_v37 }
 0x7bd   : > { %v1309_v39 = vmul.f32 1.442695, %v1300_v38  ;;  %v1307_v49 = vmul.f32 1.442695, %v1299_v40 }
 0x7be   : > { %v1288_v42 = vpop.xlane.xlu0 %1287 }
 0x7bf   : > { %5465 = vpow2.f32 %v1309_v39  ;;  %v1301_v43 = vsub.f32 %v1273_v23, %v1288_v42 }
 0x7c0   : > { %5467 = vpow2.f32 %v1305_v28 }
 0x7c1   : > { %v1311_v41 = vmul.f32 1.442695, %v1301_v43 }
 0x7c2   : > { %v1291_v48 = vpop.xlane.xlu0 %1290  ;;  %v1294_v50 = vpop.xlane.xlu1 %1293 }
 0x7c3   : > { %5469 = vpow2.f32 %v1311_v41  ;;  %v1303_v51 = vsub.f32 %v1275_v29, %v1294_v50  ;;  %v1302_v0 = vsub.f32 %v1274_v9, %v1291_v48 }
 0x7c4   : > { %5471 = vpow2.f32 %v1307_v49 }
 0x7c5   : > { %v1315_v1 = vmul.f32 1.442695, %v1303_v51  ;;  %v1313_v6 = vmul.f32 1.442695, %v1302_v0 }
 0x7c6   : > { %v1297_v2 = vpop.xlane.xlu0 %1296 }
 0x7c7   : > { %v1304_v5 = vsub.f32 %v1276_v33, %v1297_v2  ;;  %5473 = vpow2.f32 %v1315_v1 }
 0x7c9   : > { %v1317_v7 = vmul.f32 1.442695, %v1304_v5 }
 0x7cb   : > { %5475 = vpow2.f32 %v1317_v7 }
 0x7cc   : > { %v5466_v8 = vpop.eup %5465  ;;  %5477 = vpow2.f32 %v1313_v6 }
 0x7cd   : > { %v1325_v10 = vsel %vm1014_vm4, %v5466_v8, 0.0  ;;  %v5468_v12 = vpop.eup %5467 }
 0x7ce   : > { %1326 = vadd.xlane.f32.xlu1 %v1325_v10  ;;  %v1319_v15 = vsel %vm1014_vm4, %v5468_v12, 0.0 }
 0x7d0   : > { %v5470_v13 = vpop.eup %5469 }
 0x7d1   : > { %v1328_v14 = vsel %vm1014_vm4, %v5470_v13, 0.0  ;;  %v5472_v16 = vpop.eup %5471 }
 0x7d2   : > { %1329 = vadd.xlane.f32.xlu0 %v1328_v14  ;;  %1320 = vadd.xlane.f32.xlu1 %v1319_v15  ;;  %v1322_v17 = vsel %vm1014_vm4, %v5472_v16, 0.0 }
 0x7d4   : > { %v6153_v3 = vpop.eup %5473 }
 0x7d5   : > { %v1334_v22 = vsel %vm1014_vm4, %v6153_v3, 0.0 }
 0x7d6   : > { %1323 = vadd.xlane.f32.xlu0 %v1322_v17 }
 0x7d8   : > { %v5476_v19 = vpop.eup %5475 }
 0x7d9   : > { %v1337_v21 = vsel %vm1014_vm4, %v5476_v19, 0.0  ;;  %v5478_v23 = vpop.eup %5477 }
 0x7da   : > { %1338 = vadd.xlane.f32.xlu1 %v1337_v21  ;;  %1335 = vadd.xlane.f32.xlu0 %v1334_v22  ;;  %v1331_v24 = vsel %vm1014_vm4, %v5478_v23, 0.0 }
 0x7de   : > { %1332 = vadd.xlane.f32.xlu1 %v1331_v24 }
 0x7ef   : > { %1443 = vrot.lane.b32.xlu1 %v6040_v52, %s5769_s25 }
 0x7f0   : > { %1445 = vrot.lane.b32.xlu0 %v6028_v45, %s5769_s25 }
 0x7f3   : > { %1441 = vrot.lane.b32.xlu1 %v6042_v53, %s5769_s25 }
 0x7f7   : > { %1439 = vrot.lane.b32.xlu1 %v6026_v30, %s5769_s25 }
 0x857   : > { %v1327_v25 = vpop.xlane.xlu1 %1326 }
 0x85b   : > { %v1330_v26 = vpop.xlane.xlu0 %1329  ;;  %v1321_v27 = vpop.xlane.xlu1 %1320 }
 0x85c   : > { %5479 = vrcp.f32 %v1330_v26 }
 0x85d   : > { %5481 = vrcp.f32 %v1321_v27 }
 0x85e   : > { %5483 = vrcp.f32 %v1327_v25 }
 0x85f   : > { %v1324_v11 = vpop.xlane.xlu0 %1323 }
 0x860   : > { %5485 = vrcp.f32 %v1324_v11 }
 0x863   : > { %v1336_v9 = vpop.xlane.xlu0 %1335  ;;  %v1339_v29 = vpop.xlane.xlu1 %1338 }
 0x864   : > { %5487 = vrcp.f32 %v1339_v29 }
 0x865   : > { %5489 = vrcp.f32 %v1336_v9 }
 0x867   : > { %v1446_v31 = vpop.permute.xlu0 %1445  ;;  %v1333_v32 = vpop.xlane.xlu1 %1332 }
 0x868   : > { %5491 = vrcp.f32 %v1333_v32  ;;  %5337 = vmatprep.subr.msk.bf16.mxu0 %vm923_vm1, %v1446_v31  ;;  %5341 = vmatprep.subr.msk.bf16.mxu1 %vm1108_vm2, %v1446_v31  ;;  %v1633_v33 = vsel %vm1108_vm2, %v1446_v31, 0  ;;  %v1457_v50 = vsel %vm923_vm1, %v1446_v31, 0 }
 0x869   : > { %5068 = vmatpush3.bf16.msra.mxu1 %v1633_v33  ;;  %v5480_v34 = vpop.eup %5479 }
 0x86a   : > { %v5482_v20 = vpop.eup %5481  ;;  %v1350_v38 = vmul.f32 %v5480_v34, %v5470_v13 }
 0x86b   : > { %v1444_v18 = vpop.permute.xlu1 %1443  ;;  %v5484_v36 = vpop.eup %5483  ;;  %v1347_v28 = vmul.f32 %v5482_v20, %v5468_v12 }
 0x86c   : > { %5069 = vmatprep.subr.bf16.mxu1 %v1444_v18  ;;  %v1349_v40 = vmul.f32 %v5484_v36, %v5466_v8  ;;  %v1454_v8 = vsel %vm923_vm1, %v1444_v18, 0 }
 0x86d   : > { %v5486_v37 = vpop.eup %5485  ;;  %5070 = vmatpush3.bf16.msra.mxu1 %v1444_v18 }
 0x86e   : > { %v1348_v39 = vmul.f32 %v5486_v37, %v5472_v16  ;;  %v1355_v49 = vpack.c.bf16 %v1350_v38, %v1349_v40 }
 0x86f   : > { %v1442_v42 = vpop.permute.xlu1 %1441 }
 0x870   : > { %5071 = vmatprep.subr.bf16.mxu1 %v1442_v42  ;;  %v1354_v43 = vpack.c.bf16 %v1348_v39, %v1347_v28  ;;  %v1451_v10 = vsel %vm923_vm1, %v1442_v42, 0 }
 0x871   : > { %5072 = vmatpush3.bf16.msra.mxu1 %v1442_v42  ;;  %v5488_v41 = vpop.eup %5487 }
 0x872   : > { %5043 = vmatprep.mubr.msk.bf16.mxu0 %vm1014_vm4, %v1354_v43  ;;  %v5490_v48 = vpop.eup %5489  ;;  %v1353_v1 = vmul.f32 %v5488_v41, %v5476_v19 }
 0x873   : > { %5044 = vmatmul.mubr.msk.bf16.vlgmr.msra.gmra.mxu0 %vm1014_vm4, %v1355_v49  ;;  %v1440_v51 = vpop.permute.xlu1 %1439  ;;  %v1352_v5 = vmul.f32 %v5490_v48, %v6153_v3 }
 0x874   : > { %5052 = vmatpush3.bf16.xpose.msra.mxu0 %v1457_v50  ;;  %5073 = vmatprep.subr.bf16.mxu1 %v1440_v51  ;;  %v1357_v7 = vpack.c.bf16 %v1353_v1, %v1353_v1  ;;  %v1448_v12 = vsel %vm923_vm1, %v1440_v51, 0 }
 0x875   : > { %v5492_v0 = vpop.eup %5491  ;;  %5338 = vmatprep.subr.msk.bf16.mxu0 %vm923_vm1, %v1444_v18  ;;  %5074 = vmatpush3.bf16.msra.mxu1 %v1440_v51 }
 0x876   : > { %v1351_v2 = vmul.f32 %v5492_v0, %v5478_v23 }
 0x878   : > { %v1356_v6 = vpack.c.bf16 %v1352_v5, %v1351_v2 }
 0x87a   : > { %5047 = vmatprep.mubr.msk.bf16.mxu0 %vm1014_vm4, %v1356_v6 }
 0x87b   : > { %5048 = vmatmul.mubr.msk.bf16.gmra.mxu0 %vm1014_vm4, %v1357_v7 }
 0x87c   : > { %5054 = vmatpush3.bf16.xpose.msra.mxu0 %v1454_v8  ;;  %5059 = vmatprep.mubr.msk.bf16.mxu0 %vm923_vm1, %v1440_v51 }
 0x87d   : > { %5339 = vmatprep.subr.msk.bf16.mxu0 %vm923_vm1, %v1442_v42 }
 0x884   : > { %5056 = vmatpush3.bf16.xpose.msra.mxu0 %v1451_v10 }
 0x885   : > { %5340 = vmatprep.subr.msk.bf16.mxu0 %vm923_vm1, %v1440_v51 }
 0x88c   : > { %5058 = vmatpush3.bf16.xpose.msra.mxu0 %v1448_v12 }
 0x893   : > { %5060 = vmatmul.mubr.msk.bf16.vlgmr.msra.gmra.mxu0 %vm923_vm1, %v1442_v42 }
 0x894   : > { %5063 = vmatprep.mubr.msk.bf16.mxu0 %vm923_vm1, %v1444_v18 }
 0x89b   : > { %5064 = vmatmul.mubr.msk.bf16.gmra.mxu0 %vm923_vm1, %v1446_v31 }
 0x933   : > { %v6186_v13 = vpop.f32.mrf.mxu0 }
 0x935   : > { %v6188_v14 = vpop.f32.mrf.mxu0 }
 0x937   : > { %v6190_v15 = vpop.f32.mrf.mxu0 }
 0x939   : > { %v6192_v16 = vpop.f32.mrf.mxu0 }
 0x93b   : > { %v6194_v17 = vpop.f32.mrf.mxu0 }
 0x93d   : > { %v6196_v3 = vpop.f32.mrf.mxu0 }
 0x93f   : > { %v5050_v19 = vpop.f32.mrf.mxu0 }
 0x941   : > { %v6198_v21 = vpop.f32.mrf.mxu0 }
 0x953   : > { %v5061_v22 = vpop.f32.mrf.mxu0 }
 0x954   : > { %v1525_v24 = vmul.f32 0.5, %v5061_v22 }
 0x955   : > { %v1493_v23 = vpop.f32.mrf.mxu0 }
 0x956   : > { %v1523_v25 = vmul.f32 0.5, %v1493_v23  ;;  %v1532_v32 = vadd.f32 %v1525_v24, %v6068_v4 }
 0x957   : > { %v5062_v26 = vpop.f32.mrf.mxu0 }
 0x958   : > { %v1530_v27 = vadd.f32 %v1523_v25, %v6068_v4  ;;  %v1526_v9 = vmul.f32 0.5, %v5062_v26  ;;  %v1543_v36 = vsel %vm1014_vm4, %v1532_v32, -inf }
 0x959   : > { %v1496_v11 = vpop.f32.mrf.mxu0 }
 0x95a   : > { %v1524_v29 = vmul.f32 0.5, %v1496_v11  ;;  %v1537_v31 = vsel %vm1014_vm4, %v1530_v27, -inf  ;;  %v1533_v38 = vadd.f32 %v1526_v9, %v6068_v4 }
 0x95b   : > { %1538 = vmax.xlane.f32.xlu0 %v1537_v31  ;;  %v5065_v33 = vpop.f32.mrf.mxu0 }
 0x95c   : > { %v1531_v34 = vadd.f32 %v1524_v29, %v6068_v4  ;;  %v1529_v40 = vmul.f32 0.5, %v5065_v33  ;;  %v1546_v43 = vsel %vm1014_vm4, %v1533_v38, -inf }
 0x95d   : > { %v1509_v20 = vpop.f32.mrf.mxu0 }
 0x95e   : > { %v1527_v18 = vmul.f32 0.5, %v1509_v20  ;;  %v1540_v37 = vsel %vm1014_vm4, %v1531_v34, -inf  ;;  %v1536_v51 = vadd.f32 %v1529_v40, %v6068_v4 }
 0x95f   : > { %1544 = vmax.xlane.f32.xlu0 %v1543_v36  ;;  %1541 = vmax.xlane.f32.xlu1 %v1540_v37  ;;  %v5066_v28 = vpop.f32.mrf.mxu0 }
 0x960   : > { %v1534_v49 = vadd.f32 %v1527_v18, %v6068_v4  ;;  %v1555_v0 = vsel %vm1014_vm4, %v1536_v51, -inf }
 0x961   : > { %v1512_v39 = vpop.f32.mrf.mxu0 }
 0x962   : > { %v1528_v42 = vmul.f32 0.5, %v1512_v39  ;;  %v1549_v48 = vsel %vm1014_vm4, %v1534_v49, -inf }
 0x963   : > { %1547 = vmax.xlane.f32.xlu0 %v1546_v43 }
 0x964   : > { %v1535_v41 = vadd.f32 %v1528_v42, %v6068_v4 }
 0x966   : > { %v1552_v50 = vsel %vm1014_vm4, %v1535_v41, -inf }
 0x967   : > { %1550 = vmax.xlane.f32.xlu0 %v1549_v48  ;;  %1553 = vmax.xlane.f32.xlu1 %v1552_v50 }
 0x96b   : > { %1556 = vmax.xlane.f32.xlu0 %v1555_v0 }
 0x9e4   : > { %v1539_v1 = vpop.xlane.xlu0 %1538 }
 0x9e5   : > { %v1558_v2 = vsub.f32 %v1530_v27, %v1539_v1 }
 0x9e7   : > { %v1565_v8 = vmul.f32 1.442695, %v1558_v2 }
 0x9e8   : > { %v1545_v5 = vpop.xlane.xlu0 %1544  ;;  %v1542_v6 = vpop.xlane.xlu1 %1541 }
 0x9e9   : > { %v1560_v7 = vsub.f32 %v1532_v32, %v1545_v5  ;;  %v1559_v12 = vsub.f32 %v1531_v34, %v1542_v6 }
 0x9eb   : > { %v1569_v10 = vmul.f32 1.442695, %v1560_v7  ;;  %v1567_v23 = vmul.f32 1.442695, %v1559_v12 }
 0x9ec   : > { %v1548_v19 = vpop.xlane.xlu0 %1547 }
 0x9ed   : > { %5493 = vpow2.f32 %v1569_v10  ;;  %v1561_v22 = vsub.f32 %v1533_v38, %v1548_v19 }
 0x9ee   : > { %5495 = vpow2.f32 %v1565_v8 }
 0x9ef   : > { %v1571_v24 = vmul.f32 1.442695, %v1561_v22 }
 0x9f0   : > { %v1551_v25 = vpop.xlane.xlu0 %1550  ;;  %v1554_v26 = vpop.xlane.xlu1 %1553 }
 0x9f1   : > { %5497 = vpow2.f32 %v1571_v24  ;;  %v1563_v11 = vsub.f32 %v1535_v41, %v1554_v26  ;;  %v1562_v9 = vsub.f32 %v1534_v49, %v1551_v25 }
 0x9f2   : > { %5499 = vpow2.f32 %v1567_v23 }
 0x9f3   : > { %v1575_v29 = vmul.f32 1.442695, %v1563_v11  ;;  %v1573_v33 = vmul.f32 1.442695, %v1562_v9 }
 0x9f4   : > { %v1557_v27 = vpop.xlane.xlu0 %1556 }
 0x9f5   : > { %v1564_v31 = vsub.f32 %v1536_v51, %v1557_v27  ;;  %5501 = vpow2.f32 %v1575_v29 }
 0x9f7   : > { %v1577_v32 = vmul.f32 1.442695, %v1564_v31 }
 0x9f9   : > { %5503 = vpow2.f32 %v1577_v32 }
 0x9fa   : > { %v5494_v34 = vpop.eup %5493  ;;  %5505 = vpow2.f32 %v1573_v33 }
 0x9fb   : > { %v1585_v20 = vsel %vm1014_vm4, %v5494_v34, 0.0  ;;  %v5496_v18 = vpop.eup %5495 }
 0x9fc   : > { %1586 = vadd.xlane.f32.xlu1 %v1585_v20  ;;  %v1579_v38 = vsel %vm1014_vm4, %v5496_v18, 0.0 }
 0x9fe   : > { %v5498_v36 = vpop.eup %5497 }
 0x9ff   : > { %v1588_v37 = vsel %vm1014_vm4, %v5498_v36, 0.0  ;;  %v5500_v28 = vpop.eup %5499 }
 0xa00   : > { %1589 = vadd.xlane.f32.xlu0 %v1588_v37  ;;  %1580 = vadd.xlane.f32.xlu1 %v1579_v38  ;;  %v1582_v39 = vsel %vm1014_vm4, %v5500_v28, 0.0 }
 0xa02   : > { %v6218_v40 = vpop.eup %5501 }
 0xa03   : > { %v1594_v49 = vsel %vm1014_vm4, %v6218_v40, 0.0 }
 0xa04   : > { %1583 = vadd.xlane.f32.xlu0 %v1582_v39 }
 0xa06   : > { %v5504_v42 = vpop.eup %5503 }
 0xa07   : > { %v1597_v43 = vsel %vm1014_vm4, %v5504_v42, 0.0  ;;  %v5506_v41 = vpop.eup %5505 }
 0xa08   : > { %1598 = vadd.xlane.f32.xlu1 %v1597_v43  ;;  %1595 = vadd.xlane.f32.xlu0 %v1594_v49  ;;  %v1591_v48 = vsel %vm1014_vm4, %v5506_v41, 0.0 }
 0xa0c   : > { %1592 = vadd.xlane.f32.xlu1 %v1591_v48 }
 0xa1d   : > { %1703 = vrot.lane.b32.xlu1 %v6040_v52, %s5770_s26 }
 0xa1e   : > { %1705 = vrot.lane.b32.xlu0 %v6028_v45, %s5770_s26 }
 0xa21   : > { %1701 = vrot.lane.b32.xlu1 %v6042_v53, %s5770_s26 }
 0xa25   : > { %1699 = vrot.lane.b32.xlu1 %v6026_v30, %s5770_s26 }
 0xa85   : > { %v1587_v50 = vpop.xlane.xlu1 %1586 }
 0xa89   : > { %v1590_v51 = vpop.xlane.xlu0 %1589  ;;  %v1581_v0 = vpop.xlane.xlu1 %1580 }
 0xa8a   : > { %5507 = vrcp.f32 %v1590_v51 }
 0xa8b   : > { %5509 = vrcp.f32 %v1581_v0 }
 0xa8c   : > { %5511 = vrcp.f32 %v1587_v50 }
 0xa8d   : > { %v1584_v1 = vpop.xlane.xlu0 %1583 }
 0xa8e   : > { %5513 = vrcp.f32 %v1584_v1 }
 0xa91   : > { %v1596_v2 = vpop.xlane.xlu0 %1595  ;;  %v1599_v5 = vpop.xlane.xlu1 %1598 }
 0xa92   : > { %5515 = vrcp.f32 %v1599_v5 }
 0xa93   : > { %5517 = vrcp.f32 %v1596_v2 }
 0xa95   : > { %v1706_v52 = vpop.permute.xlu0 %1705  ;;  %v1593_v45 = vpop.xlane.xlu1 %1592 }
 0xa96   : > { %5519 = vrcp.f32 %v1593_v45  ;;  %5342 = vmatprep.subr.msk.bf16.mxu1 %vm923_vm1, %v1706_v52  ;;  %5346 = vmatprep.subr.msk.bf16.mxu0 %vm1108_vm2, %v1706_v52  ;;  %v1893_v30 = vsel %vm1108_vm2, %v1706_v52, 0  ;;  %v1717_v29 = vsel %vm923_vm1, %v1706_v52, 0 }
 0xa97   : > { %5100 = vmatpush3.bf16.msra.mxu0 %v1893_v30  ;;  %v5508_v53 = vpop.eup %5507 }
 0xa98   : > { %v5510_v6 = vpop.eup %5509  ;;  %v1610_v12 = vmul.f32 %v5508_v53, %v5498_v36 }
 0xa99   : > { %v1704_v7 = vpop.permute.xlu1 %1703  ;;  %v5512_v8 = vpop.eup %5511  ;;  %v1607_v19 = vmul.f32 %v5510_v6, %v5496_v18 }
 0xa9a   : > { %5101 = vmatprep.subr.bf16.mxu0 %v1704_v7  ;;  %v1609_v23 = vmul.f32 %v5512_v8, %v5494_v34  ;;  %v1714_v36 = vsel %vm923_vm1, %v1704_v7, 0 }
 0xa9b   : > { %v5514_v10 = vpop.eup %5513  ;;  %5102 = vmatpush3.bf16.msra.mxu0 %v1704_v7 }
 0xa9c   : > { %v1608_v22 = vmul.f32 %v5514_v10, %v5500_v28  ;;  %v1615_v26 = vpack.c.bf16 %v1610_v12, %v1609_v23 }
 0xa9d   : > { %v1702_v24 = vpop.permute.xlu1 %1701 }
 0xa9e   : > { %5103 = vmatprep.subr.bf16.mxu0 %v1702_v24  ;;  %v1614_v25 = vpack.c.bf16 %v1608_v22, %v1607_v19  ;;  %v1711_v37 = vsel %vm923_vm1, %v1702_v24, 0 }
 0xa9f   : > { %5104 = vmatpush3.bf16.msra.mxu0 %v1702_v24  ;;  %v5516_v11 = vpop.eup %5515 }
 0xaa0   : > { %5075 = vmatprep.mubr.msk.bf16.mxu1 %vm1014_vm4, %v1614_v25  ;;  %v5518_v9 = vpop.eup %5517  ;;  %v1613_v33 = vmul.f32 %v5516_v11, %v5504_v42 }
 0xaa1   : > { %5076 = vmatmul.mubr.msk.bf16.vlgmr.msra.gmra.mxu1 %vm1014_vm4, %v1615_v26  ;;  %v1700_v27 = vpop.permute.xlu1 %1699  ;;  %v1612_v34 = vmul.f32 %v5518_v9, %v6218_v40 }
 0xaa2   : > { %5084 = vmatpush3.bf16.xpose.msra.mxu1 %v1717_v29  ;;  %5105 = vmatprep.subr.bf16.mxu0 %v1700_v27  ;;  %v1617_v18 = vpack.c.bf16 %v1613_v33, %v1613_v33  ;;  %v1708_v38 = vsel %vm923_vm1, %v1700_v27, 0 }
 0xaa3   : > { %v5520_v31 = vpop.eup %5519  ;;  %5343 = vmatprep.subr.msk.bf16.mxu1 %vm923_vm1, %v1704_v7  ;;  %5106 = vmatpush3.bf16.msra.mxu0 %v1700_v27 }
 0xaa4   : > { %v1611_v32 = vmul.f32 %v5520_v31, %v5506_v41 }
 0xaa6   : > { %v1616_v20 = vpack.c.bf16 %v1612_v34, %v1611_v32 }
 0xaa8   : > { %5079 = vmatprep.mubr.msk.bf16.mxu1 %vm1014_vm4, %v1616_v20 }
 0xaa9   : > { %5080 = vmatmul.mubr.msk.bf16.gmra.mxu1 %vm1014_vm4, %v1617_v18 }
 0xaaa   : > { %5086 = vmatpush3.bf16.xpose.msra.mxu1 %v1714_v36  ;;  %5091 = vmatprep.mubr.msk.bf16.mxu1 %vm923_vm1, %v1700_v27 }
 0xaab   : > { %5344 = vmatprep.subr.msk.bf16.mxu1 %vm923_vm1, %v1702_v24 }
 0xab2   : > { %5088 = vmatpush3.bf16.xpose.msra.mxu1 %v1711_v37 }
 0xab3   : > { %5345 = vmatprep.subr.msk.bf16.mxu1 %vm923_vm1, %v1700_v27 }
 0xaba   : > { %5090 = vmatpush3.bf16.xpose.msra.mxu1 %v1708_v38 }
 0xac1   : > { %5092 = vmatmul.mubr.msk.bf16.vlgmr.msra.gmra.mxu1 %vm923_vm1, %v1702_v24 }
 0xac2   : > { %5095 = vmatprep.mubr.msk.bf16.mxu1 %vm923_vm1, %v1704_v7 }
 0xac9   : > { %5096 = vmatmul.mubr.msk.bf16.gmra.mxu1 %vm923_vm1, %v1706_v52 }
 0xb61   : > { %v6251_v28 = vpop.f32.mrf.mxu1 }
 0xb63   : > { %v6253_v39 = vpop.f32.mrf.mxu1 }
 0xb65   : > { %v6255_v40 = vpop.f32.mrf.mxu1 }
 0xb67   : > { %v6257_v42 = vpop.f32.mrf.mxu1 }
 0xb69   : > { %v6259_v43 = vpop.f32.mrf.mxu1 }
 0xb6b   : > { %v6261_v49 = vpop.f32.mrf.mxu1 }
 0xb6d   : > { %v5082_v41 = vpop.f32.mrf.mxu1 }
 0xb6f   : > { %v6263_v48 = vpop.f32.mrf.mxu1 }
 0xb81   : > { %v5093_v50 = vpop.f32.mrf.mxu1 }
 0xb82   : > { %v1785_v0 = vmul.f32 0.5, %v5093_v50 }
 0xb83   : > { %v1753_v51 = vpop.f32.mrf.mxu1 }
 0xb84   : > { %v1783_v1 = vmul.f32 0.5, %v1753_v51  ;;  %v1792_v6 = vadd.f32 %v1785_v0, %v6068_v4 }
 0xb85   : > { %v5094_v2 = vpop.f32.mrf.mxu1 }
 0xb86   : > { %v1790_v5 = vadd.f32 %v1783_v1, %v6068_v4  ;;  %v1786_v45 = vmul.f32 0.5, %v5094_v2  ;;  %v1803_v19 = vsel %vm1014_vm4, %v1792_v6, -inf }
 0xb87   : > { %v1756_v52 = vpop.f32.mrf.mxu1 }
 0xb88   : > { %v1784_v30 = vmul.f32 0.5, %v1756_v52  ;;  %v1797_v53 = vsel %vm1014_vm4, %v1790_v5, -inf  ;;  %v1793_v23 = vadd.f32 %v1786_v45, %v6068_v4 }
 0xb89   : > { %1798 = vmax.xlane.f32.xlu0 %v1797_v53  ;;  %v5097_v7 = vpop.f32.mrf.mxu1 }
 0xb8a   : > { %v1791_v8 = vadd.f32 %v1784_v30, %v6068_v4  ;;  %v1789_v26 = vmul.f32 0.5, %v5097_v7  ;;  %v1806_v9 = vsel %vm1014_vm4, %v1793_v23, -inf }
 0xb8b   : > { %v1769_v10 = vpop.f32.mrf.mxu1 }
 0xb8c   : > { %v1787_v12 = vmul.f32 0.5, %v1769_v10  ;;  %v1800_v22 = vsel %vm1014_vm4, %v1791_v8, -inf  ;;  %v1796_v32 = vadd.f32 %v1789_v26, %v6068_v4 }
 0xb8d   : > { %1804 = vmax.xlane.f32.xlu0 %v1803_v19  ;;  %1801 = vmax.xlane.f32.xlu1 %v1800_v22  ;;  %v5098_v24 = vpop.f32.mrf.mxu1 }
 0xb8e   : > { %v1794_v29 = vadd.f32 %v1787_v12, %v6068_v4  ;;  %v1815_v34 = vsel %vm1014_vm4, %v1796_v32, -inf }
 0xb8f   : > { %v1772_v25 = vpop.f32.mrf.mxu1 }
 0xb90   : > { %v1788_v11 = vmul.f32 0.5, %v1772_v25  ;;  %v1809_v31 = vsel %vm1014_vm4, %v1794_v29, -inf }
 0xb91   : > { %1807 = vmax.xlane.f32.xlu0 %v1806_v9 }
 0xb92   : > { %v1795_v27 = vadd.f32 %v1788_v11, %v6068_v4 }
 0xb94   : > { %v1812_v33 = vsel %vm1014_vm4, %v1795_v27, -inf }
 0xb95   : > { %1810 = vmax.xlane.f32.xlu0 %v1809_v31  ;;  %1813 = vmax.xlane.f32.xlu1 %v1812_v33 }
 0xb99   : > { %1816 = vmax.xlane.f32.xlu0 %v1815_v34 }
 0xc12   : > { %v1799_v20 = vpop.xlane.xlu0 %1798 }
 0xc13   : > { %v1818_v18 = vsub.f32 %v1790_v5, %v1799_v20 }
 0xc15   : > { %v1825_v36 = vmul.f32 1.442695, %v1818_v18 }
 0xc16   : > { %v1805_v37 = vpop.xlane.xlu0 %1804  ;;  %v1802_v38 = vpop.xlane.xlu1 %1801 }
 0xc17   : > { %5521 = vpow2.f32 %v1825_v36  ;;  %v1820_v41 = vsub.f32 %v1792_v6, %v1805_v37  ;;  %v1819_v50 = vsub.f32 %v1791_v8, %v1802_v38 }
 0xc19   : > { %v1829_v51 = vmul.f32 1.442695, %v1820_v41  ;;  %v1827_v0 = vmul.f32 1.442695, %v1819_v50 }
 0xc1a   : > { %v1808_v1 = vpop.xlane.xlu0 %1807 }
 0xc1b   : > { %5523 = vpow2.f32 %v1829_v51  ;;  %v1821_v2 = vsub.f32 %v1793_v23, %v1808_v1 }
 0xc1c   : > { %5525 = vpow2.f32 %v1827_v0 }
 0xc1d   : > { %v1831_v52 = vmul.f32 1.442695, %v1821_v2 }
 0xc1e   : > { %v1811_v45 = vpop.xlane.xlu0 %1810  ;;  %v1814_v30 = vpop.xlane.xlu1 %1813 }
 0xc1f   : > { %5527 = vpow2.f32 %v1831_v52  ;;  %v1822_v53 = vsub.f32 %v1794_v29, %v1811_v45  ;;  %v1823_v7 = vsub.f32 %v1795_v27, %v1814_v30 }
 0xc21   : > { %v1833_v10 = vmul.f32 1.442695, %v1822_v53  ;;  %v1835_v5 = vmul.f32 1.442695, %v1823_v7 }
 0xc22   : > { %v1817_v12 = vpop.xlane.xlu0 %1816 }
 0xc23   : > { %5529 = vpow2.f32 %v1833_v10  ;;  %v1824_v19 = vsub.f32 %v1796_v32, %v1817_v12 }
 0xc24   : > { %v5522_v22 = vpop.eup %5521  ;;  %5531 = vpow2.f32 %v1835_v5 }
 0xc25   : > { %v1837_v6 = vmul.f32 1.442695, %v1824_v19  ;;  %v1839_v8 = vsel %vm1014_vm4, %v5522_v22, 0.0 }
 0xc26   : > { %1840 = vadd.xlane.f32.xlu1 %v1839_v8 }
 0xc27   : > { %5533 = vpow2.f32 %v1837_v6 }
 0xc28   : > { %v5524_v23 = vpop.eup %5523 }
 0xc29   : > { %v5526_v24 = vpop.eup %5525  ;;  %v1845_v25 = vsel %vm1014_vm4, %v5524_v23, 0.0 }
 0xc2a   : > { %v1842_v26 = vsel %vm1014_vm4, %v5526_v24, 0.0  ;;  %1846 = vadd.xlane.f32.xlu1 %v1845_v25 }
 0xc2b   : > { %1843 = vadd.xlane.f32.xlu0 %v1842_v26 }
 0xc2c   : > { %v5528_v11 = vpop.eup %5527 }
 0xc2d   : > { %v1848_v9 = vsel %vm1014_vm4, %v5528_v11, 0.0 }
 0xc2f   : > { %1849 = vadd.xlane.f32.xlu0 %v1848_v9 }
 0xc30   : > { %v5530_v29 = vpop.eup %5529 }
 0xc31   : > { %v5532_v27 = vpop.eup %5531  ;;  %v1851_v31 = vsel %vm1014_vm4, %v5530_v29, 0.0 }
 0xc32   : > { %1852 = vadd.xlane.f32.xlu1 %v1851_v31  ;;  %v1854_v33 = vsel %vm1014_vm4, %v5532_v27, 0.0 }
 0xc33   : > { %1855 = vadd.xlane.f32.xlu0 %v1854_v33 }
 0xc34   : > { %v5534_v32 = vpop.eup %5533 }
 0xc35   : > { %v1857_v34 = vsel %vm1014_vm4, %v5534_v32, 0.0 }
 0xc36   : > { %1858 = vadd.xlane.f32.xlu1 %v1857_v34 }
 0xc47   : > { %1968 = vrot.lane.b32.xlu1 %v6192_v16, %s5771_s27 }
 0xc49   : > { %1966 = vrot.lane.b32.xlu0 %v6188_v14, %s5771_s27 }
 0xc4b   : > { %1970 = vrot.lane.b32.xlu1 %v6186_v13, %s5771_s27 }
 0xc4d   : > { %1994 = vrot.lane.b32.xlu0 %v6253_v39, %s5772_s28 }
 0xc4f   : > { %1972 = vrot.lane.b32.xlu1 %v6190_v15, %s5771_s27 }
 0xc51   : > { %1998 = vrot.lane.b32.xlu0 %v6251_v28, %s5772_s28 }
 0xc53   : > { %1996 = vrot.lane.b32.xlu1 %v6257_v42, %s5772_s28 }
 0xc55   : > { %1974 = vrot.lane.b32.xlu0 %v6196_v3, %s5771_s27 }
 0xc57   : > { %2000 = vrot.lane.b32.xlu1 %v6255_v40, %s5772_s28 }
 0xc59   : > { %1978 = vrot.lane.b32.xlu0 %v6194_v17, %s5771_s27 }
 0xc5b   : > { %1976 = vrot.lane.b32.xlu1 %v6198_v21, %s5771_s27 }
 0xc5f   : > { %2002 = vrot.lane.b32.xlu1 %v6261_v49, %s5772_s28 }
 0xcaf   : > { %v1841_v13 = vpop.xlane.xlu1 %1840 }
 0xcb0   : > { %5535 = vrcp.f32 %v1841_v13 }
 0xcb3   : > { %v1847_v15 = vpop.xlane.xlu1 %1846 }
 0xcb4   : > { %v1844_v14 = vpop.xlane.xlu0 %1843 }
 0xcb5   : > { %5537 = vrcp.f32 %v1844_v14 }
 0xcb6   : > { %5539 = vrcp.f32 %v1847_v15 }
 0xcb8   : > { %v1850_v16 = vpop.xlane.xlu0 %1849 }
 0xcb9   : > { %5541 = vrcp.f32 %v1850_v16 }
 0xcbb   : > { %v1853_v3 = vpop.xlane.xlu1 %1852 }
 0xcbc   : > { %v1856_v28 = vpop.xlane.xlu0 %1855  ;;  %5543 = vrcp.f32 %v1853_v3 }
 0xcbd   : > { %5545 = vrcp.f32 %v1856_v28  ;;  %v5536_v17 = vpop.eup %5535 }
 0xcbe   : > { %v1867_v21 = vmul.f32 %v5536_v17, %v5522_v22 }
 0xcbf   : > { %v1859_v39 = vpop.xlane.xlu1 %1858 }
 0xcc0   : > { %5547 = vrcp.f32 %v1859_v39 }
 0xcc2   : > { %v5538_v40 = vpop.eup %5537 }
 0xcc3   : > { %v1868_v42 = vmul.f32 %v5538_v40, %v5526_v24  ;;  %v5540_v20 = vpop.eup %5539  ;;  %v1969_v6 = vpop.permute.xlu1 %1968 }
 0xcc4   : > { %v1869_v36 = vmul.f32 %v5540_v20, %v5524_v23  ;;  %v1967_v23 = vpop.permute.xlu0 %1966 }
 0xcc5   : > { %v1874_v49 = vpack.c.bf16 %v1868_v42, %v1867_v21  ;;  %v2043_v14 = vsel %vm923_vm1, %v6123_v47, %v1967_v23 }
 0xcc6   : > { %v5542_v18 = vpop.eup %5541 }
 0xcc7   : > { %v1870_v37 = vmul.f32 %v5542_v18, %v5528_v11  ;;  %5107 = vmatprep.mubr.msk.bf16.mxu0 %vm1014_vm4, %v1874_v49  ;;  %v1971_v8 = vpop.permute.xlu1 %1970 }
 0xcc8   : > { %v1995_v25 = vpop.permute.xlu0 %1994 }
 0xcc9   : > { %v5544_v38 = vpop.eup %5543  ;;  %v1875_v41 = vpack.c.bf16 %v1870_v37, %v1869_v36  ;;  %v2051_v15 = vsel %vm2050_vm6, %v2043_v14, %v1995_v25 }
 0xcca   : > { %v5546_v50 = vpop.eup %5545  ;;  %v1871_v51 = vmul.f32 %v5544_v38, %v5530_v29 }
 0xccb   : > { %5108 = vmatmul.mubr.msk.bf16.vlgmr.msra.gmra.mxu0 %vm1014_vm4, %v1875_v41  ;;  %v1872_v0 = vmul.f32 %v5546_v50, %v5532_v27  ;;  %v1973_v24 = vpop.permute.xlu1 %1972 }
 0xccc   : > { %v1999_v26 = vpop.permute.xlu0 %1998  ;;  %v2046_v17 = vsel %vm923_vm1, %v6125_v57, %v1973_v24 }
 0xccd   : > { %v5548_v1 = vpop.eup %5547  ;;  %v1876_v2 = vpack.c.bf16 %v1872_v0, %v1871_v51 }
 0xcce   : > { %v1873_v52 = vmul.f32 %v5548_v1, %v5534_v32 }
 0xccf   : > { %5111 = vmatprep.mubr.msk.bf16.mxu0 %vm1014_vm4, %v1876_v2 }
 0xcd0   : > { %v1877_v45 = vpack.c.bf16 %v1873_v52, %v1873_v52  ;;  %v1975_v9 = vpop.permute.xlu0 %1974 }
 0xcd1   : > { %v2047_v57 = vsel %vm923_vm1, %v6131_v60, %v1975_v9 }
 0xcd3   : > { %5112 = vmatmul.mubr.msk.bf16.gmra.mxu0 %vm1014_vm4, %v1877_v45 }
 0xcd4   : > { %v1979_v27 = vpop.permute.xlu0 %1978 }
 0xd8b   : > { %v5109_v30 = vpop.f32.mrf.mxu0 }
 0xd8c   : > { %2026 = vrot.lane.b32.xlu0 %v5109_v30, %s5773_s15 }
 0xd8d   : > { %v1929_v53 = vpop.f32.mrf.mxu0 }
 0xd8f   : > { %v5110_v7 = vpop.f32.mrf.mxu0 }
 0xd90   : > { %2022 = vrot.lane.b32.xlu0 %v1929_v53, %s5773_s15  ;;  %2028 = vrot.lane.b32.xlu1 %v5110_v7, %s5773_s15 }
 0xd91   : > { %v1932_v10 = vpop.f32.mrf.mxu0 }
 0xd93   : > { %v5113_v5 = vpop.f32.mrf.mxu0 }
 0xd94   : > { %2004 = vrot.lane.b32.xlu0 %v6263_v48, %s5772_s28  ;;  %2024 = vrot.lane.b32.xlu1 %v1932_v10, %s5773_s15  ;;  %v1997_v48 = vpop.permute.xlu1 %1996 }
 0xd95   : > { %v1945_v12 = vpop.f32.mrf.mxu0 }
 0xd97   : > { %v5114_v19 = vpop.f32.mrf.mxu0 }
 0xd98   : > { %2006 = vrot.lane.b32.xlu1 %v6259_v43, %s5772_s28  ;;  %2030 = vrot.lane.b32.xlu0 %v1945_v12, %s5773_s15  ;;  %v2001_v11 = vpop.permute.xlu1 %2000  ;;  %v2045_v43 = vsel %vm923_vm1, %v6121_v54, %v1971_v8 }
 0xd99   : > { %v1948_v22 = vpop.f32.mrf.mxu0  ;;  %v2053_v32 = vsel %vm2050_vm6, %v2045_v43, %v1999_v26  ;;  %v2054_v40 = vsel %vm2050_vm6, %v2046_v17, %v2001_v11 }
 0xd9c   : > { %2034 = vrot.lane.b32.xlu0 %v5113_v5, %s5773_s15  ;;  %2032 = vrot.lane.b32.xlu1 %v1948_v22, %s5773_s15  ;;  %v1977_v29 = vpop.permute.xlu1 %1976 }
 0xd9d   : > { %v2048_v60 = vsel %vm923_vm1, %v6133_v63, %v1977_v29 }
 0xda0   : > { %v2003_v31 = vpop.permute.xlu1 %2002 }
 0xdfe   : > { %v2027_v33 = vpop.permute.xlu0 %2026 }
 0xdff   : > { %v2061_v34 = vsel %vm2058_vm5, %v2053_v32, %v2027_v33 }
 0xe00   : > { %v6330_v13 = vadd.f32 %v2061_v34, %v5933_v44  ;;  %v2044_v44 = vsel %vm923_vm1, %v6127_v58, %v1969_v6  ;;  %v2055_v58 = vsel %vm2050_vm6, %v2047_v57, %v2003_v31 }
 0xe01   : > { %v2052_v47 = vsel %vm2050_vm6, %v2044_v44, %v1997_v48 }
 0xe02   : > { %v2023_v16 = vpop.permute.xlu0 %2022  ;;  %v2029_v3 = vpop.permute.xlu1 %2028  ;;  %v2081_v54 = vsel %vm503_vm0, %v6330_v13, 0.0 }
 0xe03   : > { %v2059_v28 = vsel %vm2058_vm5, %v2051_v15, %v2023_v16  ;;  %2082 = vadd.xlane.f32.xlu0 %v2081_v54  ;;  %v2062_v49 = vsel %vm2058_vm5, %v2054_v40, %v2029_v3 }
 0xe04   : > { %v6339_v39 = vadd.f32 %v2059_v28, %v5927_v35  ;;  %v6358_v36 = vadd.f32 %v2062_v49, %v5946_v56  ;;  %v5388_v49 = vld [vmem:[%s7298_s9] sm:$0xff]  }
 0xe06   : > { %v2005_v21 = vpop.permute.xlu0 %2004  ;;  %v2025_v42 = vpop.permute.xlu1 %2024  ;;  %v2075_v20 = vsel %vm503_vm0, %v6339_v39, 0.0  ;;  %v2084_v45 = vsel %vm503_vm0, %v6358_v36, 0.0 }
 0xe07   : > { %v2060_v35 = vsel %vm2058_vm5, %v2052_v47, %v2025_v42  ;;  %2076 = vadd.xlane.f32.xlu1 %v2075_v20  ;;  %v2056_v56 = vsel %vm2050_vm6, %v2048_v60, %v2005_v21  ;;  %v5387_v20 = vld [vmem:[%s7298_s9 + $0x8] sm:$0xff]  }
 0xe08   : > { %v6352_v18 = vadd.f32 %v2060_v35, %v5936_v46  ;;  %v2049_v46 = vsel %vm923_vm1, %v6129_v59, %v1979_v27  ;;  %5115 = vmatprep.subr.bf16.mxu0 %v5387_v20 }
 0xe09   : > { %5116 = vmatpush3.bf16.msra.mxu0 %v5387_v20 }
 0xe0a   : > { %v2031_v37 = vpop.permute.xlu0 %2030  ;;  %v2007_v38 = vpop.permute.xlu1 %2006  ;;  %v2078_v41 = vsel %vm503_vm0, %v6352_v18, 0.0  ;;  %5117 = vmatprep.subr.bf16.mxu0 %v5388_v49 }
 0xe0b   : > { %v2063_v50 = vsel %vm2058_vm5, %v2055_v58, %v2031_v37  ;;  %2079 = vadd.xlane.f32.xlu0 %v2078_v41  ;;  %v2057_v0 = vsel %vm2050_vm6, %v2049_v46, %v2007_v38 }
 0xe0c   : > { %v6364_v51 = vadd.f32 %v2063_v50, %v5943_v55 }
 0xe0d   : > { %5118 = vmatpush3.bf16.msra.mxu0 %v5388_v49 }
 0xe0e   : > { %v2035_v1 = vpop.permute.xlu0 %2034  ;;  %v2033_v2 = vpop.permute.xlu1 %2032  ;;  %v2087_v52 = vsel %vm503_vm0, %v6364_v51, 0.0 }
 0xe0f   : > { %v2065_v55 = vsel %vm2058_vm5, %v2057_v0, %v2035_v1  ;;  %v2064_v30 = vsel %vm2058_vm5, %v2056_v56, %v2033_v2  ;;  %2088 = vadd.xlane.f32.xlu1 %v2087_v52  ;;  %2085 = vadd.xlane.f32.xlu0 %v2084_v45 }
 0xe10   : > { %v6379_v59 = vadd.f32 %v2065_v55, %v5953_v61  ;;  %v6382_v63 = vadd.f32 %v2064_v30, %v5955_v62 }
 0xe12   : > { %v2093_v53 = vsel %vm503_vm0, %v6379_v59, 0.0  ;;  %v2090_v7 = vsel %vm503_vm0, %v6382_v63, 0.0 }
 0xe13   : > { %2094 = vadd.xlane.f32.xlu1 %v2093_v53  ;;  %2091 = vadd.xlane.f32.xlu0 %v2090_v7 }
 0xe8c   : > { %v2083_v10 = vpop.xlane.xlu0 %2082 }
 0xe8d   : > { %v2098_v5 = vmul.f32 0.03125, %v2083_v10 }
 0xe8f   : > { %v6389_v22 = vsub.f32 %v6330_v13, %v2098_v5 }
 0xe90   : > { %v2077_v12 = vpop.xlane.xlu1 %2076 }
 0xe91   : > { %v2096_v19 = vmul.f32 0.03125, %v2077_v12  ;;  %v2112_v25 = vmul.f32 %v6389_v22, %v6389_v22 }
 0xe93   : > { %v6392_v61 = vsub.f32 %v6339_v39, %v2096_v19  ;;  %v2123_v33 = vsel %vm503_vm0, %v2112_v25, 0.0 }
 0xe94   : > { %v2080_v62 = vpop.xlane.xlu0 %2079 }
 0xe95   : > { %v2097_v6 = vmul.f32 0.03125, %v2080_v62  ;;  %v2110_v8 = vmul.f32 %v6392_v61, %v6392_v61  ;;  %v4677_v62 = vld [vmem:[%s7296_s7] ss:$0 sm:$0xff] }
 0xe97   : > { %v6397_v23 = vsub.f32 %v6352_v18, %v2097_v6  ;;  %v2117_v24 = vsel %vm503_vm0, %v2110_v8, 0.0 }
 0xe98   : > { %v2086_v48 = vpop.xlane.xlu0 %2085  ;;  %2118 = vadd.xlane.f32.xlu0 %v2117_v24  ;;  %v2089_v26 = vpop.xlane.xlu1 %2088 }
 0xe99   : > { %v2099_v11 = vmul.f32 0.03125, %v2086_v48  ;;  %v2100_v9 = vmul.f32 0.03125, %v2089_v26  ;;  %v2111_v29 = vmul.f32 %v6397_v23, %v6397_v23  ;;  %v4678_v48 = vld [vmem:[%s7297_s8] ss:$0 sm:$0xff] }
 0xe9b   : > { %v6405_v27 = vsub.f32 %v6358_v36, %v2099_v11  ;;  %v6408_v43 = vsub.f32 %v6364_v51, %v2100_v9  ;;  %v2120_v31 = vsel %vm503_vm0, %v2111_v29, 0.0 }
 0xe9c   : > { %2121 = vadd.xlane.f32.xlu1 %v2120_v31  ;;  %v2092_v32 = vpop.xlane.xlu0 %2091  ;;  %2124 = vadd.xlane.f32.xlu0 %v2123_v33  ;;  %v2095_v34 = vpop.xlane.xlu1 %2094 }
 0xe9d   : > { %v2101_v14 = vmul.f32 0.03125, %v2092_v32  ;;  %v2102_v15 = vmul.f32 0.03125, %v2095_v34  ;;  %v2113_v16 = vmul.f32 %v6405_v27, %v6405_v27  ;;  %v2114_v3 = vmul.f32 %v6408_v43, %v6408_v43 }
 0xe9f   : > { %v6417_v54 = vsub.f32 %v6382_v63, %v2101_v14  ;;  %v6420_v28 = vsub.f32 %v6379_v59, %v2102_v15  ;;  %v2126_v44 = vsel %vm503_vm0, %v2113_v16, 0.0  ;;  %v2129_v17 = vsel %vm503_vm0, %v2114_v3, 0.0 }
 0xea0   : > { %2127 = vadd.xlane.f32.xlu1 %v2126_v44  ;;  %2130 = vadd.xlane.f32.xlu0 %v2129_v17 }
 0xea1   : > { %v2115_v47 = vmul.f32 %v6417_v54, %v6417_v54  ;;  %v2116_v40 = vmul.f32 %v6420_v28, %v6420_v28 }
 0xea3   : > { %v2132_v21 = vsel %vm503_vm0, %v2115_v47, 0.0  ;;  %v2135_v42 = vsel %vm503_vm0, %v2116_v40, 0.0 }
 0xea4   : > { %2133 = vadd.xlane.f32.xlu1 %v2132_v21  ;;  %2136 = vadd.xlane.f32.xlu0 %v2135_v42 }
 0xf21   : > { %v2119_v35 = vpop.xlane.xlu0 %2118 }
 0xf22   : > { %v2138_v57 = vmul.f32 0.03125, %v2119_v35 }
 0xf24   : > { %v2145_v58 = vadd.f32 1e-05, %v2138_v57  ;;  %v5391_v57 = vld [vmem:[%s7300_s11 + $0x28] sm:$0xff]  }
 0xf25   : > { %v2125_v37 = vpop.xlane.xlu0 %2124  ;;  %v2122_v38 = vpop.xlane.xlu1 %2121 }
 0xf26   : > { %5549 = vrsqrt.f32 %v2145_v58  ;;  %v2140_v41 = vmul.f32 0.03125, %v2125_v37  ;;  %v2139_v50 = vmul.f32 0.03125, %v2122_v38  ;;  %v5392_v58 = vld [vmem:[%s7300_s11 + $0x20] sm:$0xff]   ;;  %v5393_v37 = vld [vmem:[%s7300_s11 + $0x18] sm:$0xff]   ;;  %v5394_v38 = vld [vmem:[%s7300_s11 + $0x10] sm:$0xff]  }
 0xf28   : > { %v2147_v46 = vadd.f32 1e-05, %v2140_v41  ;;  %v2146_v60 = vadd.f32 1e-05, %v2139_v50  ;;  %v5395_v41 = vld [vmem:[%s7300_s11 + $0x8] sm:$0xff]   ;;  %v5396_v50 = vld [vmem:[%s7300_s11] sm:$0xff]  }
 0xf29   : > { %v2131_v56 = vpop.xlane.xlu0 %2130  ;;  %v2128_v0 = vpop.xlane.xlu1 %2127 }
 0xf2a   : > { %5551 = vrsqrt.f32 %v2147_v46  ;;  %v2142_v1 = vmul.f32 0.03125, %v2131_v56  ;;  %v2141_v2 = vmul.f32 0.03125, %v2128_v0  ;;  %v4679_v46 = vld [vmem:[%s7299_s10] ss:$0 sm:$0xff] }
 0xf2b   : > { %5553 = vrsqrt.f32 %v2146_v60 }
 0xf2c   : > { %v2149_v52 = vadd.f32 1e-05, %v2142_v1  ;;  %v2148_v45 = vadd.f32 1e-05, %v2141_v2 }
 0xf2d   : > { %v2137_v55 = vpop.xlane.xlu0 %2136  ;;  %v2134_v30 = vpop.xlane.xlu1 %2133 }
 0xf2e   : > { %5555 = vrsqrt.f32 %v2149_v52  ;;  %v2144_v53 = vmul.f32 0.03125, %v2137_v55  ;;  %v2143_v7 = vmul.f32 0.03125, %v2134_v30 }
 0xf2f   : > { %5557 = vrsqrt.f32 %v2148_v45 }
 0xf30   : > { %v2151_v10 = vadd.f32 1e-05, %v2144_v53  ;;  %v2150_v5 = vadd.f32 1e-05, %v2143_v7 }
 0xf32   : > { %5559 = vrsqrt.f32 %v2151_v10 }
 0xf33   : > { %v5550_v12 = vpop.eup %5549  ;;  %5561 = vrsqrt.f32 %v2150_v5 }
 0xf34   : > { %v2159_v19 = vmul.f32 %v5550_v12, %v6392_v61 }
 0xf36   : > { %v2172_v24 = vmul.f32 %v4677_v62, %v2159_v19 }
 0xf37   : > { %v5552_v6 = vpop.eup %5551 }
 0xf38   : > { %v5554_v8 = vpop.eup %5553  ;;  %v2161_v25 = vmul.f32 %v5552_v6, %v6389_v22  ;;  %v2185_v31 = vadd.f32 %v4678_v48, %v2172_v24 }
 0xf39   : > { %v2160_v26 = vmul.f32 %v5554_v8, %v6397_v23 }
 0xf3a   : > { %v2174_v61 = vmul.f32 %v4677_v62, %v2161_v25 }
 0xf3b   : > { %v5556_v11 = vpop.eup %5555  ;;  %v2173_v9 = vmul.f32 %v4677_v62, %v2160_v26 }
 0xf3c   : > { %v5558_v29 = vpop.eup %5557  ;;  %v2163_v34 = vmul.f32 %v5556_v11, %v6408_v43  ;;  %v2187_v44 = vadd.f32 %v4678_v48, %v2174_v61 }
 0xf3d   : > { %v2162_v33 = vmul.f32 %v5558_v29, %v6405_v27  ;;  %v2186_v32 = vadd.f32 %v4678_v48, %v2173_v9 }
 0xf3e   : > { %v2176_v47 = vmul.f32 %v4677_v62, %v2163_v34 }
 0xf3f   : > { %v5560_v14 = vpop.eup %5559  ;;  %v2175_v15 = vmul.f32 %v4677_v62, %v2162_v33  ;;  %v2196_v16 = vpack.c.bf16 %v2186_v32, %v2185_v31 }
 0xf40   : > { %v5562_v22 = vpop.eup %5561  ;;  %v2165_v3 = vmul.f32 %v5560_v14, %v6420_v28  ;;  %v2189_v27 = vadd.f32 %v4678_v48, %v2176_v47  ;;  %v5389_v28 = vld [vmem:[%s7300_s11 + $0x38] sm:$0xff]  }
 0xf41   : > { %5119 = vmatprep.mubr.msk.bf16.mxu0 %vm503_vm0, %v2196_v16  ;;  %v2188_v23 = vadd.f32 %v4678_v48, %v2175_v15  ;;  %v2164_v17 = vmul.f32 %v5562_v22, %v6417_v54  ;;  %5127 = vmatprep.subr.bf16.mxu1 %v5389_v28  ;;  %v5390_v54 = vld [vmem:[%s7300_s11 + $0x30] sm:$0xff]  }
 0xf42   : > { %v2178_v42 = vmul.f32 %v4677_v62, %v2165_v3  ;;  %5128 = vmatpush3.bf16.msra.mxu1 %v5389_v28 }
 0xf43   : > { %v2197_v40 = vpack.c.bf16 %v2188_v23, %v2187_v44  ;;  %v2177_v21 = vmul.f32 %v4677_v62, %v2164_v17  ;;  %5129 = vmatprep.subr.bf16.mxu1 %v5390_v54 }
 0xf44   : > { %v2191_v49 = vadd.f32 %v4678_v48, %v2178_v42 }
 0xf45   : > { %5120 = vmatmul.mubr.msk.bf16.vlgmr.msra.gmra.mxu0 %vm503_vm0, %v2197_v40  ;;  %v2190_v43 = vadd.f32 %v4678_v48, %v2177_v21 }
 0xf46   : > { %v2199_v35 = vpack.c.bf16 %v2191_v49, %v2191_v49  ;;  %5130 = vmatpush3.bf16.msra.mxu1 %v5390_v54 }
 0xf47   : > { %v2198_v20 = vpack.c.bf16 %v2190_v43, %v2189_v27  ;;  %5131 = vmatprep.subr.bf16.mxu1 %v5391_v57 }
 0xf49   : > { %5123 = vmatprep.mubr.msk.bf16.mxu0 %vm503_vm0, %v2198_v20 }
 0xf4a   : > { %5132 = vmatpush3.bf16.msra.mxu1 %v5391_v57 }
 0xf4b   : > { %5133 = vmatprep.subr.bf16.mxu1 %v5392_v58 }
 0xf4d   : > { %5124 = vmatmul.mubr.msk.bf16.gmra.mxu0 %vm503_vm0, %v2199_v35 }
 0xf4e   : > { %5134 = vmatpush3.bf16.msra.mxu1 %v5392_v58 }
 0xf4f   : > { %5135 = vmatprep.subr.bf16.mxu1 %v5393_v37 }
 0xf52   : > { %5136 = vmatpush3.bf16.msra.mxu1 %v5393_v37 }
 0xf53   : > { %5137 = vmatprep.subr.bf16.mxu1 %v5394_v38 }
 0xf56   : > { %5138 = vmatpush3.bf16.msra.mxu1 %v5394_v38 }
 0xf57   : > { %5139 = vmatprep.subr.bf16.mxu1 %v5395_v41 }
 0xf5a   : > { %5140 = vmatpush3.bf16.msra.mxu1 %v5395_v41 }
 0xf5b   : > { %5141 = vmatprep.subr.bf16.mxu1 %v5396_v50 }
 0xf5e   : > { %5142 = vmatpush3.bf16.msra.mxu1 %v5396_v50 }
0x1005   : > { %v5121_v60 = vpop.f32.mrf.mxu0 }
0x1006   : > { %v6480_v56 = vadd.f32 %v5121_v60, %v4679_v46 }
0x1007   : > { %v2265_v0 = vpop.f32.mrf.mxu0 }
0x1008   : > { %v6483_v1 = vmul.f32 0.70710677, %v6480_v56  ;;  %v6485_v2 = vadd.f32 %v4679_v46, %v2265_v0 }
0x1009   : > { %v5122_v52 = vpop.f32.mrf.mxu0 }
0x100a   : > { %v2311_v45 = vand.u32 2147483647, %v6483_v1  ;;  %v6489_v55 = vmul.f32 0.70710677, %v6485_v2  ;;  %v6491_v30 = vadd.f32 %v5122_v52, %v4679_v46  ;;  %vm2451_vm7 = vcmp.lt.f32.partialorder %v6483_v1, 0.0 }
0x100b   : > { %v2268_v53 = vpop.f32.mrf.mxu0 }
0x100c   : > { %v2318_v7 = vmul.f32 0.3275911, %v2311_v45  ;;  %v2309_v10 = vand.u32 2147483647, %v6489_v55  ;;  %v6495_v5 = vmul.f32 0.70710677, %v6491_v30  ;;  %v6497_v12 = vadd.f32 %v4679_v46, %v2268_v53 }
0x100d   : > { %v5125_v19 = vpop.f32.mrf.mxu0  ;;  %v2409_v14 = vsub.f32 0.0, %v2311_v45  ;;  %vm2449_vm8 = vcmp.lt.f32.partialorder %v6489_v55, 0.0 }
0x100e   : > { %v2325_v62 = vadd.f32 1.0, %v2318_v7  ;;  %v2316_v6 = vmul.f32 0.3275911, %v2309_v10  ;;  %v2312_v8 = vand.u32 2147483647, %v6495_v5  ;;  %v6504_v29 = vadd.f32 %v5125_v19, %v4679_v46 }
0x100f   : > { %v6501_v24 = vmul.f32 0.70710677, %v6497_v12  ;;  %v2281_v25 = vpop.f32.mrf.mxu0  ;;  %v2407_v44 = vsub.f32 0.0, %v2309_v10  ;;  %v2416_v17 = vmul.f32 %v2409_v14, %v2311_v45  ;;  %vm2452_vm9 = vcmp.lt.f32.partialorder %v6495_v5, 0.0 }
0x1010   : > { %5563 = vrcp.f32 %v2325_v62  ;;  %v2323_v48 = vadd.f32 1.0, %v2316_v6  ;;  %v2319_v26 = vmul.f32 0.3275911, %v2312_v8  ;;  %v6506_v31 = vadd.f32 %v4679_v46, %v2281_v25 }
0x1011   : > { %v2310_v11 = vand.u32 2147483647, %v6501_v24  ;;  %v5126_v9 = vpop.f32.mrf.mxu0  ;;  %v6509_v32 = vmul.f32 0.70710677, %v6504_v29  ;;  %v2410_v42 = vsub.f32 0.0, %v2312_v8  ;;  %v2414_v20 = vmul.f32 %v2407_v44, %v2309_v10 }
0x1012   : > { %5565 = vrcp.f32 %v2323_v48  ;;  %v2326_v61 = vadd.f32 1.0, %v2319_v26  ;;  %v6513_v22 = vmul.f32 0.70710677, %v6506_v31  ;;  %v2425_v35 = vmul.f32 1.442695, %v2416_v17 }
0x1013   : > { %v2317_v33 = vmul.f32 0.3275911, %v2310_v11  ;;  %v2284_v34 = vpop.f32.mrf.mxu0  ;;  %v2315_v16 = vand.u32 2147483647, %v6509_v32  ;;  %v2408_v28 = vsub.f32 0.0, %v2310_v11  ;;  %v2417_v37 = vmul.f32 %v2410_v42, %v2312_v8 }
0x1014   : > { %5567 = vrcp.f32 %v2326_v61  ;;  %v6515_v3 = vadd.f32 %v4679_v46, %v2284_v34  ;;  %v2313_v47 = vand.u32 2147483647, %v6513_v22  ;;  %v2421_v46 = vmul.f32 1.442695, %v2414_v20 }
0x1015   : > { %v2324_v15 = vadd.f32 1.0, %v2317_v33  ;;  %v2322_v23 = vmul.f32 0.3275911, %v2315_v16  ;;  %v2415_v0 = vmul.f32 %v2408_v28, %v2310_v11  ;;  %v2413_v53 = vsub.f32 0.0, %v2315_v16 }
0x1016   : > { %v6519_v40 = vmul.f32 0.70710677, %v6515_v3  ;;  %v2320_v27 = vmul.f32 0.3275911, %v2313_v47  ;;  %v2427_v19 = vmul.f32 1.442695, %v2417_v37 }
0x1017   : > { %5569 = vrcp.f32 %v2324_v15  ;;  %v2329_v21 = vadd.f32 1.0, %v2322_v23  ;;  %v2423_v48 = vmul.f32 1.442695, %v2415_v0  ;;  %v2411_v26 = vsub.f32 0.0, %v2313_v47 }
0x1018   : > { %v2314_v43 = vand.u32 2147483647, %v6519_v40  ;;  %v2327_v54 = vadd.f32 1.0, %v2320_v27  ;;  %v2420_v61 = vmul.f32 %v2413_v53, %v2315_v16  ;;  %vm2450_vm10 = vcmp.lt.f32.partialorder %v6501_v24, 0.0 }
0x1019   : > { %5571 = vrcp.f32 %v2329_v21  ;;  %v2418_v42 = vmul.f32 %v2411_v26, %v2313_v47  ;;  %vm2455_vm11 = vcmp.lt.f32.partialorder %v6509_v32, 0.0  ;;  %vm2453_vm12 = vcmp.lt.f32.partialorder %v6513_v22, 0.0 }
0x101a   : > { %v2321_v57 = vmul.f32 0.3275911, %v2314_v43  ;;  %5573 = vrcp.f32 %v2327_v54  ;;  %v2412_v14 = vsub.f32 0.0, %v2314_v43  ;;  %vm2454_vm13 = vcmp.lt.f32.partialorder %v6519_v40, 0.0  ;;  %v4686_v40 = vld [vmem:[%s7301_s12] ss:$0 sm:$0xff] }
0x101b   : > { %5575 = vpow2.f32 %v2425_v35  ;;  %v2433_v35 = vmul.f32 1.442695, %v2420_v61  ;;  %v2429_v0 = vmul.f32 1.442695, %v2418_v42  ;;  %v2299_v32 = vmul.f32 0.5, %v6506_v31 }
0x101c   : > { %v2328_v38 = vadd.f32 1.0, %v2321_v57  ;;  %v2419_v57 = vmul.f32 %v2412_v14, %v2314_v43 }
0x101d   : > { %v5564_v49 = vpop.eup %5563 }
0x101e   : > { %v2346_v58 = vmul.f32 1.0614054, %v5564_v49  ;;  %5577 = vrcp.f32 %v2328_v38 }
0x101f   : > { %v6522_v41 = vpop.eup %5565  ;;  %5579 = vpow2.f32 %v2421_v46 }
0x1020   : > { %v2353_v50 = vadd.f32 -1.4531521, %v2346_v58  ;;  %v2344_v60 = vmul.f32 1.0614054, %v6522_v41  ;;  %5581 = vpow2.f32 %v2427_v19 }
0x1021   : > { %v6525_v52 = vpop.eup %5567  ;;  %5583 = vpow2.f32 %v2423_v48 }
0x1022   : > { %v2360_v45 = vmul.f32 %v5564_v49, %v2353_v50  ;;  %v2351_v7 = vadd.f32 -1.4531521, %v2344_v60  ;;  %v2347_v10 = vmul.f32 1.0614054, %v6525_v52  ;;  %5585 = vpow2.f32 %v2433_v35 }
0x1023   : > { %5587 = vpow2.f32 %v2429_v0 }
0x1024   : > { %v2367_v62 = vadd.f32 1.4214138, %v2360_v45  ;;  %v6528_v6 = vpop.eup %5569  ;;  %v2358_v8 = vmul.f32 %v6522_v41, %v2351_v7  ;;  %v2354_v25 = vadd.f32 -1.4531521, %v2347_v10 }
0x1025   : > { %v2345_v11 = vmul.f32 1.0614054, %v6528_v6 }
0x1026   : > { %v2374_v9 = vmul.f32 %v5564_v49, %v2367_v62  ;;  %v2365_v33 = vadd.f32 1.4214138, %v2358_v8  ;;  %v2361_v34 = vmul.f32 %v6525_v52, %v2354_v25  ;;  %v6533_v23 = vpop.eup %5571  ;;  %v2431_v25 = vmul.f32 1.442695, %v2419_v57 }
0x1027   : > { %v2352_v44 = vadd.f32 -1.4531521, %v2345_v11  ;;  %v2350_v16 = vmul.f32 1.0614054, %v6533_v23  ;;  %v6539_v58 = vpop.eup %5573 }
0x1028   : > { %v2381_v15 = vadd.f32 -0.28449672, %v2374_v9  ;;  %v2372_v17 = vmul.f32 %v6522_v41, %v2365_v33  ;;  %v2368_v21 = vadd.f32 1.4214138, %v2361_v34  ;;  %v2348_v47 = vmul.f32 1.0614054, %v6539_v58  ;;  %v5576_v45 = vpop.eup %5575 }
0x1029   : > { %v2359_v20 = vmul.f32 %v6528_v6, %v2352_v44  ;;  %v2357_v50 = vadd.f32 -1.4531521, %v2350_v16  ;;  %5589 = vpow2.f32 %v2431_v25 }
0x102a   : > { %v2388_v27 = vmul.f32 %v5564_v49, %v2381_v15  ;;  %v2379_v28 = vadd.f32 -0.28449672, %v2372_v17  ;;  %v2375_v54 = vmul.f32 %v6525_v52, %v2368_v21  ;;  %v2355_v8 = vadd.f32 -1.4531521, %v2348_v47 }
0x102b   : > { %v2366_v38 = vadd.f32 1.4214138, %v2359_v20  ;;  %v2364_v10 = vmul.f32 %v6533_v23, %v2357_v50  ;;  %v6545_v19 = vpop.eup %5577 }
0x102c   : > { %v2395_v37 = vadd.f32 0.2548296, %v2388_v27  ;;  %v2386_v46 = vmul.f32 %v6522_v41, %v2379_v28  ;;  %v2382_v60 = vadd.f32 -0.28449672, %v2375_v54  ;;  %v2349_v9 = vmul.f32 1.0614054, %v6545_v19  ;;  %v5580_v61 = vpop.eup %5579 }
0x102d   : > { %v2373_v7 = vmul.f32 %v6528_v6, %v2366_v38  ;;  %v2371_v11 = vadd.f32 1.4214138, %v2364_v10  ;;  %v2362_v34 = vmul.f32 %v6539_v58, %v2355_v8  ;;  %v5582_v20 = vpop.eup %5581 }
0x102e   : > { %v2402_v53 = vmul.f32 %v5564_v49, %v2395_v37  ;;  %v2393_v43 = vadd.f32 0.2548296, %v2386_v46  ;;  %v2389_v62 = vmul.f32 %v6525_v52, %v2382_v60  ;;  %v2356_v15 = vadd.f32 -1.4531521, %v2349_v9  ;;  %v5584_v37 = vpop.eup %5583 }
0x102f   : > { %v2380_v26 = vadd.f32 -0.28449672, %v2373_v7  ;;  %v2378_v44 = vmul.f32 %v6533_v23, %v2371_v11  ;;  %v2369_v27 = vadd.f32 1.4214138, %v2362_v34  ;;  %v2295_v11 = vmul.f32 0.5, %v6485_v2 }
0x1030   : > { %v2437_v48 = vmul.f32 %v5576_v45, %v2402_v53  ;;  %v2400_v49 = vmul.f32 %v6522_v41, %v2393_v43  ;;  %v2396_v33 = vadd.f32 0.2548296, %v2389_v62  ;;  %v2363_v16 = vmul.f32 %v6545_v19, %v2356_v15 }
0x1031   : > { %v2387_v14 = vmul.f32 %v6528_v6, %v2380_v26  ;;  %v2385_v41 = vadd.f32 -0.28449672, %v2378_v44  ;;  %v2376_v57 = vmul.f32 %v6539_v58, %v2369_v27 }
0x1032   : > { %v2444_v17 = vsub.f32 1.0, %v2437_v48  ;;  %v2435_v21 = vmul.f32 %v5580_v61, %v2400_v49  ;;  %v2403_v42 = vmul.f32 %v6525_v52, %v2396_v33  ;;  %v2370_v50 = vadd.f32 1.4214138, %v2363_v16  ;;  %v5586_v48 = vpop.eup %5585 }
0x1033   : > { %v2394_v35 = vadd.f32 0.2548296, %v2387_v14  ;;  %v2392_v46 = vmul.f32 %v6533_v23, %v2385_v41  ;;  %v2383_v0 = vadd.f32 -0.28449672, %v2376_v57  ;;  %v5588_v14 = vpop.eup %5587 }
0x1034   : > { %v2442_v28 = vsub.f32 1.0, %v2435_v21  ;;  %v2438_v54 = vmul.f32 %v5582_v20, %v2403_v42  ;;  %v2458_v60 = vsub.f32 0.0, %v2444_v17  ;;  %v2377_v53 = vmul.f32 %v6545_v19, %v2370_v50 }
0x1035   : > { %v2401_v38 = vmul.f32 %v6528_v6, %v2394_v35  ;;  %v2399_v7 = vadd.f32 0.2548296, %v2392_v46  ;;  %v2390_v6 = vmul.f32 %v6539_v58, %v2383_v0  ;;  %v2296_v21 = vmul.f32 0.5, %v6497_v12 }
0x1036   : > { %v2456_v47 = vsub.f32 0.0, %v2442_v28  ;;  %v2445_v52 = vsub.f32 1.0, %v2438_v54  ;;  %v2384_v8 = vadd.f32 -0.28449672, %v2377_v53  ;;  %v2465_v26 = vsel %vm2451_vm7, %v2458_v60, %v2444_v17  ;;  %v5590_v24 = vpop.eup %5589 }
0x1037   : > { %v2436_v45 = vmul.f32 %v5584_v37, %v2401_v38  ;;  %v2406_v25 = vmul.f32 %v6533_v23, %v2399_v7  ;;  %v2397_v1 = vadd.f32 0.2548296, %v2390_v6  ;;  %v2472_v15 = vadd.f32 1.0, %v2465_v26 }
0x1038   : > { %v2459_v10 = vsub.f32 0.0, %v2445_v52  ;;  %v2463_v43 = vsel %vm2449_vm8, %v2456_v47, %v2442_v28  ;;  %v2391_v55 = vmul.f32 %v6545_v19, %v2384_v8  ;;  %v2298_v23 = vmul.f32 0.5, %v6491_v30 }
0x1039   : > { %v2443_v62 = vsub.f32 1.0, %v2436_v45  ;;  %v2470_v33 = vadd.f32 1.0, %v2463_v43  ;;  %v2404_v5 = vmul.f32 %v6539_v58, %v2397_v1  ;;  %v2441_v34 = vmul.f32 %v5586_v48, %v2406_v25 }
0x103a   : > { %v2466_v9 = vsel %vm2452_vm9, %v2459_v10, %v2445_v52  ;;  %v2398_v17 = vadd.f32 0.2548296, %v2391_v55  ;;  %v2297_v20 = vmul.f32 0.5, %v6480_v56  ;;  %v2301_v52 = vmul.f32 0.5, %v6504_v29 }
0x103b   : > { %v2473_v61 = vadd.f32 1.0, %v2466_v9  ;;  %v2457_v49 = vsub.f32 0.0, %v2443_v62  ;;  %v2439_v2 = vmul.f32 %v5588_v14, %v2404_v5  ;;  %v2448_v27 = vsub.f32 1.0, %v2441_v34 }
0x103c   : > { %v2405_v16 = vmul.f32 %v6545_v19, %v2398_v17  ;;  %v2477_v41 = vmul.f32 %v2470_v33, %v2295_v11  ;;  %v2479_v57 = vmul.f32 %v2472_v15, %v2297_v20  ;;  %v2300_v45 = vmul.f32 0.5, %v6515_v3 }
0x103d   : > { %v2464_v44 = vsel %vm2450_vm10, %v2457_v49, %v2443_v62  ;;  %v2480_v35 = vmul.f32 %v2473_v61, %v2298_v23  ;;  %v2446_v28 = vsub.f32 1.0, %v2439_v2  ;;  %v2462_v54 = vsub.f32 0.0, %v2448_v27 }
0x103e   : > { %v2471_v42 = vadd.f32 1.0, %v2464_v44  ;;  %v2440_v30 = vmul.f32 %v5590_v24, %v2405_v16 }
0x103f   : > { %v2460_v37 = vsub.f32 0.0, %v2446_v28  ;;  %v2469_v12 = vsel %vm2455_vm11, %v2462_v54, %v2448_v27  ;;  %v2501_v50 = vpack.c.bf16 %v2480_v35, %v2479_v57 }
0x1040   : > { %v2478_v58 = vmul.f32 %v2471_v42, %v2296_v21  ;;  %v2447_v46 = vsub.f32 1.0, %v2440_v30  ;;  %v2476_v19 = vadd.f32 1.0, %v2469_v12 }
0x1041   : > { %v2467_v56 = vsel %vm2453_vm12, %v2460_v37, %v2446_v28 }
0x1042   : > { %v2500_v38 = vpack.c.bf16 %v2478_v58, %v2477_v41  ;;  %v2461_v60 = vsub.f32 0.0, %v2447_v46  ;;  %v2474_v47 = vadd.f32 1.0, %v2467_v56  ;;  %v2483_v7 = vmul.f32 %v2476_v19, %v2301_v52 }
0x1044   : > { %5143 = vmatprep.mubr.bf16.mxu1 %v2500_v38  ;;  %v2468_v0 = vsel %vm2454_vm13, %v2461_v60, %v2447_v46  ;;  %v2481_v10 = vmul.f32 %v2474_v47, %v2299_v32  ;;  %v2503_v43 = vpack.c.bf16 %v2483_v7, %v2483_v7 }
0x1045   : > { %5144 = vmatmul.mubr.bf16.vlgmr.msra.gmra.mxu1 %v2501_v50  ;;  %v2475_v53 = vadd.f32 1.0, %v2468_v0 }
0x1047   : > { %v2482_v22 = vmul.f32 %v2475_v53, %v2300_v45 }
0x1049   : > { %v2502_v6 = vpack.c.bf16 %v2482_v22, %v2481_v10 }
0x104b   : > { %5147 = vmatprep.mubr.bf16.mxu1 %v2502_v6 }
0x104d   : > { %5148 = vmatmul.mubr.bf16.gmra.mxu1 %v2503_v43 }
0x1105   : > { %v5145_v62 = vpop.f32.mrf.mxu1 }
0x1106   : > { %v2602_v29 = vadd.f32 %v5145_v62, %v4686_v40 }
0x1107   : > { %v2593_v8 = vpop.f32.mrf.mxu1 }
0x1108   : > { %v2594_v25 = vadd.f32 %v4686_v40, %v2593_v8  ;;  %v6585_v26 = vadd.f32 %v2602_v29, %v6330_v13  ;;  %v5397_v8 = vld [vmem:[%s7302_s13 + $0x8] sm:$0xff]   ;;  %v5398_v29 = vld [vmem:[%s7302_s13] sm:$0xff]  }
0x1109   : > { %v5146_v48 = vpop.f32.mrf.mxu1  ;;  %5151 = vmatprep.subr.bf16.mxu0 %v5397_v8 }
0x110a   : > { %v6582_v31 = vadd.f32 %v2594_v25, %v6339_v39  ;;  %v2605_v9 = vadd.f32 %v5146_v48, %v4686_v40  ;;  %v2640_v13 = vsel %vm503_vm0, %v6585_v26, 0.0  ;;  %5152 = vmatpush3.bf16.msra.mxu0 %v5397_v8 }
0x110b   : > { %v2596_v3 = vpop.f32.mrf.mxu1  ;;  %5153 = vmatprep.subr.bf16.mxu0 %v5398_v29 }
0x110c   : > { %v2597_v1 = vadd.f32 %v4686_v40, %v2596_v3  ;;  %v2634_v11 = vsel %vm503_vm0, %v6582_v31, 0.0  ;;  %v6593_v55 = vadd.f32 %v2605_v9, %v6358_v36 }
0x110d   : > { %2635 = vadd.xlane.f32.xlu1 %v2634_v11  ;;  %v5149_v49 = vpop.f32.mrf.mxu1 }
0x110e   : > { %v6590_v61 = vadd.f32 %v2597_v1, %v6352_v18  ;;  %v2618_v5 = vadd.f32 %v5149_v49, %v4686_v40  ;;  %v2643_v18 = vsel %vm503_vm0, %v6593_v55, 0.0  ;;  %5154 = vmatpush3.bf16.msra.mxu0 %v5398_v29 }
0x110f   : > { %v2609_v33 = vpop.f32.mrf.mxu1 }
0x1110   : > { %v2637_v39 = vsel %vm503_vm0, %v6590_v61, 0.0  ;;  %v2610_v34 = vadd.f32 %v4686_v40, %v2609_v33  ;;  %v6605_v23 = vadd.f32 %v2618_v5, %v6379_v59 }
0x1111   : > { %2638 = vadd.xlane.f32.xlu0 %v2637_v39  ;;  %2641 = vadd.xlane.f32.xlu1 %v2640_v13  ;;  %v5150_v14 = vpop.f32.mrf.mxu1 }
0x1112   : > { %v6600_v15 = vadd.f32 %v2610_v34, %v6364_v51  ;;  %v2652_v42 = vsel %vm503_vm0, %v6605_v23, 0.0 }
0x1113   : > { %v2612_v36 = vpop.f32.mrf.mxu1 }
0x1114   : > { %v2613_v44 = vadd.f32 %v4686_v40, %v2612_v36  ;;  %v2646_v17 = vsel %vm503_vm0, %v6600_v15, 0.0 }
0x1115   : > { %2644 = vadd.xlane.f32.xlu0 %v2643_v18  ;;  %2647 = vadd.xlane.f32.xlu1 %v2646_v17 }
0x1116   : > { %v6610_v21 = vadd.f32 %v2613_v44, %v6382_v63 }
0x1118   : > { %v2649_v51 = vsel %vm503_vm0, %v6610_v21, 0.0 }
0x1119   : > { %2650 = vadd.xlane.f32.xlu0 %v2649_v51  ;;  %2653 = vadd.xlane.f32.xlu1 %v2652_v42 }
0x1196   : > { %v2636_v2 = vpop.xlane.xlu1 %2635 }
0x1197   : > { %v2655_v27 = vmul.f32 0.03125, %v2636_v2 }
0x1199   : > { %v6617_v59 = vsub.f32 %v6582_v31, %v2655_v27 }
0x119a   : > { %v2639_v20 = vpop.xlane.xlu0 %2638  ;;  %v2642_v35 = vpop.xlane.xlu1 %2641 }
0x119b   : > { %v2656_v16 = vmul.f32 0.03125, %v2639_v20  ;;  %v2657_v24 = vmul.f32 0.03125, %v2642_v35  ;;  %v2669_v63 = vmul.f32 %v6617_v59, %v6617_v59 }
0x119d   : > { %v6622_v41 = vsub.f32 %v6590_v61, %v2656_v16  ;;  %v6625_v58 = vsub.f32 %v6585_v26, %v2657_v24  ;;  %v2676_v28 = vsel %vm503_vm0, %v2669_v63, 0.0  ;;  %v4697_v16 = vld [vmem:[%s7294_s5 + $0x1] ss:$0 sm:$0xff] }
0x119e   : > { %v2645_v54 = vpop.xlane.xlu0 %2644  ;;  %2677 = vadd.xlane.f32.xlu0 %v2676_v28  ;;  %v2648_v38 = vpop.xlane.xlu1 %2647 }
0x119f   : > { %v2658_v57 = vmul.f32 0.03125, %v2645_v54  ;;  %v2670_v30 = vmul.f32 %v6622_v41, %v6622_v41  ;;  %v2671_v37 = vmul.f32 %v6625_v58, %v6625_v58  ;;  %v2659_v50 = vmul.f32 0.03125, %v2648_v38 }
0x11a1   : > { %v6633_v12 = vsub.f32 %v6593_v55, %v2658_v57  ;;  %v2679_v46 = vsel %vm503_vm0, %v2670_v30, 0.0  ;;  %v2682_v56 = vsel %vm503_vm0, %v2671_v37, 0.0  ;;  %v6638_v60 = vsub.f32 %v6600_v15, %v2659_v50  ;;  %v4698_v30 = vld [vmem:[%s7295_s6 + $0x1] ss:$0 sm:$0xff] }
0x11a2   : > { %2680 = vadd.xlane.f32.xlu1 %v2679_v46  ;;  %2683 = vadd.xlane.f32.xlu0 %v2682_v56  ;;  %v2651_v47 = vpop.xlane.xlu0 %2650  ;;  %v2654_v52 = vpop.xlane.xlu1 %2653 }
0x11a3   : > { %v2672_v19 = vmul.f32 %v6633_v12, %v6633_v12  ;;  %v2660_v0 = vmul.f32 0.03125, %v2651_v47  ;;  %v2661_v32 = vmul.f32 0.03125, %v2654_v52  ;;  %v2673_v53 = vmul.f32 %v6638_v60, %v6638_v60 }
0x11a5   : > { %v2685_v45 = vsel %vm503_vm0, %v2672_v19, 0.0  ;;  %v6646_v7 = vsub.f32 %v6610_v21, %v2660_v0  ;;  %v6649_v10 = vsub.f32 %v6605_v23, %v2661_v32  ;;  %v2688_v22 = vsel %vm503_vm0, %v2673_v53, 0.0 }
0x11a6   : > { %2686 = vadd.xlane.f32.xlu1 %v2685_v45  ;;  %2689 = vadd.xlane.f32.xlu0 %v2688_v22 }
0x11a7   : > { %v2674_v6 = vmul.f32 %v6646_v7, %v6646_v7  ;;  %v2675_v43 = vmul.f32 %v6649_v10, %v6649_v10 }
0x11a9   : > { %v2691_v62 = vsel %vm503_vm0, %v2674_v6, 0.0  ;;  %v2694_v40 = vsel %vm503_vm0, %v2675_v43, 0.0 }
0x11aa   : > { %2692 = vadd.xlane.f32.xlu1 %v2691_v62  ;;  %2695 = vadd.xlane.f32.xlu0 %v2694_v40 }
0x1227   : > { %v2678_v25 = vpop.xlane.xlu0 %2677 }
0x1228   : > { %v2697_v48 = vmul.f32 0.03125, %v2678_v25 }
0x122a   : > { %v2704_v3 = vadd.f32 1e-05, %v2697_v48 }
0x122b   : > { %v2684_v9 = vpop.xlane.xlu0 %2683  ;;  %v2681_v1 = vpop.xlane.xlu1 %2680 }
0x122c   : > { %5591 = vrsqrt.f32 %v2704_v3  ;;  %v2699_v11 = vmul.f32 0.03125, %v2684_v9  ;;  %v2698_v49 = vmul.f32 0.03125, %v2681_v1 }
0x122e   : > { %v2706_v39 = vadd.f32 1e-05, %v2699_v11  ;;  %v2705_v13 = vadd.f32 1e-05, %v2698_v49 }
0x122f   : > { %v2687_v33 = vpop.xlane.xlu1 %2686  ;;  %v2690_v34 = vpop.xlane.xlu0 %2689 }
0x1230   : > { %5593 = vrsqrt.f32 %v2706_v39  ;;  %v2700_v5 = vmul.f32 0.03125, %v2687_v33  ;;  %v2701_v14 = vmul.f32 0.03125, %v2690_v34 }
0x1231   : > { %5595 = vrsqrt.f32 %v2705_v13 }
0x1232   : > { %v2707_v18 = vadd.f32 1e-05, %v2700_v5  ;;  %v2708_v36 = vadd.f32 1e-05, %v2701_v14 }
0x1233   : > { %v2696_v44 = vpop.xlane.xlu0 %2695  ;;  %v2693_v17 = vpop.xlane.xlu1 %2692 }
0x1234   : > { %5597 = vrsqrt.f32 %v2707_v18  ;;  %v2703_v51 = vmul.f32 0.03125, %v2696_v44  ;;  %v2702_v42 = vmul.f32 0.03125, %v2693_v17 }
0x1235   : > { %5599 = vrsqrt.f32 %v2708_v36 }
0x1236   : > { %v2710_v2 = vadd.f32 1e-05, %v2703_v51  ;;  %v2709_v27 = vadd.f32 1e-05, %v2702_v42 }
0x1238   : > { %5601 = vrsqrt.f32 %v2710_v2 }
0x1239   : > { %v5592_v20 = vpop.eup %5591  ;;  %5603 = vrsqrt.f32 %v2709_v27 }
0x123a   : > { %v2718_v35 = vmul.f32 %v5592_v20, %v6617_v59 }
0x123c   : > { %v2731_v57 = vmul.f32 %v4697_v16, %v2718_v35 }
0x123d   : > { %v5594_v24 = vpop.eup %5593 }
0x123e   : > { %v5596_v63 = vpop.eup %5595  ;;  %v2720_v28 = vmul.f32 %v5594_v24, %v6625_v58  ;;  %v2744_v56 = vadd.f32 %v4698_v30, %v2731_v57 }
0x123f   : > { %v2719_v54 = vmul.f32 %v5596_v63, %v6622_v41 }
0x1240   : > { %v2733_v50 = vmul.f32 %v4697_v16, %v2720_v28 }
0x1241   : > { %v5598_v37 = vpop.eup %5597  ;;  %v2732_v38 = vmul.f32 %v4697_v16, %v2719_v54 }
0x1242   : > { %v2721_v59 = vmul.f32 %v5598_v37, %v6633_v12  ;;  %v5600_v46 = vpop.eup %5599  ;;  %v2746_v58 = vadd.f32 %v4698_v30, %v2733_v50 }
0x1243   : > { %v2745_v19 = vadd.f32 %v4698_v30, %v2732_v38  ;;  %v2722_v0 = vmul.f32 %v5600_v46, %v6638_v60 }
0x1244   : > { %v2734_v47 = vmul.f32 %v4697_v16, %v2721_v59 }
0x1245   : > { %v2755_v52 = vpack.c.bf16 %v2745_v19, %v2744_v56  ;;  %v5602_v41 = vpop.eup %5601  ;;  %v2735_v43 = vmul.f32 %v4697_v16, %v2722_v0 }
0x1246   : > { %v2747_v32 = vadd.f32 %v4698_v30, %v2734_v47  ;;  %v5604_v45 = vpop.eup %5603  ;;  %v2724_v22 = vmul.f32 %v5602_v41, %v6649_v10 }
0x1247   : > { %5155 = vmatprep.mubr.msk.bf16.mxu0 %vm503_vm0, %v2755_v52  ;;  %v2723_v6 = vmul.f32 %v5604_v45, %v6646_v7  ;;  %v2748_v8 = vadd.f32 %v4698_v30, %v2735_v43 }
0x1248   : > { %v2756_v53 = vpack.c.bf16 %v2747_v32, %v2746_v58  ;;  %v2737_v12 = vmul.f32 %v4697_v16, %v2724_v22 }
0x1249   : > { %v2736_v62 = vmul.f32 %v4697_v16, %v2723_v6 }
0x124a   : > { %5156 = vmatmul.mubr.msk.bf16.vlgmr.msra.gmra.mxu0 %vm503_vm0, %v2756_v53  ;;  %v2750_v40 = vadd.f32 %v4698_v30, %v2737_v12 }
0x124b   : > { %v2749_v29 = vadd.f32 %v4698_v30, %v2736_v62 }
0x124c   : > { %v2758_v25 = vpack.c.bf16 %v2750_v40, %v2750_v40 }
0x124d   : > { %v2757_v60 = vpack.c.bf16 %v2749_v29, %v2748_v8 }
0x124f   : > { %5159 = vmatprep.mubr.msk.bf16.mxu0 %vm503_vm0, %v2757_v60 }
0x1252   : > { %5160 = vmatmul.mubr.msk.bf16.gmra.mxu0 %vm503_vm0, %v2758_v25 }
0x130a   : > { %v5157_v48 = vpop.f32.mrf.mxu0 }
0x130c   : > { %v2817_v3 = vpop.f32.mrf.mxu0 }
0x130e   : > { %v5158_v9 = vpop.f32.mrf.mxu0 }
0x130f   : > { %v6697_v14 = vpack.c.bf16 %v5158_v9, %v5157_v48 }
0x1310   : > { %v2820_v10 = vpop.f32.mrf.mxu0 }
0x1311   : > { %v6681_v1 = vpack.c.bf16 %v2820_v10, %v2817_v3  ;;  %v2855_v36 = vsel %vm923_vm1, %v6697_v14, 0 }
0x1312   : > { %v5161_v7 = vpop.f32.mrf.mxu0 }
0x1313   : > { %v6683_v11 = vpack.c.bf16 %v5161_v7, %v5161_v7  ;;  %5171 = vmatprep.mubr.msk.bf16.mxu0 %vm923_vm1, %v6681_v1  ;;  %v2852_v44 = vsel %vm923_vm1, %v6681_v1, 0 }
0x1314   : > { %v2833_v49 = vpop.f32.mrf.mxu0 }
0x1315   : > { %5347 = vmatprep.subr.msk.bf16.mxu0 %vm923_vm1, %v6683_v11  ;;  %5351 = vmatprep.subr.msk.bf16.mxu1 %vm1108_vm2, %v6683_v11  ;;  %v2861_v39 = vsel %vm923_vm1, %v6683_v11, 0  ;;  %v3034_v13 = vsel %vm1108_vm2, %v6683_v11, 0 }
0x1316   : > { %v5162_v33 = vpop.f32.mrf.mxu0  ;;  %5164 = vmatpush3.bf16.xpose.msra.mxu0 %v2861_v39  ;;  %5180 = vmatpush3.bf16.msra.mxu1 %v3034_v13 }
0x1318   : > { %v2836_v5 = vpop.f32.mrf.mxu0 }
0x1319   : > { %v6695_v34 = vpack.c.bf16 %v2836_v5, %v2833_v49 }
0x131b   : > { %5348 = vmatprep.subr.msk.bf16.mxu0 %vm923_vm1, %v6695_v34  ;;  %5181 = vmatprep.subr.bf16.mxu1 %v6695_v34  ;;  %v2858_v18 = vsel %vm923_vm1, %v6695_v34, 0 }
0x131c   : > { %5182 = vmatpush3.bf16.msra.mxu1 %v6695_v34 }
0x131d   : > { %5183 = vmatprep.subr.bf16.mxu1 %v6697_v14 }
0x131e   : > { %5166 = vmatpush3.bf16.xpose.msra.mxu0 %v2858_v18 }
0x131f   : > { %5349 = vmatprep.subr.msk.bf16.mxu0 %vm923_vm1, %v6697_v14 }
0x1320   : > { %5184 = vmatpush3.bf16.msra.mxu1 %v6697_v14 }
0x1321   : > { %5185 = vmatprep.subr.bf16.mxu1 %v6681_v1 }
0x1324   : > { %5186 = vmatpush3.bf16.msra.mxu1 %v6681_v1 }
0x1326   : > { %5168 = vmatpush3.bf16.xpose.msra.mxu0 %v2855_v36 }
0x1327   : > { %5350 = vmatprep.subr.msk.bf16.mxu0 %vm923_vm1, %v6681_v1 }
0x132e   : > { %5170 = vmatpush3.bf16.xpose.msra.mxu0 %v2852_v44 }
0x1335   : > { %5172 = vmatmul.mubr.msk.bf16.vlgmr.msra.gmra.mxu0 %vm923_vm1, %v6697_v14 }
0x1336   : > { %5175 = vmatprep.mubr.msk.bf16.mxu0 %vm923_vm1, %v6695_v34 }
0x133d   : > { %5176 = vmatmul.mubr.msk.bf16.gmra.mxu0 %vm923_vm1, %v6683_v11 }
0x13f5   : > { %v5173_v17 = vpop.f32.mrf.mxu0 }
0x13f6   : > { %v2929_v51 = vmul.f32 0.5, %v5173_v17 }
0x13f7   : > { %v2897_v42 = vpop.f32.mrf.mxu0 }
0x13f8   : > { %v2936_v2 = vadd.f32 %v2929_v51, %v6068_v4  ;;  %v2927_v27 = vmul.f32 0.5, %v2897_v42 }
0x13f9   : > { %v5174_v20 = vpop.f32.mrf.mxu0 }
0x13fa   : > { %v2934_v35 = vadd.f32 %v2927_v27, %v6068_v4  ;;  %v2947_v16 = vsel %vm1014_vm4, %v2936_v2, -inf  ;;  %v2930_v63 = vmul.f32 0.5, %v5174_v20 }
0x13fb   : > { %2948 = vmax.xlane.f32.xlu1 %v2947_v16  ;;  %v2900_v24 = vpop.f32.mrf.mxu0 }
0x13fc   : > { %v2928_v28 = vmul.f32 0.5, %v2900_v24  ;;  %v2941_v30 = vsel %vm1014_vm4, %v2934_v35, -inf  ;;  %v2937_v38 = vadd.f32 %v2930_v63, %v6068_v4 }
0x13fd   : > { %v5177_v54 = vpop.f32.mrf.mxu0 }
0x13fe   : > { %v2935_v57 = vadd.f32 %v2928_v28, %v6068_v4  ;;  %v2933_v50 = vmul.f32 0.5, %v5177_v54  ;;  %v2950_v58 = vsel %vm1014_vm4, %v2937_v38, -inf }
0x13ff   : > { %2942 = vmax.xlane.f32.xlu1 %v2941_v30  ;;  %v2913_v37 = vpop.f32.mrf.mxu0 }
0x1400   : > { %v2931_v59 = vmul.f32 0.5, %v2913_v37  ;;  %v2944_v46 = vsel %vm1014_vm4, %v2935_v57, -inf  ;;  %v2940_v52 = vadd.f32 %v2933_v50, %v6068_v4 }
0x1401   : > { %2945 = vmax.xlane.f32.xlu0 %v2944_v46  ;;  %v5178_v56 = vpop.f32.mrf.mxu0 }
0x1402   : > { %v2938_v19 = vadd.f32 %v2931_v59, %v6068_v4  ;;  %v2959_v45 = vsel %vm1014_vm4, %v2940_v52, -inf }
0x1403   : > { %v2916_v47 = vpop.f32.mrf.mxu0 }
0x1404   : > { %v2932_v0 = vmul.f32 0.5, %v2916_v47  ;;  %v2953_v32 = vsel %vm1014_vm4, %v2938_v19, -inf }
0x1405   : > { %2951 = vmax.xlane.f32.xlu0 %v2950_v58  ;;  %2954 = vmax.xlane.f32.xlu1 %v2953_v32 }
0x1406   : > { %v2939_v41 = vadd.f32 %v2932_v0, %v6068_v4 }
0x1408   : > { %v2956_v53 = vsel %vm1014_vm4, %v2939_v41, -inf }
0x1409   : > { %2960 = vmax.xlane.f32.xlu1 %v2959_v45  ;;  %2957 = vmax.xlane.f32.xlu0 %v2956_v53 }
0x141a   : > { %3110 = vrot.lane.b32.xlu1 %v6683_v11, %s5768_s24 }
0x1484   : > { %v2949_v22 = vpop.xlane.xlu1 %2948 }
0x1485   : > { %v2964_v6 = vsub.f32 %v2936_v2, %v2949_v22 }
0x1487   : > { %v2973_v43 = vmul.f32 1.442695, %v2964_v6 }
0x1488   : > { %v2943_v12 = vpop.xlane.xlu1 %2942 }
0x1489   : > { %5605 = vpow2.f32 %v2973_v43  ;;  %v2962_v62 = vsub.f32 %v2934_v35, %v2943_v12 }
0x148a   : > { %v2946_v40 = vpop.xlane.xlu0 %2945 }
0x148b   : > { %v2969_v8 = vmul.f32 1.442695, %v2962_v62  ;;  %v2963_v29 = vsub.f32 %v2935_v57, %v2946_v40 }
0x148d   : > { %5607 = vpow2.f32 %v2969_v8  ;;  %v2971_v3 = vmul.f32 1.442695, %v2963_v29 }
0x148e   : > { %v2952_v60 = vpop.xlane.xlu0 %2951  ;;  %v2955_v25 = vpop.xlane.xlu1 %2954 }
0x148f   : > { %v2965_v48 = vsub.f32 %v2937_v38, %v2952_v60  ;;  %v2966_v10 = vsub.f32 %v2938_v19, %v2955_v25 }
0x1491   : > { %v2975_v9 = vmul.f32 1.442695, %v2965_v48  ;;  %v2977_v39 = vmul.f32 1.442695, %v2966_v10 }
0x1492   : > { %v2961_v7 = vpop.xlane.xlu1 %2960  ;;  %v2958_v63 = vpop.xlane.xlu0 %2957 }
0x1493   : > { %5609 = vpow2.f32 %v2975_v9  ;;  %v2968_v49 = vsub.f32 %v2940_v52, %v2961_v7  ;;  %v2967_v28 = vsub.f32 %v2939_v41, %v2958_v63 }
0x1494   : > { %5611 = vpow2.f32 %v2971_v3 }
0x1495   : > { %v2981_v13 = vmul.f32 1.442695, %v2968_v49  ;;  %v2979_v54 = vmul.f32 1.442695, %v2967_v28 }
0x1496   : > { %v5606_v33 = vpop.eup %5605  ;;  %v6739_v5 = vpop.permute.xlu1 %3110 }
0x1497   : > { %5613 = vpow2.f32 %v2981_v13  ;;  %5352 = vmatprep.subr.msk.bf16.mxu1 %vm923_vm1, %v6739_v5  ;;  %5356 = vmatprep.subr.msk.bf16.mxu0 %vm1108_vm2, %v6739_v5  ;;  %v3298_v18 = vsel %vm1108_vm2, %v6739_v5, 0  ;;  %v2989_v36 = vsel %vm1014_vm4, %v5606_v33, 0.0  ;;  %v3122_v12 = vsel %vm923_vm1, %v6739_v5, 0 }
0x1498   : > { %5212 = vmatpush3.bf16.msra.mxu0 %v3298_v18  ;;  %2990 = vadd.xlane.f32.xlu0 %v2989_v36  ;;  %5615 = vpow2.f32 %v2977_v39 }
0x1499   : > { %5617 = vpow2.f32 %v2979_v54 }
0x149a   : > { %v5608_v44 = vpop.eup %5607 }
0x149b   : > { %v2983_v17 = vsel %vm1014_vm4, %v5608_v44, 0.0 }
0x149c   : > { %2984 = vadd.xlane.f32.xlu0 %v2983_v17 }
0x14a0   : > { %v5610_v51 = vpop.eup %5609 }
0x14a1   : > { %v2992_v42 = vsel %vm1014_vm4, %v5610_v51, 0.0  ;;  %v5612_v2 = vpop.eup %5611 }
0x14a2   : > { %2993 = vadd.xlane.f32.xlu1 %v2992_v42  ;;  %v2986_v20 = vsel %vm1014_vm4, %v5612_v2, 0.0 }
0x14a4   : > { %v6750_v27 = vpop.eup %5613 }
0x14a5   : > { %v3001_v35 = vsel %vm1014_vm4, %v6750_v27, 0.0  ;;  %v6755_v16 = vpop.eup %5615 }
0x14a6   : > { %2987 = vadd.xlane.f32.xlu1 %v2986_v20  ;;  %3002 = vadd.xlane.f32.xlu0 %v3001_v35  ;;  %v2995_v24 = vsel %vm1014_vm4, %v6755_v16, 0.0  ;;  %v5618_v57 = vpop.eup %5617 }
0x14a7   : > { %v2998_v30 = vsel %vm1014_vm4, %v5618_v57, 0.0 }
0x14aa   : > { %2996 = vadd.xlane.f32.xlu0 %v2995_v24 }
0x14b7   : > { %3106 = vrot.lane.b32.xlu1 %v6697_v14, %s5768_s24 }
0x14c0   : > { %3108 = vrot.lane.b32.xlu0 %v6695_v34, %s5768_s24 }
0x14db   : > { %2999 = vadd.xlane.f32.xlu1 %v2998_v30 }
0x14ec   : > { %3104 = vrot.lane.b32.xlu1 %v6681_v1, %s5768_s24  ;;  %s7305_s24 = smul.u32 56, %s7307_s30 }
0x1521   : > { %v2991_v37 = vpop.xlane.xlu0 %2990 }
0x1525   : > { %v2985_v38 = vpop.xlane.xlu0 %2984 }
0x152b   : > { %v2994_v50 = vpop.xlane.xlu1 %2993 }
0x152c   : > { %5619 = vrcp.f32 %v2994_v50 }
0x152d   : > { %5621 = vrcp.f32 %v2985_v38 }
0x152e   : > { %5623 = vrcp.f32 %v2991_v37 }
0x152f   : > { %v2988_v59 = vpop.xlane.xlu1 %2987  ;;  %v3003_v46 = vpop.xlane.xlu0 %3002 }
0x1530   : > { %5625 = vrcp.f32 %v2988_v59 }
0x1531   : > { %5627 = vrcp.f32 %v3003_v46 }
0x1533   : > { %v2997_v56 = vpop.xlane.xlu0 %2996  ;;  %v3107_v47 = vpop.permute.xlu1 %3106 }
0x1534   : > { %v3116_v40 = vsel %vm923_vm1, %v3107_v47, 0  ;;  %5629 = vrcp.f32 %v2997_v56 }
0x1537   : > { %v3109_v19 = vpop.permute.xlu0 %3108 }
0x1538   : > { %5213 = vmatprep.subr.bf16.mxu0 %v3109_v19  ;;  %v3119_v62 = vsel %vm923_vm1, %v3109_v19, 0 }
0x1539   : > { %5214 = vmatpush3.bf16.msra.mxu0 %v3109_v19  ;;  %v5620_v52 = vpop.eup %5619 }
0x153a   : > { %5215 = vmatprep.subr.bf16.mxu0 %v3107_v47  ;;  %v5622_v0 = vpop.eup %5621  ;;  %v3014_v41 = vmul.f32 %v5620_v52, %v5610_v51 }
0x153b   : > { %v5624_v58 = vpop.eup %5623  ;;  %v3011_v45 = vmul.f32 %v5622_v0, %v5608_v44 }
0x153c   : > { %v3013_v22 = vmul.f32 %v5624_v58, %v5606_v33 }
0x153d   : > { %v5626_v32 = vpop.eup %5625  ;;  %5216 = vmatpush3.bf16.msra.mxu0 %v3107_v47 }
0x153e   : > { %v3012_v53 = vmul.f32 %v5626_v32, %v5612_v2  ;;  %v3019_v43 = vpack.c.bf16 %v3014_v41, %v3013_v22  ;;  %v5628_v25 = vpop.eup %5627 }
0x153f   : > { %v3017_v9 = vmul.f32 %v5628_v25, %v6750_v27 }
0x1540   : > { %v3018_v6 = vpack.c.bf16 %v3012_v53, %v3011_v45 }
0x1541   : > { %v5630_v48 = vpop.eup %5629  ;;  %v3021_v39 = vpack.c.bf16 %v3017_v9, %v3017_v9 }
0x1542   : > { %5187 = vmatprep.mubr.msk.bf16.mxu1 %vm1014_vm4, %v3018_v6  ;;  %v3015_v10 = vmul.f32 %v5630_v48, %v6755_v16 }
0x1543   : > { %5188 = vmatmul.mubr.msk.bf16.vlgmr.msra.gmra.mxu1 %vm1014_vm4, %v3019_v43 }
0x1544   : > { %5196 = vmatpush3.bf16.xpose.msra.mxu1 %v3122_v12 }
0x1545   : > { %5353 = vmatprep.subr.msk.bf16.mxu1 %vm923_vm1, %v3109_v19 }
0x154c   : > { %5198 = vmatpush3.bf16.xpose.msra.mxu1 %v3119_v62 }
0x154d   : > { %5354 = vmatprep.subr.msk.bf16.mxu1 %vm923_vm1, %v3107_v47 }
0x1554   : > { %5200 = vmatpush3.bf16.xpose.msra.mxu1 %v3116_v40 }
0x1564   : > { %v3000_v8 = vpop.xlane.xlu1 %2999 }
0x1565   : > { %5631 = vrcp.f32 %v3000_v8 }
0x1568   : > { %v3105_v29 = vpop.permute.xlu1 %3104 }
0x1569   : > { %5355 = vmatprep.subr.msk.bf16.mxu1 %vm923_vm1, %v3105_v29  ;;  %5217 = vmatprep.subr.bf16.mxu0 %v3105_v29  ;;  %v3113_v60 = vsel %vm923_vm1, %v3105_v29, 0 }
0x156a   : > { %5202 = vmatpush3.bf16.xpose.msra.mxu1 %v3113_v60  ;;  %5218 = vmatpush3.bf16.msra.mxu0 %v3105_v29 }
0x1572   : > { %v5632_v3 = vpop.eup %5631 }
0x1573   : > { %v3016_v7 = vmul.f32 %v5632_v3, %v5618_v57 }
0x1575   : > { %v3020_v49 = vpack.c.bf16 %v3016_v7, %v3015_v10 }
0x1577   : > { %5191 = vmatprep.mubr.msk.bf16.mxu1 %vm1014_vm4, %v3020_v49 }
0x1578   : > { %5192 = vmatmul.mubr.msk.bf16.gmra.mxu1 %vm1014_vm4, %v3021_v39 }
0x1579   : > { %5203 = vmatprep.mubr.msk.bf16.mxu1 %vm923_vm1, %v3105_v29 }
0x1580   : > { %5204 = vmatmul.mubr.msk.bf16.vlgmr.msra.gmra.mxu1 %vm923_vm1, %v3107_v47 }
0x1581   : > { %5207 = vmatprep.mubr.msk.bf16.mxu1 %vm923_vm1, %v3109_v19 }
0x1588   : > { %5208 = vmatmul.mubr.msk.bf16.gmra.mxu1 %vm923_vm1, %v6739_v5 }
0x1603   : > { %v6785_v13 = vpop.f32.mrf.mxu1 }
0x1605   : > { %v6787_v33 = vpop.f32.mrf.mxu1 }
0x1607   : > { %v6789_v18 = vpop.f32.mrf.mxu1 }
0x1609   : > { %v6791_v36 = vpop.f32.mrf.mxu1 }
0x1638   : > { %v6793_v44 = vpop.f32.mrf.mxu1 }
0x163a   : > { %v6795_v17 = vpop.f32.mrf.mxu1 }
0x163c   : > { %v5194_v51 = vpop.f32.mrf.mxu1 }
0x163e   : > { %v6797_v42 = vpop.f32.mrf.mxu1 }
0x1640   : > { %v5205_v2 = vpop.f32.mrf.mxu1 }
0x1641   : > { %v3190_v27 = vmul.f32 0.5, %v5205_v2 }
0x1642   : > { %v3158_v20 = vpop.f32.mrf.mxu1 }
0x1643   : > { %v3197_v5 = vadd.f32 %v3190_v27, %v6068_v4  ;;  %v3188_v35 = vmul.f32 0.5, %v3158_v20 }
0x1644   : > { %v5206_v16 = vpop.f32.mrf.mxu1 }
0x1645   : > { %v3195_v24 = vadd.f32 %v3188_v35, %v6068_v4  ;;  %v3208_v63 = vsel %vm1014_vm4, %v3197_v5, -inf  ;;  %v3191_v54 = vmul.f32 0.5, %v5206_v16 }
0x1646   : > { %3209 = vmax.xlane.f32.xlu0 %v3208_v63  ;;  %v3161_v28 = vpop.f32.mrf.mxu1 }
0x1647   : > { %v3189_v57 = vmul.f32 0.5, %v3161_v28  ;;  %v3202_v30 = vsel %vm1014_vm4, %v3195_v24, -inf  ;;  %v3198_v59 = vadd.f32 %v3191_v54, %v6068_v4 }
0x1648   : > { %3203 = vmax.xlane.f32.xlu1 %v3202_v30  ;;  %v5209_v37 = vpop.f32.mrf.mxu1 }
0x1649   : > { %v3196_v38 = vadd.f32 %v3189_v57, %v6068_v4  ;;  %v3194_v46 = vmul.f32 0.5, %v5209_v37  ;;  %v3211_v41 = vsel %vm1014_vm4, %v3198_v59, -inf }
0x164a   : > { %v3174_v50 = vpop.f32.mrf.mxu1 }
0x164b   : > { %v3192_v56 = vmul.f32 0.5, %v3174_v50  ;;  %v3205_v19 = vsel %vm1014_vm4, %v3196_v38, -inf  ;;  %v3201_v58 = vadd.f32 %v3194_v46, %v6068_v4 }
0x164c   : > { %3206 = vmax.xlane.f32.xlu0 %v3205_v19  ;;  %v5210_v47 = vpop.f32.mrf.mxu1 }
0x164d   : > { %v3199_v52 = vadd.f32 %v3192_v56, %v6068_v4  ;;  %v3220_v22 = vsel %vm1014_vm4, %v3201_v58, -inf }
0x164e   : > { %v3177_v0 = vpop.f32.mrf.mxu1 }
0x164f   : > { %v3193_v32 = vmul.f32 0.5, %v3177_v0  ;;  %v3214_v45 = vsel %vm1014_vm4, %v3199_v52, -inf }
0x1650   : > { %3212 = vmax.xlane.f32.xlu0 %v3211_v41  ;;  %3215 = vmax.xlane.f32.xlu1 %v3214_v45 }
0x1651   : > { %v3200_v53 = vadd.f32 %v3193_v32, %v6068_v4 }
0x1653   : > { %v3217_v6 = vsel %vm1014_vm4, %v3200_v53, -inf }
0x1654   : > { %3221 = vmax.xlane.f32.xlu1 %v3220_v22  ;;  %3218 = vmax.xlane.f32.xlu0 %v3217_v6 }
0x1665   : > { %3370 = vrot.lane.b32.xlu1 %v6683_v11, %s5769_s25 }
0x16cf   : > { %v3210_v43 = vpop.xlane.xlu0 %3209 }
0x16d0   : > { %v3225_v12 = vsub.f32 %v3197_v5, %v3210_v43 }
0x16d1   : > { %v3204_v62 = vpop.xlane.xlu1 %3203 }
0x16d2   : > { %v3234_v40 = vmul.f32 1.442695, %v3225_v12  ;;  %v3223_v8 = vsub.f32 %v3195_v24, %v3204_v62 }
0x16d4   : > { %5633 = vpow2.f32 %v3234_v40  ;;  %v3230_v29 = vmul.f32 1.442695, %v3223_v8 }
0x16d5   : > { %v3207_v60 = vpop.xlane.xlu0 %3206 }
0x16d6   : > { %5635 = vpow2.f32 %v3230_v29  ;;  %v3224_v25 = vsub.f32 %v3196_v38, %v3207_v60 }
0x16d8   : > { %v3232_v10 = vmul.f32 1.442695, %v3224_v25 }
0x16d9   : > { %v3213_v48 = vpop.xlane.xlu0 %3212  ;;  %v3216_v3 = vpop.xlane.xlu1 %3215 }
0x16da   : > { %v3226_v9 = vsub.f32 %v3198_v59, %v3213_v48  ;;  %v3227_v49 = vsub.f32 %v3199_v52, %v3216_v3 }
0x16dc   : > { %v3236_v7 = vmul.f32 1.442695, %v3226_v9  ;;  %v3238_v2 = vmul.f32 1.442695, %v3227_v49 }
0x16dd   : > { %v3222_v39 = vpop.xlane.xlu1 %3221  ;;  %v3219_v46 = vpop.xlane.xlu0 %3218 }
0x16de   : > { %5637 = vpow2.f32 %v3236_v7  ;;  %v3229_v51 = vsub.f32 %v3201_v58, %v3222_v39  ;;  %v3228_v56 = vsub.f32 %v3200_v53, %v3219_v46 }
0x16df   : > { %5639 = vpow2.f32 %v3232_v10 }
0x16e0   : > { %v3242_v27 = vmul.f32 1.442695, %v3229_v51  ;;  %v3240_v19 = vmul.f32 1.442695, %v3228_v56 }
0x16e1   : > { %v5634_v20 = vpop.eup %5633  ;;  %v6815_v5 = vpop.permute.xlu1 %3370 }
0x16e2   : > { %5641 = vpow2.f32 %v3242_v27  ;;  %5357 = vmatprep.subr.msk.bf16.mxu0 %vm923_vm1, %v6815_v5  ;;  %5361 = vmatprep.subr.msk.bf16.mxu1 %vm1108_vm2, %v6815_v5  ;;  %v3558_v35 = vsel %vm1108_vm2, %v6815_v5, 0  ;;  %v3250_v16 = vsel %vm1014_vm4, %v5634_v20, 0.0  ;;  %v3382_v9 = vsel %vm923_vm1, %v6815_v5, 0 }
0x16e3   : > { %v5636_v24 = vpop.eup %5635  ;;  %5244 = vmatpush3.bf16.msra.mxu1 %v3558_v35  ;;  %3251 = vadd.xlane.f32.xlu0 %v3250_v16  ;;  %5643 = vpow2.f32 %v3238_v2 }
0x16e4   : > { %v3244_v63 = vsel %vm1014_vm4, %v5636_v24, 0.0  ;;  %5645 = vpow2.f32 %v3240_v19 }
0x16e7   : > { %3245 = vadd.xlane.f32.xlu0 %v3244_v63 }
0x16eb   : > { %v5638_v28 = vpop.eup %5637 }
0x16ec   : > { %v3253_v54 = vsel %vm1014_vm4, %v5638_v28, 0.0  ;;  %v5640_v57 = vpop.eup %5639 }
0x16ed   : > { %3254 = vadd.xlane.f32.xlu1 %v3253_v54  ;;  %v3247_v37 = vsel %vm1014_vm4, %v5640_v57, 0.0 }
0x16ef   : > { %v6826_v30 = vpop.eup %5641 }
0x16f0   : > { %v3262_v38 = vsel %vm1014_vm4, %v6826_v30, 0.0  ;;  %v6831_v50 = vpop.eup %5643 }
0x16f1   : > { %3248 = vadd.xlane.f32.xlu1 %v3247_v37  ;;  %3263 = vadd.xlane.f32.xlu0 %v3262_v38  ;;  %v3256_v59 = vsel %vm1014_vm4, %v6831_v50, 0.0  ;;  %v5646_v47 = vpop.eup %5645 }
0x16f2   : > { %v3259_v52 = vsel %vm1014_vm4, %v5646_v47, 0.0 }
0x16f5   : > { %3257 = vadd.xlane.f32.xlu0 %v3256_v59 }
0x1702   : > { %3366 = vrot.lane.b32.xlu1 %v6697_v14, %s5769_s25 }
0x170b   : > { %3368 = vrot.lane.b32.xlu0 %v6695_v34, %s5769_s25 }
0x1726   : > { %3260 = vadd.xlane.f32.xlu1 %v3259_v52 }
0x1737   : > { %3364 = vrot.lane.b32.xlu1 %v6681_v1, %s5769_s25 }
0x176c   : > { %v3252_v0 = vpop.xlane.xlu0 %3251 }
0x1770   : > { %v3246_v58 = vpop.xlane.xlu0 %3245 }
0x1776   : > { %v3255_v32 = vpop.xlane.xlu1 %3254 }
0x1777   : > { %5647 = vrcp.f32 %v3255_v32 }
0x1778   : > { %5649 = vrcp.f32 %v3246_v58 }
0x1779   : > { %5651 = vrcp.f32 %v3252_v0 }
0x177a   : > { %v3249_v41 = vpop.xlane.xlu1 %3248  ;;  %v3264_v45 = vpop.xlane.xlu0 %3263 }
0x177b   : > { %5653 = vrcp.f32 %v3249_v41 }
0x177c   : > { %5655 = vrcp.f32 %v3264_v45 }
0x177e   : > { %v3258_v22 = vpop.xlane.xlu0 %3257  ;;  %v3367_v6 = vpop.permute.xlu1 %3366 }
0x177f   : > { %v3376_v7 = vsel %vm923_vm1, %v3367_v6, 0  ;;  %5657 = vrcp.f32 %v3258_v22 }
0x1782   : > { %v3369_v53 = vpop.permute.xlu0 %3368 }
0x1783   : > { %5245 = vmatprep.subr.bf16.mxu1 %v3369_v53  ;;  %v3379_v10 = vsel %vm923_vm1, %v3369_v53, 0 }
0x1784   : > { %5246 = vmatpush3.bf16.msra.mxu1 %v3369_v53  ;;  %v5648_v43 = vpop.eup %5647 }
0x1785   : > { %5247 = vmatprep.subr.bf16.mxu1 %v3367_v6  ;;  %v5650_v12 = vpop.eup %5649  ;;  %v3275_v8 = vmul.f32 %v5648_v43, %v5638_v28 }
0x1786   : > { %v5652_v62 = vpop.eup %5651  ;;  %v3272_v29 = vmul.f32 %v5650_v12, %v5636_v24 }
0x1787   : > { %v3274_v25 = vmul.f32 %v5652_v62, %v5634_v20 }
0x1788   : > { %v5654_v40 = vpop.eup %5653  ;;  %5248 = vmatpush3.bf16.msra.mxu1 %v3367_v6 }
0x1789   : > { %v3273_v60 = vmul.f32 %v5654_v40, %v5640_v57  ;;  %v3280_v3 = vpack.c.bf16 %v3275_v8, %v3274_v25  ;;  %v5656_v2 = vpop.eup %5655 }
0x178a   : > { %v3278_v35 = vmul.f32 %v5656_v2, %v6826_v30 }
0x178b   : > { %v3279_v48 = vpack.c.bf16 %v3273_v60, %v3272_v29 }
0x178c   : > { %v5658_v27 = vpop.eup %5657  ;;  %v3282_v28 = vpack.c.bf16 %v3278_v35, %v3278_v35 }
0x178d   : > { %5219 = vmatprep.mubr.msk.bf16.mxu0 %vm1014_vm4, %v3279_v48  ;;  %v3276_v16 = vmul.f32 %v5658_v27, %v6831_v50 }
0x178e   : > { %5220 = vmatmul.mubr.msk.bf16.vlgmr.msra.gmra.mxu0 %vm1014_vm4, %v3280_v3 }
0x178f   : > { %5228 = vmatpush3.bf16.xpose.msra.mxu0 %v3382_v9 }
0x1790   : > { %5358 = vmatprep.subr.msk.bf16.mxu0 %vm923_vm1, %v3369_v53 }
0x1797   : > { %5230 = vmatpush3.bf16.xpose.msra.mxu0 %v3379_v10 }
0x1798   : > { %5359 = vmatprep.subr.msk.bf16.mxu0 %vm923_vm1, %v3367_v6 }
0x179f   : > { %5232 = vmatpush3.bf16.xpose.msra.mxu0 %v3376_v7 }
0x17af   : > { %v3261_v49 = vpop.xlane.xlu1 %3260 }
0x17b0   : > { %5659 = vrcp.f32 %v3261_v49 }
0x17b3   : > { %v3365_v39 = vpop.permute.xlu1 %3364 }
0x17b4   : > { %5360 = vmatprep.subr.msk.bf16.mxu0 %vm923_vm1, %v3365_v39  ;;  %5249 = vmatprep.subr.bf16.mxu1 %v3365_v39  ;;  %v3373_v51 = vsel %vm923_vm1, %v3365_v39, 0 }
0x17b5   : > { %5234 = vmatpush3.bf16.xpose.msra.mxu0 %v3373_v51  ;;  %5250 = vmatpush3.bf16.msra.mxu1 %v3365_v39 }
0x17bd   : > { %v5660_v20 = vpop.eup %5659 }
0x17be   : > { %v3277_v24 = vmul.f32 %v5660_v20, %v5646_v47 }
0x17c0   : > { %v3281_v63 = vpack.c.bf16 %v3277_v24, %v3276_v16 }
0x17c2   : > { %5223 = vmatprep.mubr.msk.bf16.mxu0 %vm1014_vm4, %v3281_v63 }
0x17c3   : > { %5224 = vmatmul.mubr.msk.bf16.gmra.mxu0 %vm1014_vm4, %v3282_v28 }
0x17c4   : > { %5235 = vmatprep.mubr.msk.bf16.mxu0 %vm923_vm1, %v3365_v39 }
0x17cb   : > { %5236 = vmatmul.mubr.msk.bf16.vlgmr.msra.gmra.mxu0 %vm923_vm1, %v3367_v6 }
0x17cc   : > { %5239 = vmatprep.mubr.msk.bf16.mxu0 %vm923_vm1, %v3369_v53 }
0x17d3   : > { %5240 = vmatmul.mubr.msk.bf16.gmra.mxu0 %vm923_vm1, %v6815_v5 }
0x184e   : > { %v6861_v54 = vpop.f32.mrf.mxu0 }
0x1850   : > { %v6863_v57 = vpop.f32.mrf.mxu0 }
0x1852   : > { %v6865_v30 = vpop.f32.mrf.mxu0 }
0x1854   : > { %v6867_v37 = vpop.f32.mrf.mxu0 }
0x1883   : > { %v6869_v38 = vpop.f32.mrf.mxu0 }
0x1885   : > { %v6871_v50 = vpop.f32.mrf.mxu0 }
0x1887   : > { %v5226_v59 = vpop.f32.mrf.mxu0 }
0x1889   : > { %v6873_v46 = vpop.f32.mrf.mxu0 }
0x188b   : > { %v5237_v56 = vpop.f32.mrf.mxu0 }
0x188c   : > { %v3450_v19 = vmul.f32 0.5, %v5237_v56 }
0x188d   : > { %v3418_v47 = vpop.f32.mrf.mxu0 }
0x188e   : > { %v3457_v5 = vadd.f32 %v3450_v19, %v6068_v4  ;;  %v3448_v52 = vmul.f32 0.5, %v3418_v47 }
0x188f   : > { %v5238_v0 = vpop.f32.mrf.mxu0 }
0x1890   : > { %v3455_v58 = vadd.f32 %v3448_v52, %v6068_v4  ;;  %v3468_v32 = vsel %vm1014_vm4, %v3457_v5, -inf  ;;  %v3451_v45 = vmul.f32 0.5, %v5238_v0 }
0x1891   : > { %3469 = vmax.xlane.f32.xlu0 %v3468_v32  ;;  %v3421_v41 = vpop.f32.mrf.mxu0 }
0x1892   : > { %v3449_v22 = vmul.f32 0.5, %v3421_v41  ;;  %v3462_v53 = vsel %vm1014_vm4, %v3455_v58, -inf  ;;  %v3458_v62 = vadd.f32 %v3451_v45, %v6068_v4 }
0x1893   : > { %3463 = vmax.xlane.f32.xlu1 %v3462_v53  ;;  %v5241_v6 = vpop.f32.mrf.mxu0 }
0x1894   : > { %v3456_v43 = vadd.f32 %v3449_v22, %v6068_v4  ;;  %v3454_v40 = vmul.f32 0.5, %v5241_v6  ;;  %v3471_v10 = vsel %vm1014_vm4, %v3458_v62, -inf }
0x1895   : > { %v3434_v12 = vpop.f32.mrf.mxu0 }
0x1896   : > { %v3452_v8 = vmul.f32 0.5, %v3434_v12  ;;  %v3465_v29 = vsel %vm1014_vm4, %v3456_v43, -inf  ;;  %v3461_v3 = vadd.f32 %v3454_v40, %v6068_v4 }
0x1897   : > { %3466 = vmax.xlane.f32.xlu0 %v3465_v29  ;;  %v5242_v60 = vpop.f32.mrf.mxu0 }
0x1898   : > { %v3459_v25 = vadd.f32 %v3452_v8, %v6068_v4  ;;  %v3480_v39 = vsel %vm1014_vm4, %v3461_v3, -inf }
0x1899   : > { %v3437_v48 = vpop.f32.mrf.mxu0 }
0x189a   : > { %v3453_v9 = vmul.f32 0.5, %v3437_v48  ;;  %v3474_v7 = vsel %vm1014_vm4, %v3459_v25, -inf }
0x189b   : > { %3472 = vmax.xlane.f32.xlu0 %v3471_v10  ;;  %3475 = vmax.xlane.f32.xlu1 %v3474_v7 }
0x189c   : > { %v3460_v49 = vadd.f32 %v3453_v9, %v6068_v4 }
0x189e   : > { %v3477_v51 = vsel %vm1014_vm4, %v3460_v49, -inf }
0x189f   : > { %3481 = vmax.xlane.f32.xlu1 %v3480_v39  ;;  %3478 = vmax.xlane.f32.xlu0 %v3477_v51 }
0x18b0   : > { %3630 = vrot.lane.b32.xlu1 %v6683_v11, %s5770_s26 }
0x191a   : > { %v3470_v2 = vpop.xlane.xlu0 %3469 }
0x191b   : > { %v3485_v27 = vsub.f32 %v3457_v5, %v3470_v2 }
0x191c   : > { %v3464_v20 = vpop.xlane.xlu1 %3463 }
0x191d   : > { %v3494_v35 = vmul.f32 1.442695, %v3485_v27  ;;  %v3483_v16 = vsub.f32 %v3455_v58, %v3464_v20 }
0x191f   : > { %5661 = vpow2.f32 %v3494_v35  ;;  %v3490_v24 = vmul.f32 1.442695, %v3483_v16 }
0x1920   : > { %v3467_v63 = vpop.xlane.xlu0 %3466 }
0x1921   : > { %5663 = vpow2.f32 %v3490_v24  ;;  %v3484_v28 = vsub.f32 %v3456_v43, %v3467_v63 }
0x1923   : > { %v3492_v47 = vmul.f32 1.442695, %v3484_v28 }
0x1924   : > { %v3473_v59 = vpop.xlane.xlu0 %3472  ;;  %v3476_v56 = vpop.xlane.xlu1 %3475 }
0x1925   : > { %v3486_v19 = vsub.f32 %v3458_v62, %v3473_v59  ;;  %v3487_v0 = vsub.f32 %v3459_v25, %v3476_v56 }
0x1927   : > { %v3496_v52 = vmul.f32 1.442695, %v3486_v19  ;;  %v3498_v11 = vmul.f32 1.442695, %v3487_v0 }
0x1928   : > { %v3482_v32 = vpop.xlane.xlu1 %3481 }
0x1929   : > { %5665 = vpow2.f32 %v3496_v52  ;;  %v3489_v41 = vsub.f32 %v3461_v3, %v3482_v32  ;;  %v3479_v3 = vpop.xlane.xlu0 %3478 }
0x192a   : > { %5667 = vpow2.f32 %v3492_v47  ;;  %v3488_v9 = vsub.f32 %v3460_v49, %v3479_v3 }
0x192b   : > { %v3502_v5 = vmul.f32 1.442695, %v3489_v41 }
0x192c   : > { %v5662_v45 = vpop.eup %5661  ;;  %v6891_v22 = vpop.permute.xlu1 %3630  ;;  %v3500_v10 = vmul.f32 1.442695, %v3488_v9 }
0x192d   : > { %5669 = vpow2.f32 %v3502_v5  ;;  %5362 = vmatprep.subr.msk.bf16.mxu1 %vm923_vm1, %v6891_v22  ;;  %5366 = vmatprep.subr.msk.bf16.mxu0 %vm1108_vm2, %v6891_v22  ;;  %v3818_v58 = vsel %vm1108_vm2, %v6891_v22, 0  ;;  %v3510_v53 = vsel %vm1014_vm4, %v5662_v45, 0.0  ;;  %v3642_v0 = vsel %vm923_vm1, %v6891_v22, 0 }
0x192e   : > { %v5664_v6 = vpop.eup %5663  ;;  %5276 = vmatpush3.bf16.msra.mxu0 %v3818_v58  ;;  %3511 = vadd.xlane.f32.xlu0 %v3510_v53  ;;  %5671 = vpow2.f32 %v3498_v11 }
0x192f   : > { %v3504_v43 = vsel %vm1014_vm4, %v5664_v6, 0.0  ;;  %5673 = vpow2.f32 %v3500_v10 }
0x1932   : > { %3505 = vadd.xlane.f32.xlu0 %v3504_v43 }
0x1936   : > { %v5666_v12 = vpop.eup %5665 }
0x1937   : > { %v3513_v62 = vsel %vm1014_vm4, %v5666_v12, 0.0  ;;  %v5668_v40 = vpop.eup %5667 }
0x1938   : > { %3514 = vadd.xlane.f32.xlu1 %v3513_v62  ;;  %v3507_v29 = vsel %vm1014_vm4, %v5668_v40, 0.0 }
0x193a   : > { %v6902_v8 = vpop.eup %5669 }
0x193b   : > { %v3522_v60 = vsel %vm1014_vm4, %v6902_v8, 0.0  ;;  %v6907_v25 = vpop.eup %5671 }
0x193c   : > { %3508 = vadd.xlane.f32.xlu1 %v3507_v29  ;;  %3523 = vadd.xlane.f32.xlu0 %v3522_v60  ;;  %v3516_v48 = vsel %vm1014_vm4, %v6907_v25, 0.0  ;;  %v5674_v7 = vpop.eup %5673 }
0x193d   : > { %v3519_v39 = vsel %vm1014_vm4, %v5674_v7, 0.0 }
0x1940   : > { %3517 = vadd.xlane.f32.xlu0 %v3516_v48 }
0x194d   : > { %3626 = vrot.lane.b32.xlu1 %v6697_v14, %s5770_s26 }
0x1956   : > { %3628 = vrot.lane.b32.xlu0 %v6695_v34, %s5770_s26 }
0x1971   : > { %3520 = vadd.xlane.f32.xlu1 %v3519_v39 }
0x1982   : > { %3624 = vrot.lane.b32.xlu1 %v6681_v1, %s5770_s26 }
0x19b7   : > { %v3512_v51 = vpop.xlane.xlu0 %3511 }
0x19bb   : > { %v3506_v2 = vpop.xlane.xlu0 %3505 }
0x19c1   : > { %v3515_v27 = vpop.xlane.xlu1 %3514 }
0x19c2   : > { %5675 = vrcp.f32 %v3515_v27 }
0x19c3   : > { %5677 = vrcp.f32 %v3506_v2 }
0x19c4   : > { %5679 = vrcp.f32 %v3512_v51 }
0x19c5   : > { %v3509_v14 = vpop.xlane.xlu1 %3508  ;;  %v3524_v20 = vpop.xlane.xlu0 %3523 }
0x19c6   : > { %5681 = vrcp.f32 %v3509_v14 }
0x19c7   : > { %5683 = vrcp.f32 %v3524_v20 }
0x19c9   : > { %v3518_v34 = vpop.xlane.xlu0 %3517  ;;  %v3627_v35 = vpop.permute.xlu1 %3626 }
0x19ca   : > { %v3636_v41 = vsel %vm923_vm1, %v3627_v35, 0  ;;  %5685 = vrcp.f32 %v3518_v34 }
0x19cd   : > { %v3629_v49 = vpop.permute.xlu0 %3628 }
0x19ce   : > { %5277 = vmatprep.subr.bf16.mxu0 %v3629_v49  ;;  %v3639_v32 = vsel %vm923_vm1, %v3629_v49, 0 }
0x19cf   : > { %5278 = vmatpush3.bf16.msra.mxu0 %v3629_v49  ;;  %v5676_v16 = vpop.eup %5675 }
0x19d0   : > { %5279 = vmatprep.subr.bf16.mxu0 %v3627_v35  ;;  %v5678_v24 = vpop.eup %5677  ;;  %v3535_v1 = vmul.f32 %v5676_v16, %v5666_v12 }
0x19d1   : > { %v5680_v63 = vpop.eup %5679  ;;  %v3532_v59 = vmul.f32 %v5678_v24, %v5664_v6 }
0x19d2   : > { %v3534_v19 = vmul.f32 %v5680_v63, %v5662_v45 }
0x19d3   : > { %v5682_v28 = vpop.eup %5681  ;;  %5280 = vmatpush3.bf16.msra.mxu0 %v3627_v35 }
0x19d4   : > { %v3533_v56 = vmul.f32 %v5682_v28, %v5668_v40  ;;  %v3540_v52 = vpack.c.bf16 %v3535_v1, %v3534_v19  ;;  %v5684_v58 = vpop.eup %5683 }
0x19d5   : > { %v3538_v43 = vmul.f32 %v5684_v58, %v6902_v8 }
0x19d6   : > { %v3539_v47 = vpack.c.bf16 %v3533_v56, %v3532_v59 }
0x19d7   : > { %v5686_v53 = vpop.eup %5685  ;;  %v3542_v29 = vpack.c.bf16 %v3538_v43, %v3538_v43 }
0x19d8   : > { %5251 = vmatprep.mubr.msk.bf16.mxu1 %vm1014_vm4, %v3539_v47  ;;  %v3536_v12 = vmul.f32 %v5686_v53, %v6907_v25 }
0x19d9   : > { %5252 = vmatmul.mubr.msk.bf16.vlgmr.msra.gmra.mxu1 %vm1014_vm4, %v3540_v52 }
0x19da   : > { %5260 = vmatpush3.bf16.xpose.msra.mxu1 %v3642_v0 }
0x19db   : > { %5363 = vmatprep.subr.msk.bf16.mxu1 %vm923_vm1, %v3629_v49 }
0x19e2   : > { %5262 = vmatpush3.bf16.xpose.msra.mxu1 %v3639_v32 }
0x19e3   : > { %5364 = vmatprep.subr.msk.bf16.mxu1 %vm923_vm1, %v3627_v35 }
0x19ea   : > { %5264 = vmatpush3.bf16.xpose.msra.mxu1 %v3636_v41 }
0x19fa   : > { %v3521_v11 = vpop.xlane.xlu1 %3520 }
0x19fb   : > { %5687 = vrcp.f32 %v3521_v11 }
0x19fe   : > { %v3625_v5 = vpop.permute.xlu1 %3624 }
0x19ff   : > { %5365 = vmatprep.subr.msk.bf16.mxu1 %vm923_vm1, %v3625_v5  ;;  %5281 = vmatprep.subr.bf16.mxu0 %v3625_v5  ;;  %v3633_v45 = vsel %vm923_vm1, %v3625_v5, 0 }
0x1a00   : > { %5266 = vmatpush3.bf16.xpose.msra.mxu1 %v3633_v45  ;;  %5282 = vmatpush3.bf16.msra.mxu0 %v3625_v5 }
0x1a08   : > { %v5688_v6 = vpop.eup %5687 }
0x1a09   : > { %v3537_v62 = vmul.f32 %v5688_v6, %v5674_v7 }
0x1a0b   : > { %v3541_v40 = vpack.c.bf16 %v3537_v62, %v3536_v12 }
0x1a0d   : > { %5255 = vmatprep.mubr.msk.bf16.mxu1 %vm1014_vm4, %v3541_v40 }
0x1a0e   : > { %5256 = vmatmul.mubr.msk.bf16.gmra.mxu1 %vm1014_vm4, %v3542_v29 }
0x1a0f   : > { %5267 = vmatprep.mubr.msk.bf16.mxu1 %vm923_vm1, %v3625_v5 }
0x1a16   : > { %5268 = vmatmul.mubr.msk.bf16.vlgmr.msra.gmra.mxu1 %vm923_vm1, %v3627_v35 }
0x1a17   : > { %5271 = vmatprep.mubr.msk.bf16.mxu1 %vm923_vm1, %v3629_v49 }
0x1a1e   : > { %5272 = vmatmul.mubr.msk.bf16.gmra.mxu1 %vm923_vm1, %v6891_v22 }
0x1a99   : > { %v6937_v60 = vpop.f32.mrf.mxu1 }
0x1a9b   : > { %v6939_v8 = vpop.f32.mrf.mxu1 }
0x1a9d   : > { %v6941_v25 = vpop.f32.mrf.mxu1 }
0x1a9f   : > { %v6943_v48 = vpop.f32.mrf.mxu1 }
0x1ace   : > { %v6945_v3 = vpop.f32.mrf.mxu1 }
0x1ad0   : > { %v6947_v9 = vpop.f32.mrf.mxu1 }
0x1ad2   : > { %v5258_v10 = vpop.f32.mrf.mxu1 }
0x1ad4   : > { %v6949_v7 = vpop.f32.mrf.mxu1 }
0x1ad6   : > { %v5269_v39 = vpop.f32.mrf.mxu1 }
0x1ad7   : > { %v3710_v51 = vmul.f32 0.5, %v5269_v39 }
0x1ad8   : > { %v3678_v2 = vpop.f32.mrf.mxu1 }
0x1ad9   : > { %v3717_v22 = vadd.f32 %v3710_v51, %v6068_v4  ;;  %v3708_v27 = vmul.f32 0.5, %v3678_v2 }
0x1ada   : > { %v5270_v14 = vpop.f32.mrf.mxu1 }
0x1adb   : > { %v3715_v20 = vadd.f32 %v3708_v27, %v6068_v4  ;;  %v3728_v34 = vsel %vm1014_vm4, %v3717_v22, -inf  ;;  %v3711_v35 = vmul.f32 0.5, %v5270_v14 }
0x1adc   : > { %3729 = vmax.xlane.f32.xlu0 %v3728_v34  ;;  %v3681_v49 = vpop.f32.mrf.mxu1 }
0x1add   : > { %v3709_v16 = vmul.f32 0.5, %v3681_v49  ;;  %v3722_v24 = vsel %vm1014_vm4, %v3715_v20, -inf  ;;  %v3718_v59 = vadd.f32 %v3711_v35, %v6068_v4 }
0x1ade   : > { %3723 = vmax.xlane.f32.xlu1 %v3722_v24  ;;  %v5273_v63 = vpop.f32.mrf.mxu1 }
0x1adf   : > { %v3716_v28 = vadd.f32 %v3709_v16, %v6068_v4  ;;  %v3714_v56 = vmul.f32 0.5, %v5273_v63  ;;  %v3731_v5 = vsel %vm1014_vm4, %v3718_v59, -inf }
0x1ae0   : > { %v3694_v1 = vpop.f32.mrf.mxu1 }
0x1ae1   : > { %v3712_v19 = vmul.f32 0.5, %v3694_v1  ;;  %v3725_v47 = vsel %vm1014_vm4, %v3716_v28, -inf  ;;  %v3721_v41 = vadd.f32 %v3714_v56, %v6068_v4 }
0x1ae2   : > { %3726 = vmax.xlane.f32.xlu0 %v3725_v47  ;;  %v5274_v52 = vpop.f32.mrf.mxu1 }
0x1ae3   : > { %v3719_v0 = vadd.f32 %v3712_v19, %v6068_v4  ;;  %v3740_v53 = vsel %vm1014_vm4, %v3721_v41, -inf }
0x1ae4   : > { %v3697_v32 = vpop.f32.mrf.mxu1 }
0x1ae5   : > { %v3713_v11 = vmul.f32 0.5, %v3697_v32  ;;  %v3734_v45 = vsel %vm1014_vm4, %v3719_v0, -inf }
0x1ae6   : > { %3732 = vmax.xlane.f32.xlu0 %v3731_v5  ;;  %3735 = vmax.xlane.f32.xlu1 %v3734_v45 }
0x1ae7   : > { %v3720_v58 = vadd.f32 %v3713_v11, %v6068_v4 }
0x1ae9   : > { %v3737_v6 = vsel %vm1014_vm4, %v3720_v58, -inf }
0x1aea   : > { %3741 = vmax.xlane.f32.xlu1 %v3740_v53  ;;  %3738 = vmax.xlane.f32.xlu0 %v3737_v6 }
0x1b65   : > { %v3730_v43 = vpop.xlane.xlu0 %3729 }
0x1b66   : > { %v3745_v12 = vsub.f32 %v3717_v22, %v3730_v43 }
0x1b67   : > { %v3724_v62 = vpop.xlane.xlu1 %3723 }
0x1b68   : > { %v3743_v40 = vsub.f32 %v3715_v20, %v3724_v62  ;;  %v3754_v29 = vmul.f32 1.442695, %v3745_v12 }
0x1b6a   : > { %v3750_v10 = vmul.f32 1.442695, %v3743_v40 }
0x1b6b   : > { %v3727_v39 = vpop.xlane.xlu0 %3726 }
0x1b6c   : > { %5689 = vpow2.f32 %v3750_v10  ;;  %v3744_v51 = vsub.f32 %v3716_v28, %v3727_v39 }
0x1b6d   : > { %5691 = vpow2.f32 %v3754_v29 }
0x1b6e   : > { %v3752_v2 = vmul.f32 1.442695, %v3744_v51 }
0x1b6f   : > { %v3733_v27 = vpop.xlane.xlu0 %3732  ;;  %v3736_v14 = vpop.xlane.xlu1 %3735 }
0x1b70   : > { %5693 = vpow2.f32 %v3752_v2  ;;  %v3746_v4 = vsub.f32 %v3718_v59, %v3733_v27  ;;  %v3747_v34 = vsub.f32 %v3719_v0, %v3736_v14 }
0x1b72   : > { %v3756_v49 = vmul.f32 1.442695, %v3746_v4  ;;  %v3758_v35 = vmul.f32 1.442695, %v3747_v34 }
0x1b73   : > { %v3742_v16 = vpop.xlane.xlu1 %3741  ;;  %v3739_v24 = vpop.xlane.xlu0 %3738 }
0x1b74   : > { %5695 = vpow2.f32 %v3756_v49  ;;  %v3749_v22 = vsub.f32 %v3721_v41, %v3742_v16  ;;  %v3748_v63 = vsub.f32 %v3720_v58, %v3739_v24 }
0x1b75   : > { %5697 = vpow2.f32 %v3758_v35 }
0x1b76   : > { %v3762_v20 = vmul.f32 1.442695, %v3749_v22  ;;  %v3760_v1 = vmul.f32 1.442695, %v3748_v63 }
0x1b78   : > { %5699 = vpow2.f32 %v3762_v20 }
0x1b79   : > { %v5690_v56 = vpop.eup %5689  ;;  %5701 = vpow2.f32 %v3760_v1 }
0x1b7a   : > { %v3764_v28 = vsel %vm1014_vm4, %v5690_v56, 0.0  ;;  %v5692_v19 = vpop.eup %5691 }
0x1b7b   : > { %3765 = vadd.xlane.f32.xlu0 %v3764_v28  ;;  %v3770_v52 = vsel %vm1014_vm4, %v5692_v19, 0.0 }
0x1b7d   : > { %v5694_v47 = vpop.eup %5693 }
0x1b7e   : > { %v3767_v59 = vsel %vm1014_vm4, %v5694_v47, 0.0 }
0x1b7f   : > { %3768 = vadd.xlane.f32.xlu1 %v3767_v59  ;;  %3771 = vadd.xlane.f32.xlu0 %v3770_v52 }
0x1b81   : > { %v5696_v0 = vpop.eup %5695 }
0x1b82   : > { %v5698_v32 = vpop.eup %5697  ;;  %v3773_v41 = vsel %vm1014_vm4, %v5696_v0, 0.0 }
0x1b83   : > { %3774 = vadd.xlane.f32.xlu1 %v3773_v41  ;;  %v3776_v11 = vsel %vm1014_vm4, %v5698_v32, 0.0 }
0x1b84   : > { %3777 = vadd.xlane.f32.xlu0 %v3776_v11 }
0x1b85   : > { %v5700_v5 = vpop.eup %5699 }
0x1b86   : > { %v5702_v45 = vpop.eup %5701  ;;  %v3782_v58 = vsel %vm1014_vm4, %v5700_v5, 0.0 }
0x1b87   : > { %v3779_v53 = vsel %vm1014_vm4, %v5702_v45, 0.0 }
0x1b88   : > { %3783 = vadd.xlane.f32.xlu0 %v3782_v58  ;;  %3780 = vadd.xlane.f32.xlu1 %v3779_v53 }
0x1b99   : > { %3891 = vrot.lane.b32.xlu1 %v6863_v57, %s5771_s27 }
0x1b9d   : > { %3895 = vrot.lane.b32.xlu1 %v6861_v54, %s5771_s27 }
0x1b9e   : > { %3893 = vrot.lane.b32.xlu0 %v6867_v37, %s5771_s27 }
0x1ba1   : > { %3897 = vrot.lane.b32.xlu1 %v6865_v30, %s5771_s27 }
0x1ba2   : > { %3921 = vrot.lane.b32.xlu0 %v6943_v48, %s5772_s28 }
0x1ba5   : > { %3919 = vrot.lane.b32.xlu1 %v6939_v8, %s5772_s28 }
0x1ba6   : > { %3925 = vrot.lane.b32.xlu0 %v6941_v25, %s5772_s28 }
0x1ba9   : > { %3923 = vrot.lane.b32.xlu1 %v6937_v60, %s5772_s28 }
0x1baa   : > { %3901 = vrot.lane.b32.xlu0 %v6873_v46, %s5771_s27 }
0x1bad   : > { %3899 = vrot.lane.b32.xlu1 %v6871_v50, %s5771_s27 }
0x1bae   : > { %3927 = vrot.lane.b32.xlu0 %v6947_v9, %s5772_s28 }
0x1bb1   : > { %3903 = vrot.lane.b32.xlu1 %v6869_v38, %s5771_s27  ;;  %s467_s27 = scalar_lea.vmem %s7303_s14, %s7305_s24 }
0x1c04   : > { %v3766_v54 = vpop.xlane.xlu0 %3765 }
0x1c05   : > { %5703 = vrcp.f32 %v3766_v54 }
0x1c08   : > { %v3769_v57 = vpop.xlane.xlu1 %3768  ;;  %v3772_v30 = vpop.xlane.xlu0 %3771 }
0x1c09   : > { %5705 = vrcp.f32 %v3769_v57 }
0x1c0a   : > { %5707 = vrcp.f32 %v3772_v30 }
0x1c0c   : > { %v3775_v37 = vpop.xlane.xlu1 %3774 }
0x1c0d   : > { %5709 = vrcp.f32 %v3775_v37  ;;  %v3778_v60 = vpop.xlane.xlu0 %3777 }
0x1c0e   : > { %5711 = vrcp.f32 %v3778_v60 }
0x1c11   : > { %v3781_v46 = vpop.xlane.xlu1 %3780  ;;  %v3784_v8 = vpop.xlane.xlu0 %3783 }
0x1c12   : > { %5713 = vrcp.f32 %v3781_v46  ;;  %v5704_v50 = vpop.eup %5703 }
0x1c13   : > { %5715 = vrcp.f32 %v3784_v8  ;;  %v3792_v48 = vmul.f32 %v5704_v50, %v5690_v56 }
0x1c15   : > { %v3892_v1 = vpop.permute.xlu1 %3891 }
0x1c16   : > { %v5706_v25 = vpop.eup %5705 }
0x1c17   : > { %v3793_v9 = vmul.f32 %v5706_v25, %v5694_v47  ;;  %v5708_v6 = vpop.eup %5707 }
0x1c18   : > { %v3794_v12 = vmul.f32 %v5708_v6, %v5692_v19  ;;  %v3894_v19 = vpop.permute.xlu0 %3893 }
0x1c19   : > { %v3799_v38 = vpack.c.bf16 %v3793_v9, %v3792_v48  ;;  %v3896_v56 = vpop.permute.xlu1 %3895 }
0x1c1a   : > { %v5710_v43 = vpop.eup %5709 }
0x1c1b   : > { %v3795_v62 = vmul.f32 %v5710_v43, %v5696_v0  ;;  %5283 = vmatprep.mubr.msk.bf16.mxu0 %vm1014_vm4, %v3799_v38  ;;  %v5712_v40 = vpop.eup %5711 }
0x1c1c   : > { %v3796_v51 = vmul.f32 %v5712_v40, %v5698_v32 }
0x1c1d   : > { %v3800_v29 = vpack.c.bf16 %v3795_v62, %v3794_v12  ;;  %v3898_v28 = vpop.permute.xlu1 %3897 }
0x1c1e   : > { %v3971_v30 = vsel %vm923_vm1, %v6789_v18, %v3898_v28 }
0x1c1f   : > { %v5714_v10 = vpop.eup %5713  ;;  %5284 = vmatmul.mubr.msk.bf16.vlgmr.msra.gmra.mxu0 %vm1014_vm4, %v3800_v29 }
0x1c20   : > { %v5716_v39 = vpop.eup %5715  ;;  %v3797_v2 = vmul.f32 %v5714_v10, %v5702_v45  ;;  %v3970_v45 = vsel %vm923_vm1, %v6785_v13, %v3896_v56 }
0x1c21   : > { %v3798_v27 = vmul.f32 %v5716_v39, %v5700_v5  ;;  %v3920_v47 = vpop.permute.xlu1 %3919  ;;  %v3968_v5 = vsel %vm923_vm1, %v6787_v33, %v3892_v1  ;;  %v3969_v33 = vsel %vm923_vm1, %v6791_v36, %v3894_v19 }
0x1c22   : > { %v3801_v14 = vpack.c.bf16 %v3797_v2, %v3796_v51  ;;  %v3975_v58 = vsel %vm2050_vm6, %v3968_v5, %v3920_v47 }
0x1c23   : > { %v3802_v4 = vpack.c.bf16 %v3798_v27, %v3798_v27 }
0x1c24   : > { %5287 = vmatprep.mubr.msk.bf16.mxu0 %vm1014_vm4, %v3801_v14 }
0x1c25   : > { %v3924_v59 = vpop.permute.xlu1 %3923 }
0x1c26   : > { %v3977_v53 = vsel %vm2050_vm6, %v3970_v45, %v3924_v59 }
0x1c27   : > { %5288 = vmatmul.mubr.msk.bf16.gmra.mxu0 %vm1014_vm4, %v3802_v4 }
0x1c29   : > { %v3900_v0 = vpop.permute.xlu1 %3899 }
0x1c2a   : > { %v3972_v9 = vsel %vm923_vm1, %v6795_v17, %v3900_v0 }
0x1c2d   : > { %v3904_v41 = vpop.permute.xlu1 %3903 }
0x1cdf   : > { %v5285_v34 = vpop.f32.mrf.mxu0 }
0x1ce0   : > { %3951 = vrot.lane.b32.xlu1 %v5285_v34, %s5773_s15 }
0x1ce1   : > { %v3854_v49 = vpop.f32.mrf.mxu0 }
0x1ce3   : > { %v5286_v35 = vpop.f32.mrf.mxu0 }
0x1ce4   : > { %3947 = vrot.lane.b32.xlu1 %v3854_v49, %s5773_s15  ;;  %3953 = vrot.lane.b32.xlu0 %v5286_v35, %s5773_s15 }
0x1ce5   : > { %v3857_v16 = vpop.f32.mrf.mxu0 }
0x1ce7   : > { %v5289_v24 = vpop.f32.mrf.mxu0 }
0x1ce8   : > { %3929 = vrot.lane.b32.xlu1 %v6949_v7, %s5772_s28  ;;  %3949 = vrot.lane.b32.xlu0 %v3857_v16, %s5773_s15  ;;  %v3922_v7 = vpop.permute.xlu0 %3921 }
0x1ce9   : > { %v3870_v22 = vpop.f32.mrf.mxu0  ;;  %v3976_v13 = vsel %vm2050_vm6, %v3969_v33, %v3922_v7 }
0x1ceb   : > { %v5290_v63 = vpop.f32.mrf.mxu0 }
0x1cec   : > { %3931 = vrot.lane.b32.xlu0 %v6945_v3, %s5772_s28  ;;  %3955 = vrot.lane.b32.xlu1 %v3870_v22, %s5773_s15  ;;  %v3926_v52 = vpop.permute.xlu0 %3925 }
0x1ced   : > { %v3873_v20 = vpop.f32.mrf.mxu0  ;;  %v3978_v8 = vsel %vm2050_vm6, %v3971_v30, %v3926_v52 }
0x1cf0   : > { %3959 = vrot.lane.b32.xlu1 %v5289_v24, %s5773_s15  ;;  %3957 = vrot.lane.b32.xlu0 %v3873_v20, %s5773_s15  ;;  %v3902_v32 = vpop.permute.xlu0 %3901 }
0x1cf4   : > { %v3928_v11 = vpop.permute.xlu0 %3927 }
0x1cf5   : > { %v3979_v43 = vsel %vm2050_vm6, %v3972_v9, %v3928_v11  ;;  %v5400_v9 = vld [vmem:[%s7298_s9 + $0x10] sm:$0xff]  }
0x1d52   : > { %v3952_v3 = vpop.permute.xlu1 %3951 }
0x1d53   : > { %v3984_v37 = vsel %vm2058_vm5, %v3977_v53, %v3952_v3 }
0x1d54   : > { %v7029_v50 = vadd.f32 %v3984_v37, %v6585_v26 }
0x1d56   : > { %v3948_v54 = vpop.permute.xlu1 %3947  ;;  %v3954_v57 = vpop.permute.xlu0 %3953  ;;  %v4006_v62 = vsel %vm503_vm0, %v7029_v50, 0.0 }
0x1d57   : > { %v3982_v60 = vsel %vm2058_vm5, %v3975_v58, %v3948_v54 }
0x1d58   : > { %v7022_v46 = vadd.f32 %v3982_v60, %v6582_v31  ;;  %v3985_v31 = vsel %vm2058_vm5, %v3978_v8, %v3954_v57 }
0x1d59   : > { %v7041_v38 = vadd.f32 %v3985_v31, %v6593_v55  ;;  %v3974_v55 = vsel %vm923_vm1, %v6793_v44, %v3904_v41 }
0x1d5a   : > { %v3930_v25 = vpop.permute.xlu1 %3929  ;;  %v3950_v48 = vpop.permute.xlu0 %3949  ;;  %v4000_v18 = vsel %vm503_vm0, %v7022_v46, 0.0 }
0x1d5b   : > { %v3983_v6 = vsel %vm2058_vm5, %v3976_v13, %v3950_v48  ;;  %4001 = vadd.xlane.f32.xlu0 %v4000_v18  ;;  %v4009_v27 = vsel %vm503_vm0, %v7041_v38, 0.0  ;;  %v5399_v18 = vld [vmem:[%s7298_s9 + $0x18] sm:$0xff]  }
0x1d5c   : > { %v7038_v36 = vadd.f32 %v3983_v6, %v6590_v61  ;;  %v3973_v61 = vsel %vm923_vm1, %v6797_v42, %v3902_v32  ;;  %5291 = vmatprep.subr.bf16.mxu0 %v5399_v18 }
0x1d5d   : > { %v3980_v29 = vsel %vm2050_vm6, %v3973_v61, %v3930_v25  ;;  %5292 = vmatpush3.bf16.msra.mxu0 %v5399_v18 }
0x1d5e   : > { %v3956_v26 = vpop.permute.xlu1 %3955  ;;  %v3932_v12 = vpop.permute.xlu0 %3931  ;;  %v4003_v17 = vsel %vm503_vm0, %v7038_v36, 0.0  ;;  %5293 = vmatprep.subr.bf16.mxu0 %v5400_v9 }
0x1d5f   : > { %v3986_v40 = vsel %vm2058_vm5, %v3979_v43, %v3956_v26  ;;  %4007 = vadd.xlane.f32.xlu0 %v4006_v62  ;;  %4004 = vadd.xlane.f32.xlu1 %v4003_v17  ;;  %v3981_v39 = vsel %vm2050_vm6, %v3974_v55, %v3932_v12 }
0x1d60   : > { %v7055_v10 = vadd.f32 %v3986_v40, %v6600_v15 }
0x1d61   : > { %5294 = vmatpush3.bf16.msra.mxu0 %v5400_v9 }
0x1d62   : > { %v3960_v51 = vpop.permute.xlu1 %3959  ;;  %v3958_v2 = vpop.permute.xlu0 %3957  ;;  %v4012_v15 = vsel %vm503_vm0, %v7055_v10, 0.0 }
0x1d63   : > { %v3988_v14 = vsel %vm2058_vm5, %v3981_v39, %v3960_v51  ;;  %v3987_v4 = vsel %vm2058_vm5, %v3980_v29, %v3958_v2  ;;  %4010 = vadd.xlane.f32.xlu0 %v4009_v27 }
0x1d64   : > { %v7063_v42 = vadd.f32 %v3987_v4, %v6610_v21  ;;  %v7066_v44 = vadd.f32 %v3988_v14, %v6605_v23 }
0x1d66   : > { %v4015_v34 = vsel %vm503_vm0, %v7063_v42, 0.0  ;;  %v4018_v49 = vsel %vm503_vm0, %v7066_v44, 0.0 }
0x1d67   : > { %4013 = vadd.xlane.f32.xlu0 %v4012_v15  ;;  %4016 = vadd.xlane.f32.xlu1 %v4015_v34 }
0x1d6b   : > { %4019 = vadd.xlane.f32.xlu0 %v4018_v49 }
0x1de4   : > { %v4002_v35 = vpop.xlane.xlu0 %4001 }
0x1de5   : > { %v4021_v16 = vmul.f32 0.03125, %v4002_v35 }
0x1de7   : > { %v7075_v21 = vsub.f32 %v7022_v46, %v4021_v16 }
0x1de8   : > { %v4005_v24 = vpop.xlane.xlu1 %4004  ;;  %v4008_v23 = vpop.xlane.xlu0 %4007 }
0x1de9   : > { %v4022_v22 = vmul.f32 0.03125, %v4005_v24  ;;  %v4023_v63 = vmul.f32 0.03125, %v4008_v23  ;;  %v4035_v20 = vmul.f32 %v7075_v21, %v7075_v21  ;;  %v4739_v23 = vld [vmem:[%s7296_s7 + $0x1] ss:$0 sm:$0xff] }
0x1deb   : > { %v7080_v1 = vsub.f32 %v7038_v36, %v4022_v22  ;;  %v7083_v56 = vsub.f32 %v7029_v50, %v4023_v63  ;;  %v4042_v28 = vsel %vm503_vm0, %v4035_v20, 0.0 }
0x1dec   : > { %4043 = vadd.xlane.f32.xlu1 %v4042_v28  ;;  %v4011_v19 = vpop.xlane.xlu0 %4010 }
0x1ded   : > { %v4024_v47 = vmul.f32 0.03125, %v4011_v19  ;;  %v4036_v7 = vmul.f32 %v7080_v1, %v7080_v1  ;;  %v4037_v59 = vmul.f32 %v7083_v56, %v7083_v56 }
0x1def   : > { %v7091_v52 = vsub.f32 %v7041_v38, %v4024_v47  ;;  %v4045_v0 = vsel %vm503_vm0, %v4036_v7, 0.0  ;;  %v4048_v32 = vsel %vm503_vm0, %v4037_v59, 0.0  ;;  %v4740_v47 = vld [vmem:[%s7297_s8 + $0x1] ss:$0 sm:$0xff] }
0x1df0   : > { %4046 = vadd.xlane.f32.xlu0 %v4045_v0  ;;  %v4017_v41 = vpop.xlane.xlu1 %4016  ;;  %4049 = vadd.xlane.f32.xlu1 %v4048_v32  ;;  %v4014_v11 = vpop.xlane.xlu0 %4013 }
0x1df1   : > { %v4026_v3 = vmul.f32 0.03125, %v4017_v41  ;;  %v4025_v5 = vmul.f32 0.03125, %v4014_v11  ;;  %v4038_v45 = vmul.f32 %v7091_v52, %v7091_v52 }
0x1df3   : > { %v7098_v58 = vsub.f32 %v7063_v42, %v4026_v3  ;;  %v7101_v53 = vsub.f32 %v7055_v10, %v4025_v5  ;;  %v4051_v54 = vsel %vm503_vm0, %v4038_v45, 0.0 }
0x1df4   : > { %4052 = vadd.xlane.f32.xlu0 %v4051_v54  ;;  %v4020_v57 = vpop.xlane.xlu0 %4019 }
0x1df5   : > { %v4027_v30 = vmul.f32 0.03125, %v4020_v57  ;;  %v4040_v37 = vmul.f32 %v7098_v58, %v7098_v58  ;;  %v4039_v60 = vmul.f32 %v7101_v53, %v7101_v53 }
0x1df7   : > { %v7109_v33 = vsub.f32 %v7066_v44, %v4027_v30  ;;  %v4057_v13 = vsel %vm503_vm0, %v4040_v37, 0.0  ;;  %v4054_v8 = vsel %vm503_vm0, %v4039_v60, 0.0 }
0x1df8   : > { %4058 = vadd.xlane.f32.xlu0 %v4057_v13  ;;  %4055 = vadd.xlane.f32.xlu1 %v4054_v8 }
0x1df9   : > { %v4041_v25 = vmul.f32 %v7109_v33, %v7109_v33 }
0x1dfb   : > { %v4060_v48 = vsel %vm503_vm0, %v4041_v25, 0.0 }
0x1dfc   : > { %4061 = vadd.xlane.f32.xlu1 %v4060_v48 }
0x1e75   : > { %v4044_v31 = vpop.xlane.xlu1 %4043 }
0x1e76   : > { %v4063_v6 = vmul.f32 0.03125, %v4044_v31  ;;  %v5402_v31 = vld [vmem:[%s7300_s11 + $0x70] sm:$0xff]  }
0x1e78   : > { %v4070_v26 = vadd.f32 1e-05, %v4063_v6  ;;  %v5404_v6 = vld [vmem:[%s7300_s11 + $0x60] sm:$0xff]  }
0x1e79   : > { %v4050_v43 = vpop.xlane.xlu1 %4049  ;;  %v4047_v12 = vpop.xlane.xlu0 %4046 }
0x1e7a   : > { %5717 = vrsqrt.f32 %v4070_v26  ;;  %v4065_v62 = vmul.f32 0.03125, %v4050_v43  ;;  %v4064_v17 = vmul.f32 0.03125, %v4047_v12  ;;  %v5405_v26 = vld [vmem:[%s7300_s11 + $0x58] sm:$0xff]   ;;  %v5406_v43 = vld [vmem:[%s7300_s11 + $0x50] sm:$0xff]   ;;  %v5407_v12 = vld [vmem:[%s7300_s11 + $0x48] sm:$0xff]  }
0x1e7c   : > { %v4072_v40 = vadd.f32 1e-05, %v4065_v62  ;;  %v4071_v61 = vadd.f32 1e-05, %v4064_v17  ;;  %v5408_v62 = vld [vmem:[%s7300_s11 + $0x40] sm:$0xff]  }
0x1e7d   : > { %v4053_v55 = vpop.xlane.xlu0 %4052  ;;  %v4746_v17 = vld [vmem:[%s7299_s10 + $0x1] ss:$0 sm:$0xff] }
0x1e7e   : > { %5719 = vrsqrt.f32 %v4072_v40  ;;  %v4066_v29 = vmul.f32 0.03125, %v4053_v55 }
0x1e7f   : > { %5721 = vrsqrt.f32 %v4071_v61 }
0x1e80   : > { %v4073_v39 = vadd.f32 1e-05, %v4066_v29 }
0x1e81   : > { %v4056_v51 = vpop.xlane.xlu1 %4055  ;;  %v4059_v2 = vpop.xlane.xlu0 %4058 }
0x1e82   : > { %5723 = vrsqrt.f32 %v4073_v39  ;;  %v4067_v27 = vmul.f32 0.03125, %v4056_v51  ;;  %v4068_v14 = vmul.f32 0.03125, %v4059_v2 }
0x1e84   : > { %v4074_v4 = vadd.f32 1e-05, %v4067_v27  ;;  %v4075_v15 = vadd.f32 1e-05, %v4068_v14 }
0x1e85   : > { %v4062_v34 = vpop.xlane.xlu1 %4061 }
0x1e86   : > { %5725 = vrsqrt.f32 %v4074_v4  ;;  %v4069_v49 = vmul.f32 0.03125, %v4062_v34 }
0x1e87   : > { %v5718_v35 = vpop.eup %5717  ;;  %5727 = vrsqrt.f32 %v4075_v15 }
0x1e88   : > { %v4076_v16 = vadd.f32 1e-05, %v4069_v49  ;;  %v4084_v24 = vmul.f32 %v5718_v35, %v7075_v21 }
0x1e8a   : > { %5729 = vrsqrt.f32 %v4076_v16  ;;  %v4097_v19 = vmul.f32 %v4739_v23, %v4084_v24 }
0x1e8b   : > { %v5720_v22 = vpop.eup %5719 }
0x1e8c   : > { %v5722_v63 = vpop.eup %5721  ;;  %v4086_v20 = vmul.f32 %v5720_v22, %v7083_v56  ;;  %v4110_v32 = vadd.f32 %v4740_v47, %v4097_v19 }
0x1e8d   : > { %v4085_v28 = vmul.f32 %v5722_v63, %v7080_v1 }
0x1e8e   : > { %v4099_v0 = vmul.f32 %v4739_v23, %v4086_v20 }
0x1e8f   : > { %v5724_v7 = vpop.eup %5723  ;;  %v4098_v59 = vmul.f32 %v4739_v23, %v4085_v28 }
0x1e90   : > { %v4087_v21 = vmul.f32 %v5724_v7, %v7091_v52  ;;  %v4112_v54 = vadd.f32 %v4740_v47, %v4099_v0 }
0x1e91   : > { %v4111_v41 = vadd.f32 %v4740_v47, %v4098_v59 }
0x1e92   : > { %v4100_v11 = vmul.f32 %v4739_v23, %v4087_v21 }
0x1e93   : > { %v5726_v3 = vpop.eup %5725  ;;  %v4122_v5 = vpack.c.bf16 %v4111_v41, %v4110_v32 }
0x1e94   : > { %v5728_v45 = vpop.eup %5727  ;;  %v4113_v56 = vadd.f32 %v4740_v47, %v4100_v11  ;;  %v4088_v1 = vmul.f32 %v5726_v3, %v7101_v53 }
0x1e95   : > { %5295 = vmatprep.mubr.msk.bf16.mxu0 %vm503_vm0, %v4122_v5  ;;  %v4089_v57 = vmul.f32 %v5728_v45, %v7098_v58  ;;  %v5401_v58 = vld [vmem:[%s7300_s11 + $0x78] sm:$0xff]  }
0x1e96   : > { %v4123_v30 = vpack.c.bf16 %v4113_v56, %v4112_v54  ;;  %v4101_v37 = vmul.f32 %v4739_v23, %v4088_v1  ;;  %5303 = vmatprep.subr.bf16.mxu1 %v5401_v58 }
0x1e97   : > { %v5730_v60 = vpop.eup %5729  ;;  %v4102_v13 = vmul.f32 %v4739_v23, %v4089_v57  ;;  %5304 = vmatpush3.bf16.msra.mxu1 %v5401_v58 }
0x1e98   : > { %5296 = vmatmul.mubr.msk.bf16.vlgmr.msra.gmra.mxu0 %vm503_vm0, %v4123_v30  ;;  %v4114_v52 = vadd.f32 %v4740_v47, %v4101_v37  ;;  %v4090_v8 = vmul.f32 %v5730_v60, %v7109_v33  ;;  %5305 = vmatprep.subr.bf16.mxu1 %v5402_v31  ;;  %v5403_v33 = vld [vmem:[%s7300_s11 + $0x68] sm:$0xff]  }
0x1e99   : > { %v4115_v25 = vadd.f32 %v4740_v47, %v4102_v13 }
0x1e9a   : > { %v4103_v48 = vmul.f32 %v4739_v23, %v4090_v8 }
0x1e9b   : > { %v4124_v18 = vpack.c.bf16 %v4115_v25, %v4114_v52  ;;  %5306 = vmatpush3.bf16.msra.mxu1 %v5402_v31 }
0x1e9c   : > { %v4116_v9 = vadd.f32 %v4740_v47, %v4103_v48  ;;  %5307 = vmatprep.subr.bf16.mxu1 %v5403_v33 }
0x1e9d   : > { %5299 = vmatprep.mubr.msk.bf16.mxu0 %vm503_vm0, %v4124_v18 }
0x1e9e   : > { %v4125_v53 = vpack.c.bf16 %v4116_v9, %v4116_v9 }
0x1e9f   : > { %5308 = vmatpush3.bf16.msra.mxu1 %v5403_v33 }
0x1ea0   : > { %5300 = vmatmul.mubr.msk.bf16.gmra.mxu0 %vm503_vm0, %v4125_v53  ;;  %5309 = vmatprep.subr.bf16.mxu1 %v5404_v6 }
0x1ea3   : > { %5310 = vmatpush3.bf16.msra.mxu1 %v5404_v6 }
0x1ea4   : > { %5311 = vmatprep.subr.bf16.mxu1 %v5405_v26 }
0x1ea7   : > { %5312 = vmatpush3.bf16.msra.mxu1 %v5405_v26 }
0x1ea8   : > { %5313 = vmatprep.subr.bf16.mxu1 %v5406_v43 }
0x1eab   : > { %5314 = vmatpush3.bf16.msra.mxu1 %v5406_v43 }
0x1eac   : > { %5315 = vmatprep.subr.bf16.mxu1 %v5407_v12 }
0x1eaf   : > { %5316 = vmatpush3.bf16.msra.mxu1 %v5407_v12 }
0x1eb0   : > { %5317 = vmatprep.subr.bf16.mxu1 %v5408_v62 }
0x1eb3   : > { %5318 = vmatpush3.bf16.msra.mxu1 %v5408_v62 }
0x1f58   : > { %v5297_v40 = vpop.f32.mrf.mxu0 }
0x1f59   : > { %v7166_v61 = vadd.f32 %v5297_v40, %v4746_v17 }
0x1f5a   : > { %v4192_v55 = vpop.f32.mrf.mxu0 }
0x1f5b   : > { %v7169_v29 = vmul.f32 0.70710677, %v7166_v61  ;;  %v7171_v39 = vadd.f32 %v4746_v17, %v4192_v55 }
0x1f5c   : > { %v5298_v51 = vpop.f32.mrf.mxu0 }
0x1f5d   : > { %v4238_v2 = vand.u32 2147483647, %v7169_v29  ;;  %v7175_v27 = vmul.f32 0.70710677, %v7171_v39  ;;  %v7177_v14 = vadd.f32 %v5298_v51, %v4746_v17  ;;  %vm4378_vm14 = vcmp.lt.f32.partialorder %v7169_v29, 0.0 }
0x1f5e   : > { %v4195_v4 = vpop.f32.mrf.mxu0 }
0x1f5f   : > { %v4245_v15 = vmul.f32 0.3275911, %v4238_v2  ;;  %v4236_v34 = vand.u32 2147483647, %v7175_v27  ;;  %v7181_v49 = vmul.f32 0.70710677, %v7177_v14  ;;  %v7183_v35 = vadd.f32 %v4746_v17, %v4195_v4 }
0x1f60   : > { %v5301_v16 = vpop.f32.mrf.mxu0  ;;  %v4336_v3 = vsub.f32 0.0, %v4238_v2  ;;  %vm4376_vm15 = vcmp.lt.f32.partialorder %v7175_v27, 0.0 }
0x1f61   : > { %v4252_v24 = vadd.f32 1.0, %v4245_v15  ;;  %v4243_v23 = vmul.f32 0.3275911, %v4236_v34  ;;  %v4239_v22 = vand.u32 2147483647, %v7181_v49  ;;  %v7190_v59 = vadd.f32 %v5301_v16, %v4746_v17 }
0x1f62   : > { %v7187_v63 = vmul.f32 0.70710677, %v7183_v35  ;;  %v4208_v20 = vpop.f32.mrf.mxu0  ;;  %v4334_v1 = vsub.f32 0.0, %v4236_v34  ;;  %v4343_v30 = vmul.f32 %v4336_v3, %v4238_v2  ;;  %vm4379_vm1 = vcmp.lt.f32.partialorder %v7181_v49, 0.0 }
0x1f63   : > { %5731 = vrcp.f32 %v4252_v24  ;;  %v4250_v28 = vadd.f32 1.0, %v4243_v23  ;;  %v4246_v19 = vmul.f32 0.3275911, %v4239_v22  ;;  %v7192_v0 = vadd.f32 %v4746_v17, %v4208_v20 }
0x1f64   : > { %v4237_v47 = vand.u32 2147483647, %v7187_v63  ;;  %v5302_v7 = vpop.f32.mrf.mxu0  ;;  %v7195_v41 = vmul.f32 0.70710677, %v7190_v59  ;;  %v4337_v52 = vsub.f32 0.0, %v4239_v22  ;;  %v4341_v48 = vmul.f32 %v4334_v1, %v4236_v34 }
0x1f65   : > { %5733 = vrcp.f32 %v4250_v28  ;;  %v4253_v21 = vadd.f32 1.0, %v4246_v19  ;;  %v7199_v54 = vmul.f32 0.70710677, %v7192_v0  ;;  %v4352_v9 = vmul.f32 1.442695, %v4343_v30 }
0x1f66   : > { %v4244_v32 = vmul.f32 0.3275911, %v4237_v47  ;;  %v4211_v11 = vpop.f32.mrf.mxu0  ;;  %v4242_v45 = vand.u32 2147483647, %v7195_v41  ;;  %v4335_v53 = vsub.f32 0.0, %v4237_v47  ;;  %v4344_v6 = vmul.f32 %v4337_v52, %v4239_v22 }
0x1f67   : > { %5735 = vrcp.f32 %v4253_v21  ;;  %v7201_v56 = vadd.f32 %v4746_v17, %v4211_v11  ;;  %v4240_v37 = vand.u32 2147483647, %v7199_v54  ;;  %v4348_v62 = vmul.f32 1.442695, %v4341_v48 }
0x1f68   : > { %v4251_v5 = vadd.f32 1.0, %v4244_v32  ;;  %v4249_v57 = vmul.f32 0.3275911, %v4242_v45  ;;  %v4342_v40 = vmul.f32 %v4335_v53, %v4237_v47  ;;  %v4340_v2 = vsub.f32 0.0, %v4242_v45 }
0x1f69   : > { %v7205_v60 = vmul.f32 0.70710677, %v7201_v56  ;;  %v4247_v8 = vmul.f32 0.3275911, %v4240_v37  ;;  %v4354_v34 = vmul.f32 1.442695, %v4344_v6 }
0x1f6a   : > { %5737 = vrcp.f32 %v4251_v5  ;;  %v4256_v13 = vadd.f32 1.0, %v4249_v57  ;;  %v4350_v20 = vmul.f32 1.442695, %v4342_v40  ;;  %v4338_v28 = vsub.f32 0.0, %v4240_v37 }
0x1f6b   : > { %v4241_v25 = vand.u32 2147483647, %v7205_v60  ;;  %v4254_v58 = vadd.f32 1.0, %v4247_v8  ;;  %v4347_v7 = vmul.f32 %v4340_v2, %v4242_v45  ;;  %vm4377_vm2 = vcmp.lt.f32.partialorder %v7187_v63, 0.0 }
0x1f6c   : > { %5739 = vrcp.f32 %v4256_v13  ;;  %v4345_v13 = vmul.f32 %v4338_v28, %v4240_v37  ;;  %vm4382_vm3 = vcmp.lt.f32.partialorder %v7195_v41, 0.0  ;;  %vm4380_vm4 = vcmp.lt.f32.partialorder %v7199_v54, 0.0 }
0x1f6d   : > { %v4248_v31 = vmul.f32 0.3275911, %v4241_v25  ;;  %5741 = vrcp.f32 %v4254_v58  ;;  %v4339_v11 = vsub.f32 0.0, %v4241_v25  ;;  %v4360_v48 = vmul.f32 1.442695, %v4347_v7 }
0x1f6e   : > { %5743 = vpow2.f32 %v4352_v9  ;;  %vm4381_vm5 = vcmp.lt.f32.partialorder %v7205_v60, 0.0  ;;  %v4770_v60 = vld [vmem:[%s7301_s12 + $0x1] ss:$0 sm:$0xff] }
0x1f6f   : > { %v4255_v26 = vadd.f32 1.0, %v4248_v31  ;;  %v4346_v58 = vmul.f32 %v4339_v11, %v4241_v25 }
0x1f70   : > { %v5732_v18 = vpop.eup %5731 }
0x1f71   : > { %v4273_v33 = vmul.f32 1.0614054, %v5732_v18  ;;  %5745 = vrcp.f32 %v4255_v26 }
0x1f72   : > { %v7208_v43 = vpop.eup %5733  ;;  %5747 = vpow2.f32 %v4348_v62 }
0x1f73   : > { %v4280_v12 = vadd.f32 -1.4531521, %v4273_v33  ;;  %v4271_v17 = vmul.f32 1.0614054, %v7208_v43  ;;  %5749 = vpow2.f32 %v4354_v34 }
0x1f74   : > { %v7211_v55 = vpop.eup %5735  ;;  %5751 = vpow2.f32 %v4350_v20 }
0x1f75   : > { %v4287_v51 = vmul.f32 %v5732_v18, %v4280_v12  ;;  %v4278_v4 = vadd.f32 -1.4531521, %v4271_v17  ;;  %v4274_v15 = vmul.f32 1.0614054, %v7211_v55  ;;  %v4356_v17 = vmul.f32 1.442695, %v4345_v13 }
0x1f76   : > { %5753 = vpow2.f32 %v4360_v48 }
0x1f77   : > { %v4294_v16 = vadd.f32 1.4214138, %v4287_v51  ;;  %v7214_v24 = vpop.eup %5737  ;;  %v4285_v23 = vmul.f32 %v7208_v43, %v4278_v4  ;;  %v4281_v22 = vadd.f32 -1.4531521, %v4274_v15  ;;  %5755 = vpow2.f32 %v4356_v17 }
0x1f78   : > { %v4272_v47 = vmul.f32 1.0614054, %v7214_v24 }
0x1f79   : > { %v4301_v19 = vmul.f32 %v5732_v18, %v4294_v16  ;;  %v4292_v21 = vadd.f32 1.4214138, %v4285_v23  ;;  %v4288_v32 = vmul.f32 %v7211_v55, %v4281_v22  ;;  %v7219_v1 = vpop.eup %5739  ;;  %v4358_v23 = vmul.f32 1.442695, %v4346_v58 }
0x1f7a   : > { %v4279_v5 = vadd.f32 -1.4531521, %v4272_v47  ;;  %v4277_v45 = vmul.f32 1.0614054, %v7219_v1  ;;  %v7225_v31 = vpop.eup %5741 }
0x1f7b   : > { %v4308_v3 = vadd.f32 -0.28449672, %v4301_v19  ;;  %v4299_v57 = vmul.f32 %v7208_v43, %v4292_v21  ;;  %v4295_v30 = vadd.f32 1.4214138, %v4288_v32  ;;  %v4275_v37 = vmul.f32 1.0614054, %v7225_v31  ;;  %v5744_v40 = vpop.eup %5743 }
0x1f7c   : > { %v4286_v8 = vmul.f32 %v7214_v24, %v4279_v5  ;;  %v4284_v26 = vadd.f32 -1.4531521, %v4277_v45  ;;  %5757 = vpow2.f32 %v4358_v23 }
0x1f7d   : > { %v4315_v52 = vmul.f32 %v5732_v18, %v4308_v3  ;;  %v4306_v9 = vadd.f32 -0.28449672, %v4299_v57  ;;  %v4302_v53 = vmul.f32 %v7211_v55, %v4295_v30  ;;  %v4282_v16 = vadd.f32 -1.4531521, %v4275_v37 }
0x1f7e   : > { %v4293_v6 = vadd.f32 1.4214138, %v4286_v8  ;;  %v4291_v4 = vmul.f32 %v7219_v1, %v4284_v26  ;;  %v7231_v15 = vpop.eup %5745 }
0x1f7f   : > { %v4322_v33 = vadd.f32 0.2548296, %v4315_v52  ;;  %v4313_v12 = vmul.f32 %v7208_v43, %v4306_v9  ;;  %v4309_v62 = vadd.f32 -0.28449672, %v4302_v53  ;;  %v4276_v28 = vmul.f32 1.0614054, %v7231_v15  ;;  %v5748_v47 = vpop.eup %5747 }
0x1f80   : > { %v4300_v2 = vmul.f32 %v7214_v24, %v4293_v6  ;;  %v4298_v19 = vadd.f32 1.4214138, %v4291_v4  ;;  %v4289_v21 = vmul.f32 %v7225_v31, %v4282_v16  ;;  %v5750_v52 = vpop.eup %5749 }
0x1f81   : > { %v4329_v51 = vmul.f32 %v5732_v18, %v4322_v33  ;;  %v4320_v25 = vadd.f32 0.2548296, %v4313_v12  ;;  %v4316_v34 = vmul.f32 %v7211_v55, %v4309_v62  ;;  %v4283_v11 = vadd.f32 -1.4531521, %v4276_v28  ;;  %v5752_v58 = vpop.eup %5751 }
0x1f82   : > { %v4307_v20 = vadd.f32 -0.28449672, %v4300_v2  ;;  %v4305_v3 = vmul.f32 %v7219_v1, %v4298_v19  ;;  %v4296_v13 = vadd.f32 1.4214138, %v4289_v21  ;;  %v4222_v28 = vmul.f32 0.5, %v7171_v39 }
0x1f83   : > { %v4364_v22 = vmul.f32 %v5744_v40, %v4329_v51  ;;  %v4327_v18 = vmul.f32 %v7208_v43, %v4320_v25  ;;  %v4323_v7 = vadd.f32 0.2548296, %v4316_v34  ;;  %v4290_v48 = vmul.f32 %v7231_v15, %v4283_v11  ;;  %v5754_v23 = vpop.eup %5753 }
0x1f84   : > { %v4314_v32 = vmul.f32 %v7214_v24, %v4307_v20  ;;  %v4312_v43 = vadd.f32 -0.28449672, %v4305_v3  ;;  %v4303_v53 = vmul.f32 %v7225_v31, %v4296_v13  ;;  %v5756_v21 = vpop.eup %5755  ;;  %v4224_v13 = vmul.f32 0.5, %v7166_v61 }
0x1f85   : > { %v4371_v5 = vsub.f32 1.0, %v4364_v22  ;;  %v4362_v57 = vmul.f32 %v5748_v47, %v4327_v18  ;;  %v4330_v30 = vmul.f32 %v7211_v55, %v4323_v7  ;;  %v4297_v6 = vadd.f32 1.4214138, %v4290_v48 }
0x1f86   : > { %v4321_v8 = vadd.f32 0.2548296, %v4314_v32  ;;  %v4319_v26 = vmul.f32 %v7219_v1, %v4312_v43  ;;  %v4310_v37 = vadd.f32 -0.28449672, %v4303_v53 }
0x1f87   : > { %v4369_v45 = vsub.f32 1.0, %v4362_v57  ;;  %v4365_v9 = vmul.f32 %v5750_v52, %v4330_v30  ;;  %v4385_v12 = vsub.f32 0.0, %v4371_v5  ;;  %v4304_v40 = vmul.f32 %v7231_v15, %v4297_v6 }
0x1f88   : > { %v4328_v33 = vmul.f32 %v7214_v24, %v4321_v8  ;;  %v4326_v51 = vadd.f32 0.2548296, %v4319_v26  ;;  %v4317_v24 = vmul.f32 %v7225_v31, %v4310_v37  ;;  %v4227_v37 = vmul.f32 0.5, %v7201_v56 }
0x1f89   : > { %v4383_v62 = vsub.f32 0.0, %v4369_v45  ;;  %v4372_v55 = vsub.f32 1.0, %v4365_v9  ;;  %v4311_v34 = vadd.f32 -0.28449672, %v4304_v40  ;;  %v4392_v22 = vsel %vm4378_vm14, %v4385_v12, %v4371_v5  ;;  %v5758_v63 = vpop.eup %5757 }
0x1f8a   : > { %v4363_v17 = vmul.f32 %v5752_v58, %v4328_v33  ;;  %v4333_v16 = vmul.f32 %v7219_v1, %v4326_v51  ;;  %v4324_v29 = vadd.f32 0.2548296, %v4317_v24  ;;  %v4399_v32 = vadd.f32 1.0, %v4392_v22 }
0x1f8b   : > { %v4386_v2 = vsub.f32 0.0, %v4372_v55  ;;  %v4390_v4 = vsel %vm4376_vm15, %v4383_v62, %v4369_v45  ;;  %v4318_v27 = vmul.f32 %v7231_v15, %v4311_v34  ;;  %v4225_v1 = vmul.f32 0.5, %v7177_v14 }
0x1f8c   : > { %v4370_v25 = vsub.f32 1.0, %v4363_v17  ;;  %v4397_v18 = vadd.f32 1.0, %v4390_v4  ;;  %v4331_v49 = vmul.f32 %v7225_v31, %v4324_v29  ;;  %v4368_v7 = vmul.f32 %v5754_v23, %v4333_v16 }
0x1f8d   : > { %v4393_v20 = vsel %vm4379_vm1, %v4386_v2, %v4372_v55  ;;  %v4325_v3 = vadd.f32 0.2548296, %v4318_v27  ;;  %v4223_v5 = vmul.f32 0.5, %v7183_v35  ;;  %v4406_v9 = vmul.f32 %v4399_v32, %v4224_v13 }
0x1f8e   : > { %v4400_v19 = vadd.f32 1.0, %v4393_v20  ;;  %v4384_v47 = vsub.f32 0.0, %v4370_v25  ;;  %v4366_v39 = vmul.f32 %v5756_v21, %v4331_v49  ;;  %v4375_v30 = vsub.f32 1.0, %v4368_v7 }
0x1f8f   : > { %v4332_v8 = vmul.f32 %v7231_v15, %v4325_v3  ;;  %v4404_v48 = vmul.f32 %v4397_v18, %v4222_v28  ;;  %v4228_v62 = vmul.f32 0.5, %v7190_v59  ;;  %v4226_v55 = vmul.f32 0.5, %v7192_v0 }
0x1f90   : > { %v4391_v11 = vsel %vm4377_vm2, %v4384_v47, %v4370_v25  ;;  %v4407_v52 = vmul.f32 %v4400_v19, %v4225_v1  ;;  %v4373_v43 = vsub.f32 1.0, %v4366_v39  ;;  %v4389_v45 = vsub.f32 0.0, %v4375_v30 }
0x1f91   : > { %v4398_v57 = vadd.f32 1.0, %v4391_v11  ;;  %v4367_v14 = vmul.f32 %v5758_v63, %v4332_v8 }
0x1f92   : > { %v4387_v53 = vsub.f32 0.0, %v4373_v43  ;;  %v4396_v35 = vsel %vm4382_vm3, %v4389_v45, %v4375_v30  ;;  %v4429_v33 = vpack.c.bf16 %v4407_v52, %v4406_v9 }
0x1f93   : > { %v4405_v31 = vmul.f32 %v4398_v57, %v4223_v5  ;;  %v4374_v6 = vsub.f32 1.0, %v4367_v14  ;;  %v4403_v15 = vadd.f32 1.0, %v4396_v35 }
0x1f94   : > { %v4394_v61 = vsel %vm4380_vm4, %v4387_v53, %v4373_v43 }
0x1f95   : > { %v4428_v58 = vpack.c.bf16 %v4405_v31, %v4404_v48  ;;  %v4388_v26 = vsub.f32 0.0, %v4374_v6  ;;  %v4401_v12 = vadd.f32 1.0, %v4394_v61  ;;  %v4410_v40 = vmul.f32 %v4403_v15, %v4228_v62 }
0x1f97   : > { %5319 = vmatprep.mubr.bf16.mxu1 %v4428_v58  ;;  %v4395_v41 = vsel %vm4381_vm5, %v4388_v26, %v4374_v6  ;;  %v4408_v54 = vmul.f32 %v4401_v12, %v4226_v55  ;;  %v4431_v24 = vpack.c.bf16 %v4410_v40, %v4410_v40 }
0x1f98   : > { %5320 = vmatmul.mubr.bf16.vlgmr.msra.gmra.mxu1 %v4429_v33  ;;  %v4402_v17 = vadd.f32 1.0, %v4395_v41 }
0x1f9a   : > { %v4409_v51 = vmul.f32 %v4402_v17, %v4227_v37 }
0x1f9c   : > { %v4430_v2 = vpack.c.bf16 %v4409_v51, %v4408_v54 }
0x1f9e   : > { %5323 = vmatprep.mubr.bf16.mxu1 %v4430_v2 }
0x1fa0   : > { %5324 = vmatmul.mubr.bf16.gmra.mxu1 %v4431_v24 }
0x2058   : > { %v5321_v4 = vpop.f32.mrf.mxu1 }
0x2059   : > { %v4531_v25 = vadd.f32 %v5321_v4, %v4770_v60 }
0x205a   : > { %v4522_v59 = vpop.f32.mrf.mxu1 }
0x205b   : > { %v4554_v0 = vadd.f32 %v4531_v25, %v7029_v50  ;;  %v4523_v56 = vadd.f32 %v4770_v60, %v4522_v59 }
0x205c   : > { %v5322_v34 = vpop.f32.mrf.mxu1 }
0x205d   : > { %4561 = vst.msk [vmem:[%s467_s27 + $0x10] sm:$0xff] %vm503_vm0, %v4554_v0  ;;  %v4552_v16 = vadd.f32 %v4523_v56, %v7022_v46  ;;  %v4534_v23 = vadd.f32 %v5322_v34, %v4770_v60 }
0x205e   : > { %v4525_v22 = vpop.f32.mrf.mxu1 }
0x205f   : > { %4559 = vst.msk [vmem:[%s467_s27] sm:$0xff] %vm503_vm0, %v4552_v16  ;;  %v4555_v20 = vadd.f32 %v4534_v23, %v7041_v38  ;;  %v4526_v29 = vadd.f32 %v4770_v60, %v4525_v22 }
0x2060   : > { %v5325_v19 = vpop.f32.mrf.mxu1 }
0x2061   : > { %4562 = vst.msk [vmem:[%s467_s27 + $0x18] sm:$0xff] %vm503_vm0, %v4555_v20  ;;  %v4553_v28 = vadd.f32 %v4526_v29, %v7038_v36  ;;  %v4547_v50 = vadd.f32 %v5325_v19, %v4770_v60 }
0x2062   : > { %v4538_v47 = vpop.f32.mrf.mxu1 }
0x2063   : > { %4560 = vst.msk [vmem:[%s467_s27 + $0x8] sm:$0xff] %vm503_vm0, %v4553_v28  ;;  %v4558_v27 = vadd.f32 %v4547_v50, %v7066_v44  ;;  %v4539_v18 = vadd.f32 %v4770_v60, %v4538_v47 }
0x2064   : > { %v5326_v46 = vpop.f32.mrf.mxu1 }
0x2065   : > { %4565 = vst.msk [vmem:[%s467_s27 + $0x30] sm:$0xff] %vm503_vm0, %v4558_v27  ;;  %v4556_v49 = vadd.f32 %v4539_v18, %v7055_v10 }
0x2066   : > { %v4541_v7 = vpop.f32.mrf.mxu1 }
0x2067   : > { %4563 = vst.msk [vmem:[%s467_s27 + $0x20] sm:$0xff] %vm503_vm0, %v4556_v49  ;;  %v4542_v38 = vadd.f32 %v4770_v60, %v4541_v7 }
0x2069   : > { %v4557_v21 = vadd.f32 %v4542_v38, %v7063_v42 }
0x206b   : > { %4564 = vst.msk [vmem:[%s467_s27 + $0x28] sm:$0xff] %vm503_vm0, %v4557_v21 }
0x206c PF: > { %s24_s29 = sadd.s32 1, %s5765_s29  }
0x206d   : > { %p21_p4 = scmp.ge.s32.totalorder %s24_s29, 4  }
0x206f   :  { %23 = sbr.rel (!%p21_p4) target bundleno = 1 (0x1), region = 114 }

</bundles_post_ra>
